<compile_context>
chip_gen: v7x
topology: tpu7x:2x2x1
jax: 0.10.0
libtpu: 0.0.40
codegen_flags: <defaults>
</compile_context>

<pallas_src>
import functools

import jax
import jax.numpy as jnp
from jax.experimental import pallas as pl
from jax.experimental.pallas import tpu as pltpu

_BN_EPS = 1e-5


# ----------------------------------------------------------------------------- GELU
def _erf(x):
    # Abramowitz & Stegun 7.1.26 polynomial approximation of erf (|err| < 1.5e-7).
    a1, a2, a3, a4, a5 = 0.254829592, -0.284496736, 1.421413741, -1.453152027, 1.061405429
    p = 0.3275911
    s = jnp.where(x >= 0.0, 1.0, -1.0)
    ax = jnp.abs(x)
    t = 1.0 / (1.0 + p * ax)
    poly = ((((a5 * t + a4) * t + a3) * t + a2) * t + a1) * t
    return s * (1.0 - poly * jnp.exp(-ax * ax))


def _gelu(x):
    return 0.5 * x * (1.0 + _erf(x * 0.7071067811865476))


def _wrap_shift(t, shift):
    """Circular shift by +/-1 along the width axis (axis=1) via explicit slices."""
    if shift == 1:
        return jnp.concatenate([t[:, -1:, :], t[:, :-1, :]], axis=1)
    if shift == -1:
        return jnp.concatenate([t[:, 1:, :], t[:, :1, :]], axis=1)
    return t


# --------------------------------------------------------------- conv (+ batch stats)
def _conv_stats_kernel(x0_ref, x1_ref, x2_ref, w_ref, ss_ref, y_ref, stats_ref,
                       *, stride, in_h, apply_pre):
    """One output-row stripe of a cylindrical 3x3 conv, plus per-channel sum/sumsq.

    x{kh}_ref : (N, W, C)  [stride 1]  or (N, Wo, 2*C) [stride 2, (even|odd) columns
                packed on lanes] -- rows stride*h+kh-1 of the unpadded activation.
    w_ref     : (3, 3, C, Coutp) bf16, resident.
    ss_ref    : (2, C) f32 scale/shift of the *previous* BN+GELU (used iff apply_pre).
    y_ref     : (N, Wo, Coutp) f32 conv output stripe.
    stats_ref : (2, Coutp) f32 revisited accumulator: [sum, sum of squares].
    """
    h = pl.program_id(0)
    coutp = w_ref.shape[-1]
    cin = w_ref.shape[2]
    n, wo, _ = y_ref.shape
    rows = n * wo

    if apply_pre:
        scale = ss_ref[0:1, :]
        shift = ss_ref[1:2, :]

    acc = jnp.zeros((rows, coutp), jnp.float32)
    for kh, x_ref in enumerate((x0_ref, x1_ref, x2_ref)):
        s = x_ref[...]
        if stride == 1:
            cols = (s,)                                   # all width columns
        else:
            cols = (s[:, :, :cin], s[:, :, cin:])         # even / odd width columns

        proc = []
        for col in cols:
            c = col
            if apply_pre:
                # Previous layer's BN + GELU, fused here so the activated tensor
                # never round-trips through HBM.
                c = _gelu(c.astype(jnp.float32) * scale + shift)
            # Zero the rows that fall in the height zero-padding (index_map clamps).
            if kh == 0:
                c = c * (h > 0).astype(c.dtype)
            elif kh == 2:
                c = c * (stride * h + 2 <= in_h).astype(c.dtype)
            proc.append(c.astype(jnp.bfloat16))

        if stride == 1:
            t = proc[0]
            wins = (_wrap_shift(t, 1), t, _wrap_shift(t, -1))
        else:
            even, odd = proc
            wins = (_wrap_shift(odd, 1), even, odd)

        for kw in range(3):
            acc = acc + jnp.dot(wins[kw].reshape(rows, cin), w_ref[kh, kw],
                                preferred_element_type=jnp.float32)

    y_ref[...] = acc.reshape(y_ref.shape)

    @pl.when(h == 0)
    def _init():
        stats_ref[...] = jnp.zeros_like(stats_ref)

    stats_ref[0:1, :] += jnp.sum(acc, axis=0, keepdims=True)
    stats_ref[1:2, :] += jnp.sum(acc * acc, axis=0, keepdims=True)


def _conv_and_stats(x, w, pre_ss, *, stride):
    """Cylindrical 3x3 conv (stride 1 or 2) + per-channel batch statistics."""
    N, H, W, C = x.shape
    coutp = w.shape[-1]
    Ho = (H - 1) // stride + 1
    Wo = (W - 1) // stride + 1

    if stride == 2:
        assert W % 2 == 0, "stride-2 cylindrical conv expects an even width"
        xk = x.reshape(N, H, Wo, 2 * C)        # free reshape: pack (even, odd) cols on lanes
        blk_w, blk_c = Wo, 2 * C
    else:
        xk = x
        blk_w, blk_c = W, C

    apply_pre = pre_ss is not None
    if pre_ss is None:
        pre_ss = jnp.zeros((2, C), jnp.float32)

    def slab_spec(kh):
        def idx(hh):
            r = jnp.minimum(jnp.maximum(stride * hh + kh - 1, 0), H - 1)
            return (0, r, 0, 0)
        return pl.BlockSpec((N, None, blk_w, blk_c), idx)

    kern = functools.partial(_conv_stats_kernel, stride=stride, in_h=H,
                             apply_pre=apply_pre)

    y, stats = pl.pallas_call(
        kern,
        out_shape=(jax.ShapeDtypeStruct((N, Ho, Wo, coutp), jnp.float32),
                   jax.ShapeDtypeStruct((2, coutp), jnp.float32)),
        grid=(Ho,),
        in_specs=[slab_spec(0), slab_spec(1), slab_spec(2),
                  pl.BlockSpec((3, 3, C, coutp), lambda hh: (0, 0, 0, 0)),
                  pl.BlockSpec((2, C), lambda hh: (0, 0))],
        out_specs=(pl.BlockSpec((N, None, Wo, coutp), lambda hh: (0, hh, 0, 0)),
                   pl.BlockSpec((2, coutp), lambda hh: (0, 0))),
        compiler_params=pltpu.CompilerParams(
            dimension_semantics=("arbitrary",)),   # stats accumulate across the grid
    )(xk, xk, xk, w, pre_ss)
    return y, stats


# -------------------------------------------------------------- final BN + GELU pass
def _bn_gelu_kernel(y_ref, ss_ref, o_ref):
    scale = ss_ref[0:1, :]
    shift = ss_ref[1:2, :]
    o_ref[...] = _gelu(y_ref[...] * scale + shift)


def _bn_gelu(y2d, ss):
    M, cp = y2d.shape
    tm = M if M <= 2048 else 2048
    return pl.pallas_call(
        _bn_gelu_kernel,
        out_shape=jax.ShapeDtypeStruct((M, cp), jnp.float32),
        grid=(pl.cdiv(M, tm),),
        in_specs=[pl.BlockSpec((tm, cp), lambda i: (i, 0)),
                  pl.BlockSpec((2, cp), lambda i: (0, 0))],
        out_specs=pl.BlockSpec((tm, cp), lambda i: (i, 0)),
        compiler_params=pltpu.CompilerParams(
            dimension_semantics=("parallel",)),
    )(y2d, ss)


# ------------------------------------------------------------------------- wrappers
def _round_up(x, m):
    return ((x + m - 1) // m) * m


def _pad_channels(v, n, fill):
    pad = n - v.shape[0]
    if pad == 0:
        return v
    return jnp.concatenate([v, jnp.full((pad,), fill, v.dtype)])


def _prep_weight(w, coutp, in_pad=None):
    # torch conv weight (Cout, Cin, KH, KW) -> (KH, KW, Cin[pad], Coutp), zero-padded, bf16.
    wt = jnp.transpose(w, (2, 3, 1, 0)).astype(jnp.float32)
    _, _, cin, cout = wt.shape
    cin_p = in_pad if in_pad is not None else cin
    wt = jnp.pad(wt, ((0, 0), (0, 0), (0, cin_p - cin), (0, coutp - cout)))
    return wt.astype(jnp.bfloat16)


def _bn_scale_shift(stats, count, gamma, beta, coutp):
    # Fold training-mode BatchNorm (biased variance) into a single scale/shift FMA.
    mean = stats[0] / count
    var = jnp.maximum(stats[1] / count - mean * mean, 0.0)
    g = _pad_channels(gamma.astype(jnp.float32), coutp, 1.0)
    b = _pad_channels(beta.astype(jnp.float32), coutp, 0.0)
    scale = g * jax.lax.rsqrt(var + _BN_EPS)
    shift = b - mean * scale
    return jnp.stack([scale, shift]).astype(jnp.float32)


def down_forward(x_nchw, params):
    """Forward of Down(in_channels, out_channels, film=False, down=True, attn=False)."""
    x = jnp.transpose(x_nchw, (0, 2, 3, 1)).astype(jnp.float32)   # NCHW -> NHWC
    N, H, W, _ = x.shape
    cout = params["w1"].shape[0]
    coutp = _round_up(cout, 128)                                  # lane-dense channels

    w1 = _prep_weight(params["w1"], coutp)
    w2 = _prep_weight(params["w2"], coutp, in_pad=coutp)

    # NOTE: conv biases b1/b2 are *not* applied: they cancel exactly against the
    # training-mode BatchNorm mean subtraction that immediately follows each conv.

    # conv_1 (stride 1) + batch statistics.
    y1, s1 = _conv_and_stats(x.astype(jnp.bfloat16), w1, None, stride=1)
    ss1 = _bn_scale_shift(s1, N * H * W, params["bn1_gamma"], params["bn1_beta"], coutp)

    # bn_1 + GELU fused into conv_2's kernel; conv_2 (stride 2) + batch statistics.
    y2, s2 = _conv_and_stats(y1, w2, ss1, stride=2)
    n2, ho2, wo2, _ = y2.shape
    ss2 = _bn_scale_shift(s2, n2 * ho2 * wo2, params["bn2_gamma"], params["bn2_beta"], coutp)

    # bn_2 + GELU (lane-dense tiled elementwise pass).
    out = _bn_gelu(y2.reshape(-1, coutp), ss2)
    out = out.reshape(n2, ho2, wo2, coutp)[..., :cout]
    return jnp.transpose(out, (0, 3, 1, 2))                       # NHWC -> NCHW


def init_params(key, in_channels, out_channels):
    k1, k2, k3, k4 = jax.random.split(key, 4)
    fan1 = in_channels * 9
    fan2 = out_channels * 9
    return {
        "w1": jax.random.normal(k1, (out_channels, in_channels, 3, 3), jnp.float32) / jnp.sqrt(fan1),
        "b1": jax.random.normal(k2, (out_channels,), jnp.float32) * 0.01,
        "w2": jax.random.normal(k3, (out_channels, out_channels, 3, 3), jnp.float32) / jnp.sqrt(fan2),
        "b2": jax.random.normal(k4, (out_channels,), jnp.float32) * 0.01,
        # BatchNorm2d default init: weight=1, bias=0.
        "bn1_gamma": jnp.ones((out_channels,), jnp.float32),
        "bn1_beta": jnp.zeros((out_channels,), jnp.float32),
        "bn2_gamma": jnp.ones((out_channels,), jnp.float32),
        "bn2_beta": jnp.zeros((out_channels,), jnp.float32),
    }


# ----------------------------------------------------------------- pure-JAX reference
def _reference_down(x_nchw, params):
    x = jnp.transpose(x_nchw, (0, 2, 3, 1)).astype(jnp.float32)

    def cyl_conv(a, w, b, stride):
        a = jnp.pad(a, ((0, 0), (1, 1), (0, 0), (0, 0)))                     # zero pad H
        a = jnp.concatenate([a[:, :, -1:, :], a, a[:, :, :1, :]], axis=2)    # wrap W
        y = jax.lax.conv_general_dilated(
            a, jnp.transpose(w, (2, 3, 1, 0)),
            window_strides=(stride, stride), padding="VALID",
            dimension_numbers=("NHWC", "HWIO", "NHWC"))
        return y + b

    def bn_gelu(y, g, bta):
        m = jnp.mean(y, axis=(0, 1, 2))
        v = jnp.mean(jnp.square(y - m), axis=(0, 1, 2))
        return _gelu(g * (y - m) * jax.lax.rsqrt(v + _BN_EPS) + bta)

    y = bn_gelu(cyl_conv(x, params["w1"], params["b1"], 1),
                params["bn1_gamma"], params["bn1_beta"])
    y = bn_gelu(cyl_conv(y, params["w2"], params["b2"], 2),
                params["bn2_gamma"], params["bn2_beta"])
    return jnp.transpose(y, (0, 3, 1, 2))


if __name__ == "__main__":
    key = jax.random.PRNGKey(0)
    kx, kp = jax.random.split(key)

    batch, cin, cout, h, w = 2, 4, 8, 16, 16
    x = jax.random.normal(kx, (batch, cin, h, w), jnp.float32)   # NCHW, like PyTorch
    params = init_params(kp, cin, cout)

    out = jax.jit(down_forward)(x, params)
    out = jax.block_until_ready(out)

    assert out.shape == (batch, cout, h // 2, w // 2), out.shape
    assert bool(jnp.all(jnp.isfinite(out)))

    ref = _reference_down(x, params)
    max_err = float(jnp.max(jnp.abs(out - ref)))
    # bf16 MXU operands (per the perf review) -> small drift vs. the f32 reference.
    assert max_err < 1e-1, max_err

    print("KERNEL_OK")
</pallas_src>

<mosaic_0001>
module attributes {stable_mosaic.version = 11 : i64} {
  func.func @_conv_stats_kernel(%arg0: i32, %arg1: memref<2x1x16x4xbf16, #tpu.memory_space<vmem>>, %arg2: memref<2x1x16x4xbf16, #tpu.memory_space<vmem>>, %arg3: memref<2x1x16x4xbf16, #tpu.memory_space<vmem>>, %arg4: memref<3x3x4x128xbf16, #tpu.memory_space<vmem>>, %arg5: memref<2x4xf32, #tpu.memory_space<vmem>>, %arg6: memref<2x1x16x128xf32, #tpu.memory_space<vmem>>, %arg7: memref<2x128xf32, #tpu.memory_space<vmem>>) attributes {dimension_semantics = [#tpu.dimension_semantics<arbitrary>], iteration_bounds = array<i64: 16>, scalar_prefetch = 0 : i64, scratch_operands = 0 : i64, tpu.core_type = #tpu.core_type<tc>, window_params = [{transform_indices = @transform_0, window_bounds = array<i64: 2, 1, 16, 4>}, {transform_indices = @transform_1, window_bounds = array<i64: 2, 1, 16, 4>}, {transform_indices = @transform_2, window_bounds = array<i64: 2, 1, 16, 4>}, {pipeline_mode = #tpu.pipeline_mode<synchronous>, transform_indices = @transform_3, window_bounds = array<i64: 3, 3, 4, 128>}, {pipeline_mode = #tpu.pipeline_mode<synchronous>, transform_indices = @transform_4, window_bounds = array<i64: 2, 4>}, {transform_indices = @transform_5, window_bounds = array<i64: 2, 1, 16, 128>}, {pipeline_mode = #tpu.pipeline_mode<synchronous>, transform_indices = @transform_6, window_bounds = array<i64: 2, 128>}]} {
    %cst = arith.constant 0.000000e+00 : f32
    %0 = vector.broadcast %cst : f32 to vector<32x128xf32>
    %c0 = arith.constant 0 : index
    %c0_0 = arith.constant 0 : index
    %c0_1 = arith.constant 0 : index
    %c0_2 = arith.constant 0 : index
    %1 = vector.load %arg1[%c0, %c0_0, %c0_1, %c0_2] : memref<2x1x16x4xbf16, #tpu.memory_space<vmem>>, vector<2x1x16x4xbf16>
    %2 = vector.shape_cast %1 : vector<2x1x16x4xbf16> to vector<2x16x4xbf16>
    %c0_i32 = arith.constant 0 : i32
    %3 = arith.cmpi sgt, %arg0, %c0_i32 : i32
    %4 = arith.extui %3 : i1 to i32
    %5 = arith.sitofp %4 : i32 to f32
    %6 = arith.truncf %5 : f32 to bf16
    %7 = vector.broadcast %6 : bf16 to vector<2x16x4xbf16>
    %8 = arith.mulf %2, %7 : vector<2x16x4xbf16>
    %9 = vector.extract_strided_slice %8 {offsets = [0, 15, 0], sizes = [2, 1, 4], strides = [1, 1, 1]} : vector<2x16x4xbf16> to vector<2x1x4xbf16>
    %10 = vector.extract_strided_slice %8 {offsets = [0, 0, 0], sizes = [2, 15, 4], strides = [1, 1, 1]} : vector<2x16x4xbf16> to vector<2x15x4xbf16>
    %11 = tpu.concatenate %9, %10 in 1 : vector<2x1x4xbf16>, vector<2x15x4xbf16> -> vector<2x16x4xbf16>
    %12 = vector.extract_strided_slice %8 {offsets = [0, 1, 0], sizes = [2, 15, 4], strides = [1, 1, 1]} : vector<2x16x4xbf16> to vector<2x15x4xbf16>
    %13 = vector.extract_strided_slice %8 {offsets = [0, 0, 0], sizes = [2, 1, 4], strides = [1, 1, 1]} : vector<2x16x4xbf16> to vector<2x1x4xbf16>
    %14 = tpu.concatenate %12, %13 in 1 : vector<2x15x4xbf16>, vector<2x1x4xbf16> -> vector<2x16x4xbf16>
    %15 = vector.shape_cast %11 : vector<2x16x4xbf16> to vector<32x4xbf16>
    %c0_3 = arith.constant 0 : index
    %c0_4 = arith.constant 0 : index
    %c0_5 = arith.constant 0 : index
    %c0_6 = arith.constant 0 : index
    %16 = vector.load %arg4[%c0_3, %c0_4, %c0_5, %c0_6] : memref<3x3x4x128xbf16, #tpu.memory_space<vmem>>, vector<1x1x4x128xbf16>
    %17 = vector.shape_cast %16 : vector<1x1x4x128xbf16> to vector<4x128xbf16>
    %cst_7 = arith.constant dense<0.000000e+00> : vector<32x128xf32>
    %18 = tpu.matmul %15, %17, %cst_7 {dimension_numbers = #tpu.dot_dimension_numbers<[1], [0], [0], [1], [0, 0, 1, 1], [], []>} : vector<32x4xbf16>, vector<4x128xbf16>, vector<32x128xf32> -> vector<32x128xf32>
    %19 = arith.addf %0, %18 : vector<32x128xf32>
    %20 = vector.shape_cast %8 : vector<2x16x4xbf16> to vector<32x4xbf16>
    %c0_8 = arith.constant 0 : index
    %c1 = arith.constant 1 : index
    %c0_9 = arith.constant 0 : index
    %c0_10 = arith.constant 0 : index
    %21 = vector.load %arg4[%c0_8, %c1, %c0_9, %c0_10] : memref<3x3x4x128xbf16, #tpu.memory_space<vmem>>, vector<1x1x4x128xbf16>
    %22 = vector.shape_cast %21 : vector<1x1x4x128xbf16> to vector<4x128xbf16>
    %cst_11 = arith.constant dense<0.000000e+00> : vector<32x128xf32>
    %23 = tpu.matmul %20, %22, %cst_11 {dimension_numbers = #tpu.dot_dimension_numbers<[1], [0], [0], [1], [0, 0, 1, 1], [], []>} : vector<32x4xbf16>, vector<4x128xbf16>, vector<32x128xf32> -> vector<32x128xf32>
    %24 = arith.addf %19, %23 : vector<32x128xf32>
    %25 = vector.shape_cast %14 : vector<2x16x4xbf16> to vector<32x4xbf16>
    %c0_12 = arith.constant 0 : index
    %c2 = arith.constant 2 : index
    %c0_13 = arith.constant 0 : index
    %c0_14 = arith.constant 0 : index
    %26 = vector.load %arg4[%c0_12, %c2, %c0_13, %c0_14] : memref<3x3x4x128xbf16, #tpu.memory_space<vmem>>, vector<1x1x4x128xbf16>
    %27 = vector.shape_cast %26 : vector<1x1x4x128xbf16> to vector<4x128xbf16>
    %cst_15 = arith.constant dense<0.000000e+00> : vector<32x128xf32>
    %28 = tpu.matmul %25, %27, %cst_15 {dimension_numbers = #tpu.dot_dimension_numbers<[1], [0], [0], [1], [0, 0, 1, 1], [], []>} : vector<32x4xbf16>, vector<4x128xbf16>, vector<32x128xf32> -> vector<32x128xf32>
    %29 = arith.addf %24, %28 : vector<32x128xf32>
    %c0_16 = arith.constant 0 : index
    %c0_17 = arith.constant 0 : index
    %c0_18 = arith.constant 0 : index
    %c0_19 = arith.constant 0 : index
    %30 = vector.load %arg2[%c0_16, %c0_17, %c0_18, %c0_19] : memref<2x1x16x4xbf16, #tpu.memory_space<vmem>>, vector<2x1x16x4xbf16>
    %31 = vector.shape_cast %30 : vector<2x1x16x4xbf16> to vector<2x16x4xbf16>
    %32 = vector.extract_strided_slice %31 {offsets = [0, 15, 0], sizes = [2, 1, 4], strides = [1, 1, 1]} : vector<2x16x4xbf16> to vector<2x1x4xbf16>
    %33 = vector.extract_strided_slice %31 {offsets = [0, 0, 0], sizes = [2, 15, 4], strides = [1, 1, 1]} : vector<2x16x4xbf16> to vector<2x15x4xbf16>
    %34 = tpu.concatenate %32, %33 in 1 : vector<2x1x4xbf16>, vector<2x15x4xbf16> -> vector<2x16x4xbf16>
    %35 = vector.extract_strided_slice %31 {offsets = [0, 1, 0], sizes = [2, 15, 4], strides = [1, 1, 1]} : vector<2x16x4xbf16> to vector<2x15x4xbf16>
    %36 = vector.extract_strided_slice %31 {offsets = [0, 0, 0], sizes = [2, 1, 4], strides = [1, 1, 1]} : vector<2x16x4xbf16> to vector<2x1x4xbf16>
    %37 = tpu.concatenate %35, %36 in 1 : vector<2x15x4xbf16>, vector<2x1x4xbf16> -> vector<2x16x4xbf16>
    %38 = vector.shape_cast %34 : vector<2x16x4xbf16> to vector<32x4xbf16>
    %c1_20 = arith.constant 1 : index
    %c0_21 = arith.constant 0 : index
    %c0_22 = arith.constant 0 : index
    %c0_23 = arith.constant 0 : index
    %39 = vector.load %arg4[%c1_20, %c0_21, %c0_22, %c0_23] : memref<3x3x4x128xbf16, #tpu.memory_space<vmem>>, vector<1x1x4x128xbf16>
    %40 = vector.shape_cast %39 : vector<1x1x4x128xbf16> to vector<4x128xbf16>
    %cst_24 = arith.constant dense<0.000000e+00> : vector<32x128xf32>
    %41 = tpu.matmul %38, %40, %cst_24 {dimension_numbers = #tpu.dot_dimension_numbers<[1], [0], [0], [1], [0, 0, 1, 1], [], []>} : vector<32x4xbf16>, vector<4x128xbf16>, vector<32x128xf32> -> vector<32x128xf32>
    %42 = arith.addf %29, %41 : vector<32x128xf32>
    %43 = vector.shape_cast %31 : vector<2x16x4xbf16> to vector<32x4xbf16>
    %c1_25 = arith.constant 1 : index
    %c1_26 = arith.constant 1 : index
    %c0_27 = arith.constant 0 : index
    %c0_28 = arith.constant 0 : index
    %44 = vector.load %arg4[%c1_25, %c1_26, %c0_27, %c0_28] : memref<3x3x4x128xbf16, #tpu.memory_space<vmem>>, vector<1x1x4x128xbf16>
    %45 = vector.shape_cast %44 : vector<1x1x4x128xbf16> to vector<4x128xbf16>
    %cst_29 = arith.constant dense<0.000000e+00> : vector<32x128xf32>
    %46 = tpu.matmul %43, %45, %cst_29 {dimension_numbers = #tpu.dot_dimension_numbers<[1], [0], [0], [1], [0, 0, 1, 1], [], []>} : vector<32x4xbf16>, vector<4x128xbf16>, vector<32x128xf32> -> vector<32x128xf32>
    %47 = arith.addf %42, %46 : vector<32x128xf32>
    %48 = vector.shape_cast %37 : vector<2x16x4xbf16> to vector<32x4xbf16>
    %c1_30 = arith.constant 1 : index
    %c2_31 = arith.constant 2 : index
    %c0_32 = arith.constant 0 : index
    %c0_33 = arith.constant 0 : index
    %49 = vector.load %arg4[%c1_30, %c2_31, %c0_32, %c0_33] : memref<3x3x4x128xbf16, #tpu.memory_space<vmem>>, vector<1x1x4x128xbf16>
    %50 = vector.shape_cast %49 : vector<1x1x4x128xbf16> to vector<4x128xbf16>
    %cst_34 = arith.constant dense<0.000000e+00> : vector<32x128xf32>
    %51 = tpu.matmul %48, %50, %cst_34 {dimension_numbers = #tpu.dot_dimension_numbers<[1], [0], [0], [1], [0, 0, 1, 1], [], []>} : vector<32x4xbf16>, vector<4x128xbf16>, vector<32x128xf32> -> vector<32x128xf32>
    %52 = arith.addf %47, %51 : vector<32x128xf32>
    %c0_35 = arith.constant 0 : index
    %c0_36 = arith.constant 0 : index
    %c0_37 = arith.constant 0 : index
    %c0_38 = arith.constant 0 : index
    %53 = vector.load %arg3[%c0_35, %c0_36, %c0_37, %c0_38] : memref<2x1x16x4xbf16, #tpu.memory_space<vmem>>, vector<2x1x16x4xbf16>
    %54 = vector.shape_cast %53 : vector<2x1x16x4xbf16> to vector<2x16x4xbf16>
    %c1_i32 = arith.constant 1 : i32
    %55 = arith.muli %c1_i32, %arg0 : i32
    %c2_i32 = arith.constant 2 : i32
    %56 = arith.addi %55, %c2_i32 : i32
    %c16_i32 = arith.constant 16 : i32
    %57 = arith.cmpi sle, %56, %c16_i32 : i32
    %58 = arith.extui %57 : i1 to i32
    %59 = arith.sitofp %58 : i32 to f32
    %60 = arith.truncf %59 : f32 to bf16
    %61 = vector.broadcast %60 : bf16 to vector<2x16x4xbf16>
    %62 = arith.mulf %54, %61 : vector<2x16x4xbf16>
    %63 = vector.extract_strided_slice %62 {offsets = [0, 15, 0], sizes = [2, 1, 4], strides = [1, 1, 1]} : vector<2x16x4xbf16> to vector<2x1x4xbf16>
    %64 = vector.extract_strided_slice %62 {offsets = [0, 0, 0], sizes = [2, 15, 4], strides = [1, 1, 1]} : vector<2x16x4xbf16> to vector<2x15x4xbf16>
    %65 = tpu.concatenate %63, %64 in 1 : vector<2x1x4xbf16>, vector<2x15x4xbf16> -> vector<2x16x4xbf16>
    %66 = vector.extract_strided_slice %62 {offsets = [0, 1, 0], sizes = [2, 15, 4], strides = [1, 1, 1]} : vector<2x16x4xbf16> to vector<2x15x4xbf16>
    %67 = vector.extract_strided_slice %62 {offsets = [0, 0, 0], sizes = [2, 1, 4], strides = [1, 1, 1]} : vector<2x16x4xbf16> to vector<2x1x4xbf16>
    %68 = tpu.concatenate %66, %67 in 1 : vector<2x15x4xbf16>, vector<2x1x4xbf16> -> vector<2x16x4xbf16>
    %69 = vector.shape_cast %65 : vector<2x16x4xbf16> to vector<32x4xbf16>
    %c2_39 = arith.constant 2 : index
    %c0_40 = arith.constant 0 : index
    %c0_41 = arith.constant 0 : index
    %c0_42 = arith.constant 0 : index
    %70 = vector.load %arg4[%c2_39, %c0_40, %c0_41, %c0_42] : memref<3x3x4x128xbf16, #tpu.memory_space<vmem>>, vector<1x1x4x128xbf16>
    %71 = vector.shape_cast %70 : vector<1x1x4x128xbf16> to vector<4x128xbf16>
    %cst_43 = arith.constant dense<0.000000e+00> : vector<32x128xf32>
    %72 = tpu.matmul %69, %71, %cst_43 {dimension_numbers = #tpu.dot_dimension_numbers<[1], [0], [0], [1], [0, 0, 1, 1], [], []>} : vector<32x4xbf16>, vector<4x128xbf16>, vector<32x128xf32> -> vector<32x128xf32>
    %73 = arith.addf %52, %72 : vector<32x128xf32>
    %74 = vector.shape_cast %62 : vector<2x16x4xbf16> to vector<32x4xbf16>
    %c2_44 = arith.constant 2 : index
    %c1_45 = arith.constant 1 : index
    %c0_46 = arith.constant 0 : index
    %c0_47 = arith.constant 0 : index
    %75 = vector.load %arg4[%c2_44, %c1_45, %c0_46, %c0_47] : memref<3x3x4x128xbf16, #tpu.memory_space<vmem>>, vector<1x1x4x128xbf16>
    %76 = vector.shape_cast %75 : vector<1x1x4x128xbf16> to vector<4x128xbf16>
    %cst_48 = arith.constant dense<0.000000e+00> : vector<32x128xf32>
    %77 = tpu.matmul %74, %76, %cst_48 {dimension_numbers = #tpu.dot_dimension_numbers<[1], [0], [0], [1], [0, 0, 1, 1], [], []>} : vector<32x4xbf16>, vector<4x128xbf16>, vector<32x128xf32> -> vector<32x128xf32>
    %78 = arith.addf %73, %77 : vector<32x128xf32>
    %79 = vector.shape_cast %68 : vector<2x16x4xbf16> to vector<32x4xbf16>
    %c2_49 = arith.constant 2 : index
    %c2_50 = arith.constant 2 : index
    %c0_51 = arith.constant 0 : index
    %c0_52 = arith.constant 0 : index
    %80 = vector.load %arg4[%c2_49, %c2_50, %c0_51, %c0_52] : memref<3x3x4x128xbf16, #tpu.memory_space<vmem>>, vector<1x1x4x128xbf16>
    %81 = vector.shape_cast %80 : vector<1x1x4x128xbf16> to vector<4x128xbf16>
    %cst_53 = arith.constant dense<0.000000e+00> : vector<32x128xf32>
    %82 = tpu.matmul %79, %81, %cst_53 {dimension_numbers = #tpu.dot_dimension_numbers<[1], [0], [0], [1], [0, 0, 1, 1], [], []>} : vector<32x4xbf16>, vector<4x128xbf16>, vector<32x128xf32> -> vector<32x128xf32>
    %83 = arith.addf %78, %82 : vector<32x128xf32>
    %84 = vector.shape_cast %83 : vector<32x128xf32> to vector<2x16x128xf32>
    %c0_54 = arith.constant 0 : index
    %c0_55 = arith.constant 0 : index
    %c0_56 = arith.constant 0 : index
    %c0_57 = arith.constant 0 : index
    %85 = vector.load %arg6[%c0_54, %c0_55, %c0_56, %c0_57] : memref<2x1x16x128xf32, #tpu.memory_space<vmem>>, vector<2x1x16x128xf32>
    %86 = vector.shape_cast %85 : vector<2x1x16x128xf32> to vector<2x16x128xf32>
    %87 = vector.shape_cast %84 : vector<2x16x128xf32> to vector<2x1x16x128xf32>
    tpu.vector_store %arg6[%c0_54, %c0_55, %c0_56, %c0_57], %87 {strides = array<i32>} : memref<2x1x16x128xf32, #tpu.memory_space<vmem>>, vector<2x1x16x128xf32>,
    %c0_i32_58 = arith.constant 0 : i32
    %88 = arith.cmpi eq, %arg0, %c0_i32_58 : i32
    %89 = arith.extui %88 : i1 to i32
    %c0_i32_59 = arith.constant 0 : i32
    %90 = arith.cmpi ne, %89, %c0_i32_59 : i32
    scf.if %90 {
      %cst_70 = arith.constant 0.000000e+00 : f32
      %102 = vector.broadcast %cst_70 : f32 to vector<2x128xf32>
      %c0_71 = arith.constant 0 : index
      %c0_72 = arith.constant 0 : index
      %103 = vector.load %arg7[%c0_71, %c0_72] : memref<2x128xf32, #tpu.memory_space<vmem>>, vector<2x128xf32>
      tpu.vector_store %arg7[%c0_71, %c0_72], %102 {strides = array<i32>} : memref<2x128xf32, #tpu.memory_space<vmem>>, vector<2x128xf32>,
    } else {
    }
    %c0_60 = arith.constant 0 : index
    %c0_61 = arith.constant 0 : index
    %91 = vector.load %arg7[%c0_60, %c0_61] : memref<2x128xf32, #tpu.memory_space<vmem>>, vector<1x128xf32>
    %cst_62 = arith.constant dense<0.000000e+00> : vector<128xf32>
    %92 = vector.multi_reduction <add>, %83, %cst_62 [0] : vector<32x128xf32> to vector<128xf32>
    %93 = vector.shape_cast %92 : vector<128xf32> to vector<1x128xf32>
    %94 = arith.addf %91, %93 : vector<1x128xf32>
    %c0_63 = arith.constant 0 : index
    %c0_64 = arith.constant 0 : index
    %95 = vector.load %arg7[%c0_63, %c0_64] : memref<2x128xf32, #tpu.memory_space<vmem>>, vector<1x128xf32>
    tpu.vector_store %arg7[%c0_63, %c0_64], %94 {strides = array<i32>} : memref<2x128xf32, #tpu.memory_space<vmem>>, vector<1x128xf32>,
    %c1_65 = arith.constant 1 : index
    %c0_66 = arith.constant 0 : index
    %96 = vector.load %arg7[%c1_65, %c0_66] : memref<2x128xf32, #tpu.memory_space<vmem>>, vector<1x128xf32>
    %97 = arith.mulf %83, %83 : vector<32x128xf32>
    %cst_67 = arith.constant dense<0.000000e+00> : vector<128xf32>
    %98 = vector.multi_reduction <add>, %97, %cst_67 [0] : vector<32x128xf32> to vector<128xf32>
    %99 = vector.shape_cast %98 : vector<128xf32> to vector<1x128xf32>
    %100 = arith.addf %96, %99 : vector<1x128xf32>
    %c1_68 = arith.constant 1 : index
    %c0_69 = arith.constant 0 : index
    %101 = vector.load %arg7[%c1_68, %c0_69] : memref<2x128xf32, #tpu.memory_space<vmem>>, vector<1x128xf32>
    tpu.vector_store %arg7[%c1_68, %c0_69], %100 {strides = array<i32>} : memref<2x128xf32, #tpu.memory_space<vmem>>, vector<1x128xf32>,
    return
  }
  func.func @transform_0(%arg0: i32) -> (i32, i32, i32, i32) {
    %c1_i32 = arith.constant 1 : i32
    %0 = arith.muli %c1_i32, %arg0 : i32
    %c0_i32 = arith.constant 0 : i32
    %1 = arith.addi %0, %c0_i32 : i32
    %c1_i32_0 = arith.constant 1 : i32
    %2 = arith.subi %1, %c1_i32_0 : i32
    %c0_i32_1 = arith.constant 0 : i32
    %3 = arith.maxsi %2, %c0_i32_1 : i32
    %c15_i32 = arith.constant 15 : i32
    %4 = arith.minsi %3, %c15_i32 : i32
    %c0_i32_2 = arith.constant 0 : i32
    %c0_i32_3 = arith.constant 0 : i32
    %c0_i32_4 = arith.constant 0 : i32
    %c0_i32_5 = arith.constant 0 : i32
    return %c0_i32_2, %4, %c0_i32_3, %c0_i32_4 : i32, i32, i32, i32
  }
  func.func @transform_1(%arg0: i32) -> (i32, i32, i32, i32) {
    %c1_i32 = arith.constant 1 : i32
    %0 = arith.muli %c1_i32, %arg0 : i32
    %c1_i32_0 = arith.constant 1 : i32
    %1 = arith.addi %0, %c1_i32_0 : i32
    %c1_i32_1 = arith.constant 1 : i32
    %2 = arith.subi %1, %c1_i32_1 : i32
    %c0_i32 = arith.constant 0 : i32
    %3 = arith.maxsi %2, %c0_i32 : i32
    %c15_i32 = arith.constant 15 : i32
    %4 = arith.minsi %3, %c15_i32 : i32
    %c0_i32_2 = arith.constant 0 : i32
    %c0_i32_3 = arith.constant 0 : i32
    %c0_i32_4 = arith.constant 0 : i32
    %c0_i32_5 = arith.constant 0 : i32
    return %c0_i32_2, %4, %c0_i32_3, %c0_i32_4 : i32, i32, i32, i32
  }
  func.func @transform_2(%arg0: i32) -> (i32, i32, i32, i32) {
    %c1_i32 = arith.constant 1 : i32
    %0 = arith.muli %c1_i32, %arg0 : i32
    %c2_i32 = arith.constant 2 : i32
    %1 = arith.addi %0, %c2_i32 : i32
    %c1_i32_0 = arith.constant 1 : i32
    %2 = arith.subi %1, %c1_i32_0 : i32
    %c0_i32 = arith.constant 0 : i32
    %3 = arith.maxsi %2, %c0_i32 : i32
    %c15_i32 = arith.constant 15 : i32
    %4 = arith.minsi %3, %c15_i32 : i32
    %c0_i32_1 = arith.constant 0 : i32
    %c0_i32_2 = arith.constant 0 : i32
    %c0_i32_3 = arith.constant 0 : i32
    %c0_i32_4 = arith.constant 0 : i32
    return %c0_i32_1, %4, %c0_i32_2, %c0_i32_3 : i32, i32, i32, i32
  }
  func.func @transform_3(%arg0: i32) -> (i32, i32, i32, i32) {
    %c0_i32 = arith.constant 0 : i32
    %c0_i32_0 = arith.constant 0 : i32
    %c0_i32_1 = arith.constant 0 : i32
    %c0_i32_2 = arith.constant 0 : i32
    %c0_i32_3 = arith.constant 0 : i32
    return %c0_i32, %c0_i32_0, %c0_i32_1, %c0_i32_2 : i32, i32, i32, i32
  }
  func.func @transform_4(%arg0: i32) -> (i32, i32) {
    %c0_i32 = arith.constant 0 : i32
    %c0_i32_0 = arith.constant 0 : i32
    %c0_i32_1 = arith.constant 0 : i32
    return %c0_i32, %c0_i32_0 : i32, i32
  }
  func.func @transform_5(%arg0: i32) -> (i32, i32, i32, i32) {
    %c0_i32 = arith.constant 0 : i32
    %c0_i32_0 = arith.constant 0 : i32
    %c0_i32_1 = arith.constant 0 : i32
    %c0_i32_2 = arith.constant 0 : i32
    return %c0_i32, %arg0, %c0_i32_0, %c0_i32_1 : i32, i32, i32, i32
  }
  func.func @transform_6(%arg0: i32) -> (i32, i32) {
    %c0_i32 = arith.constant 0 : i32
    %c0_i32_0 = arith.constant 0 : i32
    %c0_i32_1 = arith.constant 0 : i32
    return %c0_i32, %c0_i32_0 : i32, i32
  }
}

module attributes {stable_mosaic.version = 11 : i64} {
  func.func @_bn_gelu_kernel(%arg0: i32, %arg1: memref<128x128xf32, #tpu.memory_space<vmem>>, %arg2: memref<2x128xf32, #tpu.memory_space<vmem>>, %arg3: memref<128x128xf32, #tpu.memory_space<vmem>>) attributes {dimension_semantics = [#tpu.dimension_semantics<parallel>], iteration_bounds = array<i64: 1>, scalar_prefetch = 0 : i64, scratch_operands = 0 : i64, tpu.core_type = #tpu.core_type<tc>, window_params = [{transform_indices = @transform_0, window_bounds = array<i64: 128, 128>}, {pipeline_mode = #tpu.pipeline_mode<synchronous>, transform_indices = @transform_1, window_bounds = array<i64: 2, 128>}, {transform_indices = @transform_2, window_bounds = array<i64: 128, 128>}]} {
    %c0 = arith.constant 0 : index
    %c0_0 = arith.constant 0 : index
    %0 = vector.load %arg2[%c0, %c0_0] : memref<2x128xf32, #tpu.memory_space<vmem>>, vector<1x128xf32>
    %c1 = arith.constant 1 : index
    %c0_1 = arith.constant 0 : index
    %1 = vector.load %arg2[%c1, %c0_1] : memref<2x128xf32, #tpu.memory_space<vmem>>, vector<1x128xf32>
    %c0_2 = arith.constant 0 : index
    %c0_3 = arith.constant 0 : index
    %2 = vector.load %arg1[%c0_2, %c0_3] : memref<128x128xf32, #tpu.memory_space<vmem>>, vector<128x128xf32>
    %3 = vector.broadcast %0 : vector<1x128xf32> to vector<128x128xf32>
    %4 = arith.mulf %2, %3 : vector<128x128xf32>
    %5 = vector.broadcast %1 : vector<1x128xf32> to vector<128x128xf32>
    %6 = arith.addf %4, %5 : vector<128x128xf32>
    %cst = arith.constant 5.000000e-01 : f32
    %7 = vector.broadcast %cst : f32 to vector<128x128xf32>
    %8 = arith.mulf %7, %6 : vector<128x128xf32>
    %cst_4 = arith.constant 0.707106769 : f32
    %9 = vector.broadcast %cst_4 : f32 to vector<128x128xf32>
    %10 = arith.mulf %6, %9 : vector<128x128xf32>
    %cst_5 = arith.constant 0.000000e+00 : f32
    %11 = vector.broadcast %cst_5 : f32 to vector<128x128xf32>
    %12 = arith.cmpf oge, %10, %11 : vector<128x128xf32>
    %cst_6 = arith.constant 1.000000e+00 : f32
    %cst_7 = arith.constant -1.000000e+00 : f32
    %13 = vector.broadcast %cst_6 : f32 to vector<128x128xf32>
    %14 = vector.broadcast %cst_7 : f32 to vector<128x128xf32>
    %15 = arith.select %12, %13, %14 : vector<128x128xi1>, vector<128x128xf32>
    %16 = math.absf %10 : vector<128x128xf32>
    %cst_8 = arith.constant 0.327591091 : f32
    %17 = vector.broadcast %cst_8 : f32 to vector<128x128xf32>
    %18 = arith.mulf %17, %16 : vector<128x128xf32>
    %cst_9 = arith.constant 1.000000e+00 : f32
    %19 = vector.broadcast %cst_9 : f32 to vector<128x128xf32>
    %20 = arith.addf %19, %18 : vector<128x128xf32>
    %cst_10 = arith.constant 1.000000e+00 : f32
    %21 = vector.broadcast %cst_10 : f32 to vector<128x128xf32>
    %22 = arith.divf %21, %20 : vector<128x128xf32>
    %cst_11 = arith.constant 1.06140542 : f32
    %23 = vector.broadcast %cst_11 : f32 to vector<128x128xf32>
    %24 = arith.mulf %23, %22 : vector<128x128xf32>
    %cst_12 = arith.constant -1.45315206 : f32
    %25 = vector.broadcast %cst_12 : f32 to vector<128x128xf32>
    %26 = arith.addf %24, %25 : vector<128x128xf32>
    %27 = arith.mulf %26, %22 : vector<128x128xf32>
    %cst_13 = arith.constant 1.42141378 : f32
    %28 = vector.broadcast %cst_13 : f32 to vector<128x128xf32>
    %29 = arith.addf %27, %28 : vector<128x128xf32>
    %30 = arith.mulf %29, %22 : vector<128x128xf32>
    %cst_14 = arith.constant -0.284496725 : f32
    %31 = vector.broadcast %cst_14 : f32 to vector<128x128xf32>
    %32 = arith.addf %30, %31 : vector<128x128xf32>
    %33 = arith.mulf %32, %22 : vector<128x128xf32>
    %cst_15 = arith.constant 0.254829586 : f32
    %34 = vector.broadcast %cst_15 : f32 to vector<128x128xf32>
    %35 = arith.addf %33, %34 : vector<128x128xf32>
    %36 = arith.mulf %35, %22 : vector<128x128xf32>
    %cst_16 = arith.constant 0.000000e+00 : f32
    %37 = vector.broadcast %cst_16 : f32 to vector<128x128xf32>
    %38 = arith.subf %37, %16 : vector<128x128xf32>
    %39 = arith.mulf %38, %16 : vector<128x128xf32>
    %40 = math.exp %39 : vector<128x128xf32>
    %41 = arith.mulf %36, %40 : vector<128x128xf32>
    %cst_17 = arith.constant 1.000000e+00 : f32
    %42 = vector.broadcast %cst_17 : f32 to vector<128x128xf32>
    %43 = arith.subf %42, %41 : vector<128x128xf32>
    %44 = arith.mulf %15, %43 : vector<128x128xf32>
    %cst_18 = arith.constant 1.000000e+00 : f32
    %45 = vector.broadcast %cst_18 : f32 to vector<128x128xf32>
    %46 = arith.addf %45, %44 : vector<128x128xf32>
    %47 = arith.mulf %8, %46 : vector<128x128xf32>
    %c0_19 = arith.constant 0 : index
    %c0_20 = arith.constant 0 : index
    %48 = vector.load %arg3[%c0_19, %c0_20] : memref<128x128xf32, #tpu.memory_space<vmem>>, vector<128x128xf32>
    tpu.vector_store %arg3[%c0_19, %c0_20], %47 {strides = array<i32>} : memref<128x128xf32, #tpu.memory_space<vmem>>, vector<128x128xf32>,
    return
  }
  func.func @transform_0(%arg0: i32) -> (i32, i32) {
    %c0_i32 = arith.constant 0 : i32
    %c0_i32_0 = arith.constant 0 : i32
    return %arg0, %c0_i32 : i32, i32
  }
  func.func @transform_1(%arg0: i32) -> (i32, i32) {
    %c0_i32 = arith.constant 0 : i32
    %c0_i32_0 = arith.constant 0 : i32
    %c0_i32_1 = arith.constant 0 : i32
    return %c0_i32, %c0_i32_0 : i32, i32
  }
  func.func @transform_2(%arg0: i32) -> (i32, i32) {
    %c0_i32 = arith.constant 0 : i32
    %c0_i32_0 = arith.constant 0 : i32
    return %arg0, %c0_i32 : i32, i32
  }
}

module attributes {stable_mosaic.version = 11 : i64} {
  func.func @_conv_stats_kernel(%arg0: i32, %arg1: memref<2x1x8x256xf32, #tpu.memory_space<vmem>>, %arg2: memref<2x1x8x256xf32, #tpu.memory_space<vmem>>, %arg3: memref<2x1x8x256xf32, #tpu.memory_space<vmem>>, %arg4: memref<3x3x128x128xbf16, #tpu.memory_space<vmem>>, %arg5: memref<2x128xf32, #tpu.memory_space<vmem>>, %arg6: memref<2x1x8x128xf32, #tpu.memory_space<vmem>>, %arg7: memref<2x128xf32, #tpu.memory_space<vmem>>) attributes {dimension_semantics = [#tpu.dimension_semantics<arbitrary>], iteration_bounds = array<i64: 8>, scalar_prefetch = 0 : i64, scratch_operands = 0 : i64, tpu.core_type = #tpu.core_type<tc>, window_params = [{transform_indices = @transform_0, window_bounds = array<i64: 2, 1, 8, 256>}, {transform_indices = @transform_1, window_bounds = array<i64: 2, 1, 8, 256>}, {transform_indices = @transform_2, window_bounds = array<i64: 2, 1, 8, 256>}, {pipeline_mode = #tpu.pipeline_mode<synchronous>, transform_indices = @transform_3, window_bounds = array<i64: 3, 3, 128, 128>}, {pipeline_mode = #tpu.pipeline_mode<synchronous>, transform_indices = @transform_4, window_bounds = array<i64: 2, 128>}, {transform_indices = @transform_5, window_bounds = array<i64: 2, 1, 8, 128>}, {pipeline_mode = #tpu.pipeline_mode<synchronous>, transform_indices = @transform_6, window_bounds = array<i64: 2, 128>}]} {
    %c0 = arith.constant 0 : index
    %c0_0 = arith.constant 0 : index
    %0 = vector.load %arg5[%c0, %c0_0] : memref<2x128xf32, #tpu.memory_space<vmem>>, vector<1x128xf32>
    %c1 = arith.constant 1 : index
    %c0_1 = arith.constant 0 : index
    %1 = vector.load %arg5[%c1, %c0_1] : memref<2x128xf32, #tpu.memory_space<vmem>>, vector<1x128xf32>
    %cst = arith.constant 0.000000e+00 : f32
    %2 = vector.broadcast %cst : f32 to vector<16x128xf32>
    %c0_2 = arith.constant 0 : index
    %c0_3 = arith.constant 0 : index
    %c0_4 = arith.constant 0 : index
    %c0_5 = arith.constant 0 : index
    %3 = vector.load %arg1[%c0_2, %c0_3, %c0_4, %c0_5] : memref<2x1x8x256xf32, #tpu.memory_space<vmem>>, vector<2x1x8x256xf32>
    %4 = vector.shape_cast %3 : vector<2x1x8x256xf32> to vector<2x8x256xf32>
    %5 = vector.extract_strided_slice %4 {offsets = [0, 0, 0], sizes = [2, 8, 128], strides = [1, 1, 1]} : vector<2x8x256xf32> to vector<2x8x128xf32>
    %6 = vector.extract_strided_slice %4 {offsets = [0, 0, 128], sizes = [2, 8, 128], strides = [1, 1, 1]} : vector<2x8x256xf32> to vector<2x8x128xf32>
    %7 = vector.shape_cast %0 : vector<1x128xf32> to vector<1x1x128xf32>
    %8 = vector.broadcast %7 : vector<1x1x128xf32> to vector<2x8x128xf32>
    %9 = arith.mulf %5, %8 : vector<2x8x128xf32>
    %10 = vector.shape_cast %1 : vector<1x128xf32> to vector<1x1x128xf32>
    %11 = vector.broadcast %10 : vector<1x1x128xf32> to vector<2x8x128xf32>
    %12 = arith.addf %9, %11 : vector<2x8x128xf32>
    %cst_6 = arith.constant 5.000000e-01 : f32
    %13 = vector.broadcast %cst_6 : f32 to vector<2x8x128xf32>
    %14 = arith.mulf %13, %12 : vector<2x8x128xf32>
    %cst_7 = arith.constant 0.707106769 : f32
    %15 = vector.broadcast %cst_7 : f32 to vector<2x8x128xf32>
    %16 = arith.mulf %12, %15 : vector<2x8x128xf32>
    %cst_8 = arith.constant 0.000000e+00 : f32
    %17 = vector.broadcast %cst_8 : f32 to vector<2x8x128xf32>
    %18 = arith.cmpf oge, %16, %17 : vector<2x8x128xf32>
    %cst_9 = arith.constant 1.000000e+00 : f32
    %cst_10 = arith.constant -1.000000e+00 : f32
    %19 = vector.broadcast %cst_9 : f32 to vector<2x8x128xf32>
    %20 = vector.broadcast %cst_10 : f32 to vector<2x8x128xf32>
    %21 = arith.select %18, %19, %20 : vector<2x8x128xi1>, vector<2x8x128xf32>
    %22 = math.absf %16 : vector<2x8x128xf32>
    %cst_11 = arith.constant 0.327591091 : f32
    %23 = vector.broadcast %cst_11 : f32 to vector<2x8x128xf32>
    %24 = arith.mulf %23, %22 : vector<2x8x128xf32>
    %cst_12 = arith.constant 1.000000e+00 : f32
    %25 = vector.broadcast %cst_12 : f32 to vector<2x8x128xf32>
    %26 = arith.addf %25, %24 : vector<2x8x128xf32>
    %cst_13 = arith.constant 1.000000e+00 : f32
    %27 = vector.broadcast %cst_13 : f32 to vector<2x8x128xf32>
    %28 = arith.divf %27, %26 : vector<2x8x128xf32>
    %cst_14 = arith.constant 1.06140542 : f32
    %29 = vector.broadcast %cst_14 : f32 to vector<2x8x128xf32>
    %30 = arith.mulf %29, %28 : vector<2x8x128xf32>
    %cst_15 = arith.constant -1.45315206 : f32
    %31 = vector.broadcast %cst_15 : f32 to vector<2x8x128xf32>
    %32 = arith.addf %30, %31 : vector<2x8x128xf32>
    %33 = arith.mulf %32, %28 : vector<2x8x128xf32>
    %cst_16 = arith.constant 1.42141378 : f32
    %34 = vector.broadcast %cst_16 : f32 to vector<2x8x128xf32>
    %35 = arith.addf %33, %34 : vector<2x8x128xf32>
    %36 = arith.mulf %35, %28 : vector<2x8x128xf32>
    %cst_17 = arith.constant -0.284496725 : f32
    %37 = vector.broadcast %cst_17 : f32 to vector<2x8x128xf32>
    %38 = arith.addf %36, %37 : vector<2x8x128xf32>
    %39 = arith.mulf %38, %28 : vector<2x8x128xf32>
    %cst_18 = arith.constant 0.254829586 : f32
    %40 = vector.broadcast %cst_18 : f32 to vector<2x8x128xf32>
    %41 = arith.addf %39, %40 : vector<2x8x128xf32>
    %42 = arith.mulf %41, %28 : vector<2x8x128xf32>
    %cst_19 = arith.constant 0.000000e+00 : f32
    %43 = vector.broadcast %cst_19 : f32 to vector<2x8x128xf32>
    %44 = arith.subf %43, %22 : vector<2x8x128xf32>
    %45 = arith.mulf %44, %22 : vector<2x8x128xf32>
    %46 = math.exp %45 : vector<2x8x128xf32>
    %47 = arith.mulf %42, %46 : vector<2x8x128xf32>
    %cst_20 = arith.constant 1.000000e+00 : f32
    %48 = vector.broadcast %cst_20 : f32 to vector<2x8x128xf32>
    %49 = arith.subf %48, %47 : vector<2x8x128xf32>
    %50 = arith.mulf %21, %49 : vector<2x8x128xf32>
    %cst_21 = arith.constant 1.000000e+00 : f32
    %51 = vector.broadcast %cst_21 : f32 to vector<2x8x128xf32>
    %52 = arith.addf %51, %50 : vector<2x8x128xf32>
    %53 = arith.mulf %14, %52 : vector<2x8x128xf32>
    %c0_i32 = arith.constant 0 : i32
    %54 = arith.cmpi sgt, %arg0, %c0_i32 : i32
    %55 = arith.extui %54 : i1 to i32
    %56 = arith.sitofp %55 : i32 to f32
    %57 = vector.broadcast %56 : f32 to vector<2x8x128xf32>
    %58 = arith.mulf %53, %57 : vector<2x8x128xf32>
    %59 = arith.truncf %58 : vector<2x8x128xf32> to vector<2x8x128xbf16>
    %60 = vector.shape_cast %0 : vector<1x128xf32> to vector<1x1x128xf32>
    %61 = vector.broadcast %60 : vector<1x1x128xf32> to vector<2x8x128xf32>
    %62 = arith.mulf %6, %61 : vector<2x8x128xf32>
    %63 = vector.shape_cast %1 : vector<1x128xf32> to vector<1x1x128xf32>
    %64 = vector.broadcast %63 : vector<1x1x128xf32> to vector<2x8x128xf32>
    %65 = arith.addf %62, %64 : vector<2x8x128xf32>
    %cst_22 = arith.constant 5.000000e-01 : f32
    %66 = vector.broadcast %cst_22 : f32 to vector<2x8x128xf32>
    %67 = arith.mulf %66, %65 : vector<2x8x128xf32>
    %cst_23 = arith.constant 0.707106769 : f32
    %68 = vector.broadcast %cst_23 : f32 to vector<2x8x128xf32>
    %69 = arith.mulf %65, %68 : vector<2x8x128xf32>
    %cst_24 = arith.constant 0.000000e+00 : f32
    %70 = vector.broadcast %cst_24 : f32 to vector<2x8x128xf32>
    %71 = arith.cmpf oge, %69, %70 : vector<2x8x128xf32>
    %cst_25 = arith.constant 1.000000e+00 : f32
    %cst_26 = arith.constant -1.000000e+00 : f32
    %72 = vector.broadcast %cst_25 : f32 to vector<2x8x128xf32>
    %73 = vector.broadcast %cst_26 : f32 to vector<2x8x128xf32>
    %74 = arith.select %71, %72, %73 : vector<2x8x128xi1>, vector<2x8x128xf32>
    %75 = math.absf %69 : vector<2x8x128xf32>
    %cst_27 = arith.constant 0.327591091 : f32
    %76 = vector.broadcast %cst_27 : f32 to vector<2x8x128xf32>
    %77 = arith.mulf %76, %75 : vector<2x8x128xf32>
    %cst_28 = arith.constant 1.000000e+00 : f32
    %78 = vector.broadcast %cst_28 : f32 to vector<2x8x128xf32>
    %79 = arith.addf %78, %77 : vector<2x8x128xf32>
    %cst_29 = arith.constant 1.000000e+00 : f32
    %80 = vector.broadcast %cst_29 : f32 to vector<2x8x128xf32>
    %81 = arith.divf %80, %79 : vector<2x8x128xf32>
    %cst_30 = arith.constant 1.06140542 : f32
    %82 = vector.broadcast %cst_30 : f32 to vector<2x8x128xf32>
    %83 = arith.mulf %82, %81 : vector<2x8x128xf32>
    %cst_31 = arith.constant -1.45315206 : f32
    %84 = vector.broadcast %cst_31 : f32 to vector<2x8x128xf32>
    %85 = arith.addf %83, %84 : vector<2x8x128xf32>
    %86 = arith.mulf %85, %81 : vector<2x8x128xf32>
    %cst_32 = arith.constant 1.42141378 : f32
    %87 = vector.broadcast %cst_32 : f32 to vector<2x8x128xf32>
    %88 = arith.addf %86, %87 : vector<2x8x128xf32>
    %89 = arith.mulf %88, %81 : vector<2x8x128xf32>
    %cst_33 = arith.constant -0.284496725 : f32
    %90 = vector.broadcast %cst_33 : f32 to vector<2x8x128xf32>
    %91 = arith.addf %89, %90 : vector<2x8x128xf32>
    %92 = arith.mulf %91, %81 : vector<2x8x128xf32>
    %cst_34 = arith.constant 0.254829586 : f32
    %93 = vector.broadcast %cst_34 : f32 to vector<2x8x128xf32>
    %94 = arith.addf %92, %93 : vector<2x8x128xf32>
    %95 = arith.mulf %94, %81 : vector<2x8x128xf32>
    %cst_35 = arith.constant 0.000000e+00 : f32
    %96 = vector.broadcast %cst_35 : f32 to vector<2x8x128xf32>
    %97 = arith.subf %96, %75 : vector<2x8x128xf32>
    %98 = arith.mulf %97, %75 : vector<2x8x128xf32>
    %99 = math.exp %98 : vector<2x8x128xf32>
    %100 = arith.mulf %95, %99 : vector<2x8x128xf32>
    %cst_36 = arith.constant 1.000000e+00 : f32
    %101 = vector.broadcast %cst_36 : f32 to vector<2x8x128xf32>
    %102 = arith.subf %101, %100 : vector<2x8x128xf32>
    %103 = arith.mulf %74, %102 : vector<2x8x128xf32>
    %cst_37 = arith.constant 1.000000e+00 : f32
    %104 = vector.broadcast %cst_37 : f32 to vector<2x8x128xf32>
    %105 = arith.addf %104, %103 : vector<2x8x128xf32>
    %106 = arith.mulf %67, %105 : vector<2x8x128xf32>
    %c0_i32_38 = arith.constant 0 : i32
    %107 = arith.cmpi sgt, %arg0, %c0_i32_38 : i32
    %108 = arith.extui %107 : i1 to i32
    %109 = arith.sitofp %108 : i32 to f32
    %110 = vector.broadcast %109 : f32 to vector<2x8x128xf32>
    %111 = arith.mulf %106, %110 : vector<2x8x128xf32>
    %112 = arith.truncf %111 : vector<2x8x128xf32> to vector<2x8x128xbf16>
    %113 = vector.extract_strided_slice %112 {offsets = [0, 7, 0], sizes = [2, 1, 128], strides = [1, 1, 1]} : vector<2x8x128xbf16> to vector<2x1x128xbf16>
    %114 = vector.extract_strided_slice %112 {offsets = [0, 0, 0], sizes = [2, 7, 128], strides = [1, 1, 1]} : vector<2x8x128xbf16> to vector<2x7x128xbf16>
    %115 = tpu.concatenate %113, %114 in 1 : vector<2x1x128xbf16>, vector<2x7x128xbf16> -> vector<2x8x128xbf16>
    %116 = vector.shape_cast %115 : vector<2x8x128xbf16> to vector<16x128xbf16>
    %c0_39 = arith.constant 0 : index
    %c0_40 = arith.constant 0 : index
    %c0_41 = arith.constant 0 : index
    %c0_42 = arith.constant 0 : index
    %117 = vector.load %arg4[%c0_39, %c0_40, %c0_41, %c0_42] : memref<3x3x128x128xbf16, #tpu.memory_space<vmem>>, vector<1x1x128x128xbf16>
    %118 = vector.shape_cast %117 : vector<1x1x128x128xbf16> to vector<128x128xbf16>
    %cst_43 = arith.constant dense<0.000000e+00> : vector<16x128xf32>
    %119 = tpu.matmul %116, %118, %cst_43 {dimension_numbers = #tpu.dot_dimension_numbers<[1], [0], [0], [1], [0, 0, 1, 1], [], []>} : vector<16x128xbf16>, vector<128x128xbf16>, vector<16x128xf32> -> vector<16x128xf32>
    %120 = arith.addf %2, %119 : vector<16x128xf32>
    %121 = vector.shape_cast %59 : vector<2x8x128xbf16> to vector<16x128xbf16>
    %c0_44 = arith.constant 0 : index
    %c1_45 = arith.constant 1 : index
    %c0_46 = arith.constant 0 : index
    %c0_47 = arith.constant 0 : index
    %122 = vector.load %arg4[%c0_44, %c1_45, %c0_46, %c0_47] : memref<3x3x128x128xbf16, #tpu.memory_space<vmem>>, vector<1x1x128x128xbf16>
    %123 = vector.shape_cast %122 : vector<1x1x128x128xbf16> to vector<128x128xbf16>
    %cst_48 = arith.constant dense<0.000000e+00> : vector<16x128xf32>
    %124 = tpu.matmul %121, %123, %cst_48 {dimension_numbers = #tpu.dot_dimension_numbers<[1], [0], [0], [1], [0, 0, 1, 1], [], []>} : vector<16x128xbf16>, vector<128x128xbf16>, vector<16x128xf32> -> vector<16x128xf32>
    %125 = arith.addf %120, %124 : vector<16x128xf32>
    %126 = vector.shape_cast %112 : vector<2x8x128xbf16> to vector<16x128xbf16>
    %c0_49 = arith.constant 0 : index
    %c2 = arith.constant 2 : index
    %c0_50 = arith.constant 0 : index
    %c0_51 = arith.constant 0 : index
    %127 = vector.load %arg4[%c0_49, %c2, %c0_50, %c0_51] : memref<3x3x128x128xbf16, #tpu.memory_space<vmem>>, vector<1x1x128x128xbf16>
    %128 = vector.shape_cast %127 : vector<1x1x128x128xbf16> to vector<128x128xbf16>
    %cst_52 = arith.constant dense<0.000000e+00> : vector<16x128xf32>
    %129 = tpu.matmul %126, %128, %cst_52 {dimension_numbers = #tpu.dot_dimension_numbers<[1], [0], [0], [1], [0, 0, 1, 1], [], []>} : vector<16x128xbf16>, vector<128x128xbf16>, vector<16x128xf32> -> vector<16x128xf32>
    %130 = arith.addf %125, %129 : vector<16x128xf32>
    %c0_53 = arith.constant 0 : index
    %c0_54 = arith.constant 0 : index
    %c0_55 = arith.constant 0 : index
    %c0_56 = arith.constant 0 : index
    %131 = vector.load %arg2[%c0_53, %c0_54, %c0_55, %c0_56] : memref<2x1x8x256xf32, #tpu.memory_space<vmem>>, vector<2x1x8x256xf32>
    %132 = vector.shape_cast %131 : vector<2x1x8x256xf32> to vector<2x8x256xf32>
    %133 = vector.extract_strided_slice %132 {offsets = [0, 0, 0], sizes = [2, 8, 128], strides = [1, 1, 1]} : vector<2x8x256xf32> to vector<2x8x128xf32>
    %134 = vector.extract_strided_slice %132 {offsets = [0, 0, 128], sizes = [2, 8, 128], strides = [1, 1, 1]} : vector<2x8x256xf32> to vector<2x8x128xf32>
    %135 = vector.shape_cast %0 : vector<1x128xf32> to vector<1x1x128xf32>
    %136 = vector.broadcast %135 : vector<1x1x128xf32> to vector<2x8x128xf32>
    %137 = arith.mulf %133, %136 : vector<2x8x128xf32>
    %138 = vector.shape_cast %1 : vector<1x128xf32> to vector<1x1x128xf32>
    %139 = vector.broadcast %138 : vector<1x1x128xf32> to vector<2x8x128xf32>
    %140 = arith.addf %137, %139 : vector<2x8x128xf32>
    %cst_57 = arith.constant 5.000000e-01 : f32
    %141 = vector.broadcast %cst_57 : f32 to vector<2x8x128xf32>
    %142 = arith.mulf %141, %140 : vector<2x8x128xf32>
    %cst_58 = arith.constant 0.707106769 : f32
    %143 = vector.broadcast %cst_58 : f32 to vector<2x8x128xf32>
    %144 = arith.mulf %140, %143 : vector<2x8x128xf32>
    %cst_59 = arith.constant 0.000000e+00 : f32
    %145 = vector.broadcast %cst_59 : f32 to vector<2x8x128xf32>
    %146 = arith.cmpf oge, %144, %145 : vector<2x8x128xf32>
    %cst_60 = arith.constant 1.000000e+00 : f32
    %cst_61 = arith.constant -1.000000e+00 : f32
    %147 = vector.broadcast %cst_60 : f32 to vector<2x8x128xf32>
    %148 = vector.broadcast %cst_61 : f32 to vector<2x8x128xf32>
    %149 = arith.select %146, %147, %148 : vector<2x8x128xi1>, vector<2x8x128xf32>
    %150 = math.absf %144 : vector<2x8x128xf32>
    %cst_62 = arith.constant 0.327591091 : f32
    %151 = vector.broadcast %cst_62 : f32 to vector<2x8x128xf32>
    %152 = arith.mulf %151, %150 : vector<2x8x128xf32>
    %cst_63 = arith.constant 1.000000e+00 : f32
    %153 = vector.broadcast %cst_63 : f32 to vector<2x8x128xf32>
    %154 = arith.addf %153, %152 : vector<2x8x128xf32>
    %cst_64 = arith.constant 1.000000e+00 : f32
    %155 = vector.broadcast %cst_64 : f32 to vector<2x8x128xf32>
    %156 = arith.divf %155, %154 : vector<2x8x128xf32>
    %cst_65 = arith.constant 1.06140542 : f32
    %157 = vector.broadcast %cst_65 : f32 to vector<2x8x128xf32>
    %158 = arith.mulf %157, %156 : vector<2x8x128xf32>
    %cst_66 = arith.constant -1.45315206 : f32
    %159 = vector.broadcast %cst_66 : f32 to vector<2x8x128xf32>
    %160 = arith.addf %158, %159 : vector<2x8x128xf32>
    %161 = arith.mulf %160, %156 : vector<2x8x128xf32>
    %cst_67 = arith.constant 1.42141378 : f32
    %162 = vector.broadcast %cst_67 : f32 to vector<2x8x128xf32>
    %163 = arith.addf %161, %162 : vector<2x8x128xf32>
    %164 = arith.mulf %163, %156 : vector<2x8x128xf32>
    %cst_68 = arith.constant -0.284496725 : f32
    %165 = vector.broadcast %cst_68 : f32 to vector<2x8x128xf32>
    %166 = arith.addf %164, %165 : vector<2x8x128xf32>
    %167 = arith.mulf %166, %156 : vector<2x8x128xf32>
    %cst_69 = arith.constant 0.254829586 : f32
    %168 = vector.broadcast %cst_69 : f32 to vector<2x8x128xf32>
    %169 = arith.addf %167, %168 : vector<2x8x128xf32>
    %170 = arith.mulf %169, %156 : vector<2x8x128xf32>
    %cst_70 = arith.constant 0.000000e+00 : f32
    %171 = vector.broadcast %cst_70 : f32 to vector<2x8x128xf32>
    %172 = arith.subf %171, %150 : vector<2x8x128xf32>
    %173 = arith.mulf %172, %150 : vector<2x8x128xf32>
    %174 = math.exp %173 : vector<2x8x128xf32>
    %175 = arith.mulf %170, %174 : vector<2x8x128xf32>
    %cst_71 = arith.constant 1.000000e+00 : f32
    %176 = vector.broadcast %cst_71 : f32 to vector<2x8x128xf32>
    %177 = arith.subf %176, %175 : vector<2x8x128xf32>
    %178 = arith.mulf %149, %177 : vector<2x8x128xf32>
    %cst_72 = arith.constant 1.000000e+00 : f32
    %179 = vector.broadcast %cst_72 : f32 to vector<2x8x128xf32>
    %180 = arith.addf %179, %178 : vector<2x8x128xf32>
    %181 = arith.mulf %142, %180 : vector<2x8x128xf32>
    %182 = arith.truncf %181 : vector<2x8x128xf32> to vector<2x8x128xbf16>
    %183 = vector.shape_cast %0 : vector<1x128xf32> to vector<1x1x128xf32>
    %184 = vector.broadcast %183 : vector<1x1x128xf32> to vector<2x8x128xf32>
    %185 = arith.mulf %134, %184 : vector<2x8x128xf32>
    %186 = vector.shape_cast %1 : vector<1x128xf32> to vector<1x1x128xf32>
    %187 = vector.broadcast %186 : vector<1x1x128xf32> to vector<2x8x128xf32>
    %188 = arith.addf %185, %187 : vector<2x8x128xf32>
    %cst_73 = arith.constant 5.000000e-01 : f32
    %189 = vector.broadcast %cst_73 : f32 to vector<2x8x128xf32>
    %190 = arith.mulf %189, %188 : vector<2x8x128xf32>
    %cst_74 = arith.constant 0.707106769 : f32
    %191 = vector.broadcast %cst_74 : f32 to vector<2x8x128xf32>
    %192 = arith.mulf %188, %191 : vector<2x8x128xf32>
    %cst_75 = arith.constant 0.000000e+00 : f32
    %193 = vector.broadcast %cst_75 : f32 to vector<2x8x128xf32>
    %194 = arith.cmpf oge, %192, %193 : vector<2x8x128xf32>
    %cst_76 = arith.constant 1.000000e+00 : f32
    %cst_77 = arith.constant -1.000000e+00 : f32
    %195 = vector.broadcast %cst_76 : f32 to vector<2x8x128xf32>
    %196 = vector.broadcast %cst_77 : f32 to vector<2x8x128xf32>
    %197 = arith.select %194, %195, %196 : vector<2x8x128xi1>, vector<2x8x128xf32>
    %198 = math.absf %192 : vector<2x8x128xf32>
    %cst_78 = arith.constant 0.327591091 : f32
    %199 = vector.broadcast %cst_78 : f32 to vector<2x8x128xf32>
    %200 = arith.mulf %199, %198 : vector<2x8x128xf32>
    %cst_79 = arith.constant 1.000000e+00 : f32
    %201 = vector.broadcast %cst_79 : f32 to vector<2x8x128xf32>
    %202 = arith.addf %201, %200 : vector<2x8x128xf32>
    %cst_80 = arith.constant 1.000000e+00 : f32
    %203 = vector.broadcast %cst_80 : f32 to vector<2x8x128xf32>
    %204 = arith.divf %203, %202 : vector<2x8x128xf32>
    %cst_81 = arith.constant 1.06140542 : f32
    %205 = vector.broadcast %cst_81 : f32 to vector<2x8x128xf32>
    %206 = arith.mulf %205, %204 : vector<2x8x128xf32>
    %cst_82 = arith.constant -1.45315206 : f32
    %207 = vector.broadcast %cst_82 : f32 to vector<2x8x128xf32>
    %208 = arith.addf %206, %207 : vector<2x8x128xf32>
    %209 = arith.mulf %208, %204 : vector<2x8x128xf32>
    %cst_83 = arith.constant 1.42141378 : f32
    %210 = vector.broadcast %cst_83 : f32 to vector<2x8x128xf32>
    %211 = arith.addf %209, %210 : vector<2x8x128xf32>
    %212 = arith.mulf %211, %204 : vector<2x8x128xf32>
    %cst_84 = arith.constant -0.284496725 : f32
    %213 = vector.broadcast %cst_84 : f32 to vector<2x8x128xf32>
    %214 = arith.addf %212, %213 : vector<2x8x128xf32>
    %215 = arith.mulf %214, %204 : vector<2x8x128xf32>
    %cst_85 = arith.constant 0.254829586 : f32
    %216 = vector.broadcast %cst_85 : f32 to vector<2x8x128xf32>
    %217 = arith.addf %215, %216 : vector<2x8x128xf32>
    %218 = arith.mulf %217, %204 : vector<2x8x128xf32>
    %cst_86 = arith.constant 0.000000e+00 : f32
    %219 = vector.broadcast %cst_86 : f32 to vector<2x8x128xf32>
    %220 = arith.subf %219, %198 : vector<2x8x128xf32>
    %221 = arith.mulf %220, %198 : vector<2x8x128xf32>
    %222 = math.exp %221 : vector<2x8x128xf32>
    %223 = arith.mulf %218, %222 : vector<2x8x128xf32>
    %cst_87 = arith.constant 1.000000e+00 : f32
    %224 = vector.broadcast %cst_87 : f32 to vector<2x8x128xf32>
    %225 = arith.subf %224, %223 : vector<2x8x128xf32>
    %226 = arith.mulf %197, %225 : vector<2x8x128xf32>
    %cst_88 = arith.constant 1.000000e+00 : f32
    %227 = vector.broadcast %cst_88 : f32 to vector<2x8x128xf32>
    %228 = arith.addf %227, %226 : vector<2x8x128xf32>
    %229 = arith.mulf %190, %228 : vector<2x8x128xf32>
    %230 = arith.truncf %229 : vector<2x8x128xf32> to vector<2x8x128xbf16>
    %231 = vector.extract_strided_slice %230 {offsets = [0, 7, 0], sizes = [2, 1, 128], strides = [1, 1, 1]} : vector<2x8x128xbf16> to vector<2x1x128xbf16>
    %232 = vector.extract_strided_slice %230 {offsets = [0, 0, 0], sizes = [2, 7, 128], strides = [1, 1, 1]} : vector<2x8x128xbf16> to vector<2x7x128xbf16>
    %233 = tpu.concatenate %231, %232 in 1 : vector<2x1x128xbf16>, vector<2x7x128xbf16> -> vector<2x8x128xbf16>
    %234 = vector.shape_cast %233 : vector<2x8x128xbf16> to vector<16x128xbf16>
    %c1_89 = arith.constant 1 : index
    %c0_90 = arith.constant 0 : index
    %c0_91 = arith.constant 0 : index
    %c0_92 = arith.constant 0 : index
    %235 = vector.load %arg4[%c1_89, %c0_90, %c0_91, %c0_92] : memref<3x3x128x128xbf16, #tpu.memory_space<vmem>>, vector<1x1x128x128xbf16>
    %236 = vector.shape_cast %235 : vector<1x1x128x128xbf16> to vector<128x128xbf16>
    %cst_93 = arith.constant dense<0.000000e+00> : vector<16x128xf32>
    %237 = tpu.matmul %234, %236, %cst_93 {dimension_numbers = #tpu.dot_dimension_numbers<[1], [0], [0], [1], [0, 0, 1, 1], [], []>} : vector<16x128xbf16>, vector<128x128xbf16>, vector<16x128xf32> -> vector<16x128xf32>
    %238 = arith.addf %130, %237 : vector<16x128xf32>
    %239 = vector.shape_cast %182 : vector<2x8x128xbf16> to vector<16x128xbf16>
    %c1_94 = arith.constant 1 : index
    %c1_95 = arith.constant 1 : index
    %c0_96 = arith.constant 0 : index
    %c0_97 = arith.constant 0 : index
    %240 = vector.load %arg4[%c1_94, %c1_95, %c0_96, %c0_97] : memref<3x3x128x128xbf16, #tpu.memory_space<vmem>>, vector<1x1x128x128xbf16>
    %241 = vector.shape_cast %240 : vector<1x1x128x128xbf16> to vector<128x128xbf16>
    %cst_98 = arith.constant dense<0.000000e+00> : vector<16x128xf32>
    %242 = tpu.matmul %239, %241, %cst_98 {dimension_numbers = #tpu.dot_dimension_numbers<[1], [0], [0], [1], [0, 0, 1, 1], [], []>} : vector<16x128xbf16>, vector<128x128xbf16>, vector<16x128xf32> -> vector<16x128xf32>
    %243 = arith.addf %238, %242 : vector<16x128xf32>
    %244 = vector.shape_cast %230 : vector<2x8x128xbf16> to vector<16x128xbf16>
    %c1_99 = arith.constant 1 : index
    %c2_100 = arith.constant 2 : index
    %c0_101 = arith.constant 0 : index
    %c0_102 = arith.constant 0 : index
    %245 = vector.load %arg4[%c1_99, %c2_100, %c0_101, %c0_102] : memref<3x3x128x128xbf16, #tpu.memory_space<vmem>>, vector<1x1x128x128xbf16>
    %246 = vector.shape_cast %245 : vector<1x1x128x128xbf16> to vector<128x128xbf16>
    %cst_103 = arith.constant dense<0.000000e+00> : vector<16x128xf32>
    %247 = tpu.matmul %244, %246, %cst_103 {dimension_numbers = #tpu.dot_dimension_numbers<[1], [0], [0], [1], [0, 0, 1, 1], [], []>} : vector<16x128xbf16>, vector<128x128xbf16>, vector<16x128xf32> -> vector<16x128xf32>
    %248 = arith.addf %243, %247 : vector<16x128xf32>
    %c0_104 = arith.constant 0 : index
    %c0_105 = arith.constant 0 : index
    %c0_106 = arith.constant 0 : index
    %c0_107 = arith.constant 0 : index
    %249 = vector.load %arg3[%c0_104, %c0_105, %c0_106, %c0_107] : memref<2x1x8x256xf32, #tpu.memory_space<vmem>>, vector<2x1x8x256xf32>
    %250 = vector.shape_cast %249 : vector<2x1x8x256xf32> to vector<2x8x256xf32>
    %251 = vector.extract_strided_slice %250 {offsets = [0, 0, 0], sizes = [2, 8, 128], strides = [1, 1, 1]} : vector<2x8x256xf32> to vector<2x8x128xf32>
    %252 = vector.extract_strided_slice %250 {offsets = [0, 0, 128], sizes = [2, 8, 128], strides = [1, 1, 1]} : vector<2x8x256xf32> to vector<2x8x128xf32>
    %253 = vector.shape_cast %0 : vector<1x128xf32> to vector<1x1x128xf32>
    %254 = vector.broadcast %253 : vector<1x1x128xf32> to vector<2x8x128xf32>
    %255 = arith.mulf %251, %254 : vector<2x8x128xf32>
    %256 = vector.shape_cast %1 : vector<1x128xf32> to vector<1x1x128xf32>
    %257 = vector.broadcast %256 : vector<1x1x128xf32> to vector<2x8x128xf32>
    %258 = arith.addf %255, %257 : vector<2x8x128xf32>
    %cst_108 = arith.constant 5.000000e-01 : f32
    %259 = vector.broadcast %cst_108 : f32 to vector<2x8x128xf32>
    %260 = arith.mulf %259, %258 : vector<2x8x128xf32>
    %cst_109 = arith.constant 0.707106769 : f32
    %261 = vector.broadcast %cst_109 : f32 to vector<2x8x128xf32>
    %262 = arith.mulf %258, %261 : vector<2x8x128xf32>
    %cst_110 = arith.constant 0.000000e+00 : f32
    %263 = vector.broadcast %cst_110 : f32 to vector<2x8x128xf32>
    %264 = arith.cmpf oge, %262, %263 : vector<2x8x128xf32>
    %cst_111 = arith.constant 1.000000e+00 : f32
    %cst_112 = arith.constant -1.000000e+00 : f32
    %265 = vector.broadcast %cst_111 : f32 to vector<2x8x128xf32>
    %266 = vector.broadcast %cst_112 : f32 to vector<2x8x128xf32>
    %267 = arith.select %264, %265, %266 : vector<2x8x128xi1>, vector<2x8x128xf32>
    %268 = math.absf %262 : vector<2x8x128xf32>
    %cst_113 = arith.constant 0.327591091 : f32
    %269 = vector.broadcast %cst_113 : f32 to vector<2x8x128xf32>
    %270 = arith.mulf %269, %268 : vector<2x8x128xf32>
    %cst_114 = arith.constant 1.000000e+00 : f32
    %271 = vector.broadcast %cst_114 : f32 to vector<2x8x128xf32>
    %272 = arith.addf %271, %270 : vector<2x8x128xf32>
    %cst_115 = arith.constant 1.000000e+00 : f32
    %273 = vector.broadcast %cst_115 : f32 to vector<2x8x128xf32>
    %274 = arith.divf %273, %272 : vector<2x8x128xf32>
    %cst_116 = arith.constant 1.06140542 : f32
    %275 = vector.broadcast %cst_116 : f32 to vector<2x8x128xf32>
    %276 = arith.mulf %275, %274 : vector<2x8x128xf32>
    %cst_117 = arith.constant -1.45315206 : f32
    %277 = vector.broadcast %cst_117 : f32 to vector<2x8x128xf32>
    %278 = arith.addf %276, %277 : vector<2x8x128xf32>
    %279 = arith.mulf %278, %274 : vector<2x8x128xf32>
    %cst_118 = arith.constant 1.42141378 : f32
    %280 = vector.broadcast %cst_118 : f32 to vector<2x8x128xf32>
    %281 = arith.addf %279, %280 : vector<2x8x128xf32>
    %282 = arith.mulf %281, %274 : vector<2x8x128xf32>
    %cst_119 = arith.constant -0.284496725 : f32
    %283 = vector.broadcast %cst_119 : f32 to vector<2x8x128xf32>
    %284 = arith.addf %282, %283 : vector<2x8x128xf32>
    %285 = arith.mulf %284, %274 : vector<2x8x128xf32>
    %cst_120 = arith.constant 0.254829586 : f32
    %286 = vector.broadcast %cst_120 : f32 to vector<2x8x128xf32>
    %287 = arith.addf %285, %286 : vector<2x8x128xf32>
    %288 = arith.mulf %287, %274 : vector<2x8x128xf32>
    %cst_121 = arith.constant 0.000000e+00 : f32
    %289 = vector.broadcast %cst_121 : f32 to vector<2x8x128xf32>
    %290 = arith.subf %289, %268 : vector<2x8x128xf32>
    %291 = arith.mulf %290, %268 : vector<2x8x128xf32>
    %292 = math.exp %291 : vector<2x8x128xf32>
    %293 = arith.mulf %288, %292 : vector<2x8x128xf32>
    %cst_122 = arith.constant 1.000000e+00 : f32
    %294 = vector.broadcast %cst_122 : f32 to vector<2x8x128xf32>
    %295 = arith.subf %294, %293 : vector<2x8x128xf32>
    %296 = arith.mulf %267, %295 : vector<2x8x128xf32>
    %cst_123 = arith.constant 1.000000e+00 : f32
    %297 = vector.broadcast %cst_123 : f32 to vector<2x8x128xf32>
    %298 = arith.addf %297, %296 : vector<2x8x128xf32>
    %299 = arith.mulf %260, %298 : vector<2x8x128xf32>
    %c2_i32 = arith.constant 2 : i32
    %300 = arith.muli %c2_i32, %arg0 : i32
    %c2_i32_124 = arith.constant 2 : i32
    %301 = arith.addi %300, %c2_i32_124 : i32
    %c16_i32 = arith.constant 16 : i32
    %302 = arith.cmpi sle, %301, %c16_i32 : i32
    %303 = arith.extui %302 : i1 to i32
    %304 = arith.sitofp %303 : i32 to f32
    %305 = vector.broadcast %304 : f32 to vector<2x8x128xf32>
    %306 = arith.mulf %299, %305 : vector<2x8x128xf32>
    %307 = arith.truncf %306 : vector<2x8x128xf32> to vector<2x8x128xbf16>
    %308 = vector.shape_cast %0 : vector<1x128xf32> to vector<1x1x128xf32>
    %309 = vector.broadcast %308 : vector<1x1x128xf32> to vector<2x8x128xf32>
    %310 = arith.mulf %252, %309 : vector<2x8x128xf32>
    %311 = vector.shape_cast %1 : vector<1x128xf32> to vector<1x1x128xf32>
    %312 = vector.broadcast %311 : vector<1x1x128xf32> to vector<2x8x128xf32>
    %313 = arith.addf %310, %312 : vector<2x8x128xf32>
    %cst_125 = arith.constant 5.000000e-01 : f32
    %314 = vector.broadcast %cst_125 : f32 to vector<2x8x128xf32>
    %315 = arith.mulf %314, %313 : vector<2x8x128xf32>
    %cst_126 = arith.constant 0.707106769 : f32
    %316 = vector.broadcast %cst_126 : f32 to vector<2x8x128xf32>
    %317 = arith.mulf %313, %316 : vector<2x8x128xf32>
    %cst_127 = arith.constant 0.000000e+00 : f32
    %318 = vector.broadcast %cst_127 : f32 to vector<2x8x128xf32>
    %319 = arith.cmpf oge, %317, %318 : vector<2x8x128xf32>
    %cst_128 = arith.constant 1.000000e+00 : f32
    %cst_129 = arith.constant -1.000000e+00 : f32
    %320 = vector.broadcast %cst_128 : f32 to vector<2x8x128xf32>
    %321 = vector.broadcast %cst_129 : f32 to vector<2x8x128xf32>
    %322 = arith.select %319, %320, %321 : vector<2x8x128xi1>, vector<2x8x128xf32>
    %323 = math.absf %317 : vector<2x8x128xf32>
    %cst_130 = arith.constant 0.327591091 : f32
    %324 = vector.broadcast %cst_130 : f32 to vector<2x8x128xf32>
    %325 = arith.mulf %324, %323 : vector<2x8x128xf32>
    %cst_131 = arith.constant 1.000000e+00 : f32
    %326 = vector.broadcast %cst_131 : f32 to vector<2x8x128xf32>
    %327 = arith.addf %326, %325 : vector<2x8x128xf32>
    %cst_132 = arith.constant 1.000000e+00 : f32
    %328 = vector.broadcast %cst_132 : f32 to vector<2x8x128xf32>
    %329 = arith.divf %328, %327 : vector<2x8x128xf32>
    %cst_133 = arith.constant 1.06140542 : f32
    %330 = vector.broadcast %cst_133 : f32 to vector<2x8x128xf32>
    %331 = arith.mulf %330, %329 : vector<2x8x128xf32>
    %cst_134 = arith.constant -1.45315206 : f32
    %332 = vector.broadcast %cst_134 : f32 to vector<2x8x128xf32>
    %333 = arith.addf %331, %332 : vector<2x8x128xf32>
    %334 = arith.mulf %333, %329 : vector<2x8x128xf32>
    %cst_135 = arith.constant 1.42141378 : f32
    %335 = vector.broadcast %cst_135 : f32 to vector<2x8x128xf32>
    %336 = arith.addf %334, %335 : vector<2x8x128xf32>
    %337 = arith.mulf %336, %329 : vector<2x8x128xf32>
    %cst_136 = arith.constant -0.284496725 : f32
    %338 = vector.broadcast %cst_136 : f32 to vector<2x8x128xf32>
    %339 = arith.addf %337, %338 : vector<2x8x128xf32>
    %340 = arith.mulf %339, %329 : vector<2x8x128xf32>
    %cst_137 = arith.constant 0.254829586 : f32
    %341 = vector.broadcast %cst_137 : f32 to vector<2x8x128xf32>
    %342 = arith.addf %340, %341 : vector<2x8x128xf32>
    %343 = arith.mulf %342, %329 : vector<2x8x128xf32>
    %cst_138 = arith.constant 0.000000e+00 : f32
    %344 = vector.broadcast %cst_138 : f32 to vector<2x8x128xf32>
    %345 = arith.subf %344, %323 : vector<2x8x128xf32>
    %346 = arith.mulf %345, %323 : vector<2x8x128xf32>
    %347 = math.exp %346 : vector<2x8x128xf32>
    %348 = arith.mulf %343, %347 : vector<2x8x128xf32>
    %cst_139 = arith.constant 1.000000e+00 : f32
    %349 = vector.broadcast %cst_139 : f32 to vector<2x8x128xf32>
    %350 = arith.subf %349, %348 : vector<2x8x128xf32>
    %351 = arith.mulf %322, %350 : vector<2x8x128xf32>
    %cst_140 = arith.constant 1.000000e+00 : f32
    %352 = vector.broadcast %cst_140 : f32 to vector<2x8x128xf32>
    %353 = arith.addf %352, %351 : vector<2x8x128xf32>
    %354 = arith.mulf %315, %353 : vector<2x8x128xf32>
    %c2_i32_141 = arith.constant 2 : i32
    %355 = arith.muli %c2_i32_141, %arg0 : i32
    %c2_i32_142 = arith.constant 2 : i32
    %356 = arith.addi %355, %c2_i32_142 : i32
    %c16_i32_143 = arith.constant 16 : i32
    %357 = arith.cmpi sle, %356, %c16_i32_143 : i32
    %358 = arith.extui %357 : i1 to i32
    %359 = arith.sitofp %358 : i32 to f32
    %360 = vector.broadcast %359 : f32 to vector<2x8x128xf32>
    %361 = arith.mulf %354, %360 : vector<2x8x128xf32>
    %362 = arith.truncf %361 : vector<2x8x128xf32> to vector<2x8x128xbf16>
    %363 = vector.extract_strided_slice %362 {offsets = [0, 7, 0], sizes = [2, 1, 128], strides = [1, 1, 1]} : vector<2x8x128xbf16> to vector<2x1x128xbf16>
    %364 = vector.extract_strided_slice %362 {offsets = [0, 0, 0], sizes = [2, 7, 128], strides = [1, 1, 1]} : vector<2x8x128xbf16> to vector<2x7x128xbf16>
    %365 = tpu.concatenate %363, %364 in 1 : vector<2x1x128xbf16>, vector<2x7x128xbf16> -> vector<2x8x128xbf16>
    %366 = vector.shape_cast %365 : vector<2x8x128xbf16> to vector<16x128xbf16>
    %c2_144 = arith.constant 2 : index
    %c0_145 = arith.constant 0 : index
    %c0_146 = arith.constant 0 : index
    %c0_147 = arith.constant 0 : index
    %367 = vector.load %arg4[%c2_144, %c0_145, %c0_146, %c0_147] : memref<3x3x128x128xbf16, #tpu.memory_space<vmem>>, vector<1x1x128x128xbf16>
    %368 = vector.shape_cast %367 : vector<1x1x128x128xbf16> to vector<128x128xbf16>
    %cst_148 = arith.constant dense<0.000000e+00> : vector<16x128xf32>
    %369 = tpu.matmul %366, %368, %cst_148 {dimension_numbers = #tpu.dot_dimension_numbers<[1], [0], [0], [1], [0, 0, 1, 1], [], []>} : vector<16x128xbf16>, vector<128x128xbf16>, vector<16x128xf32> -> vector<16x128xf32>
    %370 = arith.addf %248, %369 : vector<16x128xf32>
    %371 = vector.shape_cast %307 : vector<2x8x128xbf16> to vector<16x128xbf16>
    %c2_149 = arith.constant 2 : index
    %c1_150 = arith.constant 1 : index
    %c0_151 = arith.constant 0 : index
    %c0_152 = arith.constant 0 : index
    %372 = vector.load %arg4[%c2_149, %c1_150, %c0_151, %c0_152] : memref<3x3x128x128xbf16, #tpu.memory_space<vmem>>, vector<1x1x128x128xbf16>
    %373 = vector.shape_cast %372 : vector<1x1x128x128xbf16> to vector<128x128xbf16>
    %cst_153 = arith.constant dense<0.000000e+00> : vector<16x128xf32>
    %374 = tpu.matmul %371, %373, %cst_153 {dimension_numbers = #tpu.dot_dimension_numbers<[1], [0], [0], [1], [0, 0, 1, 1], [], []>} : vector<16x128xbf16>, vector<128x128xbf16>, vector<16x128xf32> -> vector<16x128xf32>
    %375 = arith.addf %370, %374 : vector<16x128xf32>
    %376 = vector.shape_cast %362 : vector<2x8x128xbf16> to vector<16x128xbf16>
    %c2_154 = arith.constant 2 : index
    %c2_155 = arith.constant 2 : index
    %c0_156 = arith.constant 0 : index
    %c0_157 = arith.constant 0 : index
    %377 = vector.load %arg4[%c2_154, %c2_155, %c0_156, %c0_157] : memref<3x3x128x128xbf16, #tpu.memory_space<vmem>>, vector<1x1x128x128xbf16>
    %378 = vector.shape_cast %377 : vector<1x1x128x128xbf16> to vector<128x128xbf16>
    %cst_158 = arith.constant dense<0.000000e+00> : vector<16x128xf32>
    %379 = tpu.matmul %376, %378, %cst_158 {dimension_numbers = #tpu.dot_dimension_numbers<[1], [0], [0], [1], [0, 0, 1, 1], [], []>} : vector<16x128xbf16>, vector<128x128xbf16>, vector<16x128xf32> -> vector<16x128xf32>
    %380 = arith.addf %375, %379 : vector<16x128xf32>
    %381 = vector.shape_cast %380 : vector<16x128xf32> to vector<2x8x128xf32>
    %c0_159 = arith.constant 0 : index
    %c0_160 = arith.constant 0 : index
    %c0_161 = arith.constant 0 : index
    %c0_162 = arith.constant 0 : index
    %382 = vector.load %arg6[%c0_159, %c0_160, %c0_161, %c0_162] : memref<2x1x8x128xf32, #tpu.memory_space<vmem>>, vector<2x1x8x128xf32>
    %383 = vector.shape_cast %382 : vector<2x1x8x128xf32> to vector<2x8x128xf32>
    %384 = vector.shape_cast %381 : vector<2x8x128xf32> to vector<2x1x8x128xf32>
    tpu.vector_store %arg6[%c0_159, %c0_160, %c0_161, %c0_162], %384 {strides = array<i32>} : memref<2x1x8x128xf32, #tpu.memory_space<vmem>>, vector<2x1x8x128xf32>,
    %c0_i32_163 = arith.constant 0 : i32
    %385 = arith.cmpi eq, %arg0, %c0_i32_163 : i32
    %386 = arith.extui %385 : i1 to i32
    %c0_i32_164 = arith.constant 0 : i32
    %387 = arith.cmpi ne, %386, %c0_i32_164 : i32
    scf.if %387 {
      %cst_175 = arith.constant 0.000000e+00 : f32
      %399 = vector.broadcast %cst_175 : f32 to vector<2x128xf32>
      %c0_176 = arith.constant 0 : index
      %c0_177 = arith.constant 0 : index
      %400 = vector.load %arg7[%c0_176, %c0_177] : memref<2x128xf32, #tpu.memory_space<vmem>>, vector<2x128xf32>
      tpu.vector_store %arg7[%c0_176, %c0_177], %399 {strides = array<i32>} : memref<2x128xf32, #tpu.memory_space<vmem>>, vector<2x128xf32>,
    } else {
    }
    %c0_165 = arith.constant 0 : index
    %c0_166 = arith.constant 0 : index
    %388 = vector.load %arg7[%c0_165, %c0_166] : memref<2x128xf32, #tpu.memory_space<vmem>>, vector<1x128xf32>
    %cst_167 = arith.constant dense<0.000000e+00> : vector<128xf32>
    %389 = vector.multi_reduction <add>, %380, %cst_167 [0] : vector<16x128xf32> to vector<128xf32>
    %390 = vector.shape_cast %389 : vector<128xf32> to vector<1x128xf32>
    %391 = arith.addf %388, %390 : vector<1x128xf32>
    %c0_168 = arith.constant 0 : index
    %c0_169 = arith.constant 0 : index
    %392 = vector.load %arg7[%c0_168, %c0_169] : memref<2x128xf32, #tpu.memory_space<vmem>>, vector<1x128xf32>
    tpu.vector_store %arg7[%c0_168, %c0_169], %391 {strides = array<i32>} : memref<2x128xf32, #tpu.memory_space<vmem>>, vector<1x128xf32>,
    %c1_170 = arith.constant 1 : index
    %c0_171 = arith.constant 0 : index
    %393 = vector.load %arg7[%c1_170, %c0_171] : memref<2x128xf32, #tpu.memory_space<vmem>>, vector<1x128xf32>
    %394 = arith.mulf %380, %380 : vector<16x128xf32>
    %cst_172 = arith.constant dense<0.000000e+00> : vector<128xf32>
    %395 = vector.multi_reduction <add>, %394, %cst_172 [0] : vector<16x128xf32> to vector<128xf32>
    %396 = vector.shape_cast %395 : vector<128xf32> to vector<1x128xf32>
    %397 = arith.addf %393, %396 : vector<1x128xf32>
    %c1_173 = arith.constant 1 : index
    %c0_174 = arith.constant 0 : index
    %398 = vector.load %arg7[%c1_173, %c0_174] : memref<2x128xf32, #tpu.memory_space<vmem>>, vector<1x128xf32>
    tpu.vector_store %arg7[%c1_173, %c0_174], %397 {strides = array<i32>} : memref<2x128xf32, #tpu.memory_space<vmem>>, vector<1x128xf32>,
    return
  }
  func.func @transform_0(%arg0: i32) -> (i32, i32, i32, i32) {
    %c2_i32 = arith.constant 2 : i32
    %0 = arith.muli %c2_i32, %arg0 : i32
    %c0_i32 = arith.constant 0 : i32
    %1 = arith.addi %0, %c0_i32 : i32
    %c1_i32 = arith.constant 1 : i32
    %2 = arith.subi %1, %c1_i32 : i32
    %c0_i32_0 = arith.constant 0 : i32
    %3 = arith.maxsi %2, %c0_i32_0 : i32
    %c15_i32 = arith.constant 15 : i32
    %4 = arith.minsi %3, %c15_i32 : i32
    %c0_i32_1 = arith.constant 0 : i32
    %c0_i32_2 = arith.constant 0 : i32
    %c0_i32_3 = arith.constant 0 : i32
    %c0_i32_4 = arith.constant 0 : i32
    return %c0_i32_1, %4, %c0_i32_2, %c0_i32_3 : i32, i32, i32, i32
  }
  func.func @transform_1(%arg0: i32) -> (i32, i32, i32, i32) {
    %c2_i32 = arith.constant 2 : i32
    %0 = arith.muli %c2_i32, %arg0 : i32
    %c1_i32 = arith.constant 1 : i32
    %1 = arith.addi %0, %c1_i32 : i32
    %c1_i32_0 = arith.constant 1 : i32
    %2 = arith.subi %1, %c1_i32_0 : i32
    %c0_i32 = arith.constant 0 : i32
    %3 = arith.maxsi %2, %c0_i32 : i32
    %c15_i32 = arith.constant 15 : i32
    %4 = arith.minsi %3, %c15_i32 : i32
    %c0_i32_1 = arith.constant 0 : i32
    %c0_i32_2 = arith.constant 0 : i32
    %c0_i32_3 = arith.constant 0 : i32
    %c0_i32_4 = arith.constant 0 : i32
    return %c0_i32_1, %4, %c0_i32_2, %c0_i32_3 : i32, i32, i32, i32
  }
  func.func @transform_2(%arg0: i32) -> (i32, i32, i32, i32) {
    %c2_i32 = arith.constant 2 : i32
    %0 = arith.muli %c2_i32, %arg0 : i32
    %c2_i32_0 = arith.constant 2 : i32
    %1 = arith.addi %0, %c2_i32_0 : i32
    %c1_i32 = arith.constant 1 : i32
    %2 = arith.subi %1, %c1_i32 : i32
    %c0_i32 = arith.constant 0 : i32
    %3 = arith.maxsi %2, %c0_i32 : i32
    %c15_i32 = arith.constant 15 : i32
    %4 = arith.minsi %3, %c15_i32 : i32
    %c0_i32_1 = arith.constant 0 : i32
    %c0_i32_2 = arith.constant 0 : i32
    %c0_i32_3 = arith.constant 0 : i32
    %c0_i32_4 = arith.constant 0 : i32
    return %c0_i32_1, %4, %c0_i32_2, %c0_i32_3 : i32, i32, i32, i32
  }
  func.func @transform_3(%arg0: i32) -> (i32, i32, i32, i32) {
    %c0_i32 = arith.constant 0 : i32
    %c0_i32_0 = arith.constant 0 : i32
    %c0_i32_1 = arith.constant 0 : i32
    %c0_i32_2 = arith.constant 0 : i32
    %c0_i32_3 = arith.constant 0 : i32
    return %c0_i32, %c0_i32_0, %c0_i32_1, %c0_i32_2 : i32, i32, i32, i32
  }
  func.func @transform_4(%arg0: i32) -> (i32, i32) {
    %c0_i32 = arith.constant 0 : i32
    %c0_i32_0 = arith.constant 0 : i32
    %c0_i32_1 = arith.constant 0 : i32
    return %c0_i32, %c0_i32_0 : i32, i32
  }
  func.func @transform_5(%arg0: i32) -> (i32, i32, i32, i32) {
    %c0_i32 = arith.constant 0 : i32
    %c0_i32_0 = arith.constant 0 : i32
    %c0_i32_1 = arith.constant 0 : i32
    %c0_i32_2 = arith.constant 0 : i32
    return %c0_i32, %arg0, %c0_i32_0, %c0_i32_1 : i32, i32, i32, i32
  }
  func.func @transform_6(%arg0: i32) -> (i32, i32) {
    %c0_i32 = arith.constant 0 : i32
    %c0_i32_0 = arith.constant 0 : i32
    %c0_i32_1 = arith.constant 0 : i32
    return %c0_i32, %c0_i32_0 : i32, i32
  }
}

</mosaic_0001>

<bundles_post_ra>
// kernel: down_forward.5
= control target key start
LH: loop header
LB: loop body
LE: loop exit
PB: predicated region body
PF: predicated region fallthrough
CT: control target
= control target key end

     0   :  { %v588_v49 = vmov -1.0   ;;  %s1024_s0 = inlined_call_operand.vmem [shape: f32[128,128], index: 0, kind: input, shape index: {}]   ;;  %s1025_s1 = inlined_call_operand.vmem [shape: f32[2,128], index: 1, kind: input, shape index: {}]   ;;  %s1026_s2 = inlined_call_operand.vmem [shape: f32[128,128], index: 2, kind: output, shape index: {}]  }
   0x1   :  { %v607_v0 = vld [vmem:[%s1025_s1] ss:$0 sm:$0xff]  ;;  %v612_v1 = vld [vmem:[%s1025_s1 + $0x1] ss:$0 sm:$0xff]  ;;  %v14_v4 = vld [vmem:[%s1024_s0 + $0x8] sm:$0xff] }
   0x2   :  { %v13_v2 = vld [vmem:[%s1024_s0] sm:$0xff]  ;;  %v15_v5 = vld [vmem:[%s1024_s0 + $0x10] sm:$0xff]  ;;  %v16_v6 = vld [vmem:[%s1024_s0 + $0x18] sm:$0xff]  ;;  %v34_v7 = vmul.f32 %v607_v0, %v14_v4 }
   0x3   :  { %v33_v3 = vmul.f32 %v607_v0, %v13_v2  ;;  %v35_v8 = vmul.f32 %v607_v0, %v15_v5  ;;  %v36_v9 = vmul.f32 %v607_v0, %v16_v6  ;;  %v17_v14 = vld [vmem:[%s1024_s0 + $0x20] sm:$0xff]  ;;  %v18_v16 = vld [vmem:[%s1024_s0 + $0x28] sm:$0xff]  ;;  %v19_v19 = vld [vmem:[%s1024_s0 + $0x30] sm:$0xff] }
   0x4   :  { %v54_v11 = vadd.f32 %v612_v1, %v34_v7  ;;  %v37_v22 = vmul.f32 %v607_v0, %v17_v14  ;;  %v20_v23 = vld [vmem:[%s1024_s0 + $0x38] sm:$0xff]  ;;  %v38_v25 = vmul.f32 %v607_v0, %v18_v16  ;;  %v39_v28 = vmul.f32 %v607_v0, %v19_v19 }
   0x5   :  { %v53_v10 = vadd.f32 %v612_v1, %v33_v3  ;;  %v55_v12 = vadd.f32 %v612_v1, %v35_v8  ;;  %v56_v13 = vadd.f32 %v612_v1, %v36_v9  ;;  %v40_v32 = vmul.f32 %v607_v0, %v20_v23 }
   0x6   :  { %v86_v17 = vmul.f32 0.70710677, %v54_v11  ;;  %v57_v36 = vadd.f32 %v612_v1, %v37_v22  ;;  %v656_v37 = vmul.f32 0.5, %v54_v11  ;;  %v659_v40 = vadd.f32 %v612_v1, %v38_v25 }
   0x7   :  { %v85_v15 = vmul.f32 0.70710677, %v53_v10  ;;  %v87_v18 = vmul.f32 0.70710677, %v55_v12  ;;  %v643_v21 = vmul.f32 0.70710677, %v56_v13  ;;  %v674_v55 = vadd.f32 %v612_v1, %v39_v28 }
   0x8   :  { %v134_v24 = vand.u32 2147483647, %v86_v17  ;;  %v652_v33 = vmul.f32 0.5, %v53_v10  ;;  %vm102_vm1 = vcmp.ge.f32.partialorder %v86_v17, 0.0  ;;  %v661_v46 = vmul.f32 0.5, %v55_v12 }
   0x9   :  { %v133_v20 = vand.u32 2147483647, %v85_v15  ;;  %v135_v31 = vand.u32 2147483647, %v87_v18  ;;  %v136_v35 = vand.u32 2147483647, %v643_v21  ;;  %v686_v3 = vadd.f32 %v612_v1, %v40_v32 }
   0xa   :  { %v150_v29 = vmul.f32 0.3275911, %v134_v24  ;;  %v358_v30 = vsub.f32 0.0, %v134_v24  ;;  %vm101_vm0 = vcmp.ge.f32.partialorder %v85_v15, 0.0  ;;  %vm103_vm2 = vcmp.ge.f32.partialorder %v87_v18, 0.0 }
   0xb   :  { %v149_v26 = vmul.f32 0.3275911, %v133_v20  ;;  %v357_v27 = vsub.f32 0.0, %v133_v20  ;;  %v151_v39 = vmul.f32 0.3275911, %v135_v31  ;;  %v359_v45 = vsub.f32 0.0, %v135_v31 }
   0xc   :  { %v166_v38 = vadd.f32 1.0, %v150_v29  ;;  %v152_v42 = vmul.f32 0.3275911, %v136_v35  ;;  %v374_v43 = vmul.f32 %v358_v30, %v134_v24  ;;  %v360_v48 = vsub.f32 0.0, %v136_v35 }
   0xd   :  { %v165_v34 = vadd.f32 1.0, %v149_v26  ;;  %v373_v41 = vmul.f32 %v357_v27, %v133_v20  ;;  %v167_v44 = vadd.f32 1.0, %v151_v39  ;;  %v664_v50 = vsel %vm101_vm0, 1.0, %v588_v49 }
   0xe   :  { %v168_v47 = vadd.f32 1.0, %v152_v42  ;;  %v666_v51 = vmul.f32 0.5, %v56_v13  ;;  %v668_v52 = vmul.f32 0.70710677, %v57_v36  ;;  %v671_v54 = vmul.f32 0.70710677, %v659_v40 }
   0xf   :  { %524 = vrcp.f32 %v165_v34  ;;  %v389_v53 = vmul.f32 1.442695, %v373_v41  ;;  %v677_v56 = vsel %vm102_vm1, 1.0, %v588_v49  ;;  %v391_v57 = vmul.f32 1.442695, %v374_v43 }
  0x10   :  { %526 = vrcp.f32 %v166_v38  ;;  %v375_v58 = vmul.f32 %v359_v45, %v135_v31  ;;  %v137_v59 = vand.u32 2147483647, %v668_v52  ;;  %v681_v60 = vsel %vm103_vm2, 1.0, %v588_v49 }
  0x11   :  { %528 = vrcp.f32 %v167_v44  ;;  %v376_v61 = vmul.f32 %v360_v48, %v136_v35  ;;  %v138_v62 = vand.u32 2147483647, %v671_v54  ;;  %vm104_vm3 = vcmp.ge.f32.partialorder %v643_v21, 0.0  ;;  %v21_v21 = vld [vmem:[%s1024_s0 + $0x40] sm:$0xff] }
  0x12   :  { %530 = vrcp.f32 %v168_v47  ;;  %v153_v63 = vmul.f32 0.3275911, %v137_v59  ;;  %v361_v2 = vsub.f32 0.0, %v137_v59  ;;  %v689_v6 = vmul.f32 0.70710677, %v674_v55 }
  0x13   :  { %532 = vpow2.f32 %v389_v53  ;;  %v154_v4 = vmul.f32 0.3275911, %v138_v62  ;;  %v362_v5 = vsub.f32 0.0, %v138_v62  ;;  %v393_v7 = vmul.f32 1.442695, %v375_v58 }
  0x14   :  { %534 = vpow2.f32 %v391_v57  ;;  %v169_v8 = vadd.f32 1.0, %v153_v63  ;;  %v377_v9 = vmul.f32 %v361_v2, %v137_v59  ;;  %v395_v11 = vmul.f32 1.442695, %v376_v61 }
  0x15   :  { %v170_v12 = vadd.f32 1.0, %v154_v4  ;;  %v378_v13 = vmul.f32 %v362_v5, %v138_v62  ;;  %v139_v14 = vand.u32 2147483647, %v689_v6  ;;  %v700_v17 = vsel %vm104_vm3, 1.0, %v588_v49 }
  0x16   :  { %536 = vrcp.f32 %v169_v8  ;;  %v703_v18 = vmul.f32 0.70710677, %v686_v3  ;;  %v706_v20 = vmul.f32 0.5, %v57_v36  ;;  %v397_v24 = vmul.f32 1.442695, %v377_v9 }
  0x17   :  { %538 = vrcp.f32 %v170_v12  ;;  %v155_v22 = vmul.f32 0.3275911, %v139_v14  ;;  %v363_v25 = vsub.f32 0.0, %v139_v14  ;;  %v399_v28 = vmul.f32 1.442695, %v378_v13 }
  0x18   :  { %540 = vpow2.f32 %v393_v7  ;;  %v140_v34 = vand.u32 2147483647, %v703_v18  ;;  %vm105_vm4 = vcmp.ge.f32.partialorder %v668_v52, 0.0  ;;  %v41_v38 = vmul.f32 %v607_v0, %v21_v21 }
  0x19   :  { %v691_v10 = vpop.eup %524  ;;  %542 = vpow2.f32 %v395_v11  ;;  %v171_v29 = vadd.f32 1.0, %v155_v22  ;;  %v379_v32 = vmul.f32 %v363_v25, %v139_v14  ;;  %v736_v12 = vsel %vm105_vm4, 1.0, %v588_v49 }
  0x1a   :  { %v694_v15 = vpop.eup %526  ;;  %v213_v16 = vmul.f32 1.0614054, %v691_v10  ;;  %v156_v47 = vmul.f32 0.3275911, %v140_v34  ;;  %v364_v59 = vsub.f32 0.0, %v140_v34  ;;  %v726_v63 = vadd.f32 %v612_v1, %v41_v38 }
  0x1b   :  { %v214_v19 = vmul.f32 1.0614054, %v694_v15  ;;  %v711_v26 = vpop.eup %528  ;;  %544 = vrcp.f32 %v171_v29  ;;  %v401_v45 = vmul.f32 1.442695, %v379_v32  ;;  %vm106_vm5 = vcmp.ge.f32.partialorder %v671_v54, 0.0 }
  0x1c   :  { %v229_v23 = vadd.f32 -1.4531521, %v213_v16  ;;  %v215_v31 = vmul.f32 1.0614054, %v711_v26  ;;  %v716_v35 = vpop.eup %530  ;;  %546 = vpow2.f32 %v397_v24  ;;  %v172_v62 = vadd.f32 1.0, %v156_v47  ;;  %v22_v24 = vld [vmem:[%s1024_s0 + $0x48] sm:$0xff] }
  0x1d   :  { %v230_v27 = vadd.f32 -1.4531521, %v214_v19  ;;  %v216_v42 = vmul.f32 1.0614054, %v716_v35  ;;  %v533_v43 = vpop.eup %532  ;;  %548 = vpow2.f32 %v399_v28  ;;  %v380_v8 = vmul.f32 %v364_v59, %v140_v34 }
  0x1e   :  { %v245_v30 = vmul.f32 %v691_v10, %v229_v23  ;;  %v231_v41 = vadd.f32 -1.4531521, %v215_v31  ;;  %v535_v48 = vpop.eup %534  ;;  %550 = vpow2.f32 %v401_v45  ;;  %v747_v28 = vmul.f32 0.70710677, %v726_v63 }
  0x1f   :  { %v246_v36 = vmul.f32 %v694_v15, %v230_v27  ;;  %v232_v58 = vadd.f32 -1.4531521, %v216_v42  ;;  %552 = vrcp.f32 %v172_v62  ;;  %v403_v27 = vmul.f32 1.442695, %v380_v8 }
  0x20   :  { %v261_v39 = vadd.f32 1.4214138, %v245_v30  ;;  %v247_v57 = vmul.f32 %v711_v26, %v231_v41  ;;  %v728_v2 = vpop.eup %536  ;;  %vm107_vm6 = vcmp.ge.f32.partialorder %v689_v6, 0.0  ;;  %vm108_vm7 = vcmp.ge.f32.partialorder %v703_v18, 0.0 }
  0x21   :  { %v262_v44 = vadd.f32 1.4214138, %v246_v36  ;;  %v248_v7 = vmul.f32 %v716_v35, %v232_v58  ;;  %v731_v9 = vpop.eup %538  ;;  %v217_v13 = vmul.f32 1.0614054, %v728_v2  ;;  %554 = vpow2.f32 %v403_v27 }
  0x22   :  { %v277_v53 = vmul.f32 %v691_v10, %v261_v39  ;;  %v263_v5 = vadd.f32 1.4214138, %v247_v57  ;;  %v541_v14 = vpop.eup %540  ;;  %v218_v23 = vmul.f32 1.0614054, %v731_v9  ;;  %v754_v39 = vmul.f32 %v607_v0, %v22_v24 }
  0x23   :  { %v278_v61 = vmul.f32 %v694_v15, %v262_v44  ;;  %v264_v22 = vadd.f32 1.4214138, %v248_v7  ;;  %v543_v25 = vpop.eup %542  ;;  %v233_v21 = vadd.f32 -1.4531521, %v217_v13  ;;  %vm109_vm8 = vcmp.ge.f32.partialorder %v747_v28, 0.0 }
  0x24   :  { %v293_v4 = vadd.f32 -0.28449672, %v277_v53  ;;  %v279_v19 = vmul.f32 %v711_v26, %v263_v5  ;;  %v234_v32 = vadd.f32 -1.4531521, %v218_v23 }
  0x25   :  { %v294_v11 = vadd.f32 -0.28449672, %v278_v61  ;;  %v280_v31 = vmul.f32 %v716_v35, %v264_v22  ;;  %v750_v34 = vpop.eup %544  ;;  %v249_v38 = vmul.f32 %v728_v2, %v233_v21  ;;  %v764_v61 = vand.u32 2147483647, %v747_v28 }
  0x26   :  { %v309_v16 = vmul.f32 %v691_v10, %v293_v4  ;;  %v295_v30 = vadd.f32 -0.28449672, %v279_v19  ;;  %v547_v41 = vpop.eup %546  ;;  %v250_v47 = vmul.f32 %v731_v9, %v234_v32  ;;  %v219_v59 = vmul.f32 1.0614054, %v750_v34 }
  0x27   :  { %v310_v52 = vmul.f32 %v694_v15, %v294_v11  ;;  %v296_v45 = vadd.f32 -0.28449672, %v280_v31  ;;  %v759_v53 = vpop.eup %548  ;;  %v265_v58 = vadd.f32 1.4214138, %v249_v38 }
  0x28   :  { %v325_v29 = vadd.f32 0.2548296, %v309_v16  ;;  %v311_v44 = vmul.f32 %v711_v26, %v295_v30  ;;  %v767_v7 = vpop.eup %550  ;;  %v235_v13 = vadd.f32 -1.4531521, %v219_v59  ;;  %v157_v16 = vmul.f32 0.3275911, %v764_v61 }
  0x29   :  { %v326_v36 = vadd.f32 0.2548296, %v310_v52  ;;  %v312_v5 = vmul.f32 %v716_v35, %v296_v45  ;;  %v281_v11 = vmul.f32 %v728_v2, %v265_v58  ;;  %v774_v23 = vpop.eup %552 }
  0x2a   :  { %v341_v42 = vmul.f32 %v691_v10, %v325_v29  ;;  %v327_v4 = vadd.f32 0.2548296, %v311_v44  ;;  %v266_v10 = vadd.f32 1.4214138, %v250_v47  ;;  %v251_v21 = vmul.f32 %v750_v34, %v235_v13 }
  0x2b   :  { %v342_v57 = vmul.f32 %v694_v15, %v326_v36  ;;  %v328_v22 = vadd.f32 0.2548296, %v312_v5  ;;  %v297_v52 = vadd.f32 -0.28449672, %v281_v11  ;;  %v220_v38 = vmul.f32 1.0614054, %v774_v23 }
  0x2c   :  { %v421_v62 = vmul.f32 %v533_v43, %v341_v42  ;;  %v343_v19 = vmul.f32 %v711_v26, %v327_v4  ;;  %v282_v43 = vmul.f32 %v731_v9, %v266_v10  ;;  %v267_v36 = vadd.f32 1.4214138, %v251_v21  ;;  %v23_v5 = vld [vmem:[%s1024_s0 + $0x50] sm:$0xff] }
  0x2d   :  { %v422_v8 = vmul.f32 %v535_v48, %v342_v57  ;;  %v173_v48 = vadd.f32 1.0, %v157_v16  ;;  %v344_v30 = vmul.f32 %v716_v35, %v328_v22  ;;  %v313_v32 = vmul.f32 %v728_v2, %v297_v52  ;;  %v783_v57 = vpop.eup %554 }
  0x2e   :  { %v437_v15 = vsub.f32 1.0, %v421_v62  ;;  %v423_v29 = vmul.f32 %v541_v14, %v343_v19  ;;  %v298_v31 = vadd.f32 -0.28449672, %v282_v43  ;;  %v283_v14 = vmul.f32 %v750_v34, %v267_v36 }
  0x2f   :  { %v438_v24 = vsub.f32 1.0, %v422_v8  ;;  %v424_v45 = vmul.f32 %v543_v25, %v344_v30  ;;  %v236_v35 = vadd.f32 -1.4531521, %v220_v38  ;;  %556 = vrcp.f32 %v173_v48 }
  0x30   :  { %v453_v27 = vmul.f32 %v437_v15, %v664_v50  ;;  %v439_v44 = vsub.f32 1.0, %v423_v29  ;;  %v314_v47 = vmul.f32 %v731_v9, %v298_v31  ;;  %v329_v50 = vadd.f32 0.2548296, %v313_v32 }
  0x31   :  { %v454_v26 = vmul.f32 %v438_v24, %v677_v56  ;;  %v440_v62 = vsub.f32 1.0, %v424_v45  ;;  %v299_v8 = vadd.f32 -0.28449672, %v283_v14  ;;  %v252_v11 = vmul.f32 %v774_v23, %v236_v35 }
  0x32   :  { %v469_v42 = vadd.f32 1.0, %v453_v27  ;;  %v455_v56 = vmul.f32 %v439_v44, %v681_v60  ;;  %v330_v4 = vadd.f32 0.2548296, %v314_v47  ;;  %v345_v10 = vmul.f32 %v728_v2, %v329_v50 }
  0x33   :  { %v470_v58 = vadd.f32 1.0, %v454_v26  ;;  %v456_v60 = vmul.f32 %v440_v62, %v700_v17  ;;  %v315_v2 = vmul.f32 %v750_v34, %v299_v8  ;;  %v268_v16 = vadd.f32 1.4214138, %v252_v11  ;;  %v25_v62 = vld [vmem:[%s1024_s0 + $0x60] sm:$0xff] }
  0x34   :  { %v485_v59 = vmul.f32 %v469_v42, %v652_v33  ;;  %v471_v33 = vadd.f32 1.0, %v455_v56  ;;  %v346_v13 = vmul.f32 %v731_v9, %v330_v4  ;;  %v43_v15 = vmul.f32 %v607_v0, %v23_v5 }
  0x35   :  { %v486_v25 = vmul.f32 %v470_v58, %v656_v37  ;;  %v425_v37 = vmul.f32 %v547_v41, %v345_v10  ;;  %v472_v22 = vadd.f32 1.0, %v456_v60  ;;  %v808_v17 = vadd.f32 %v612_v1, %v754_v39 }
  0x36   :  { %501 = vst [vmem:[%s1026_s2] sm:$0xff] %v485_v59  ;;  %v487_v19 = vmul.f32 %v471_v33, %v661_v46  ;;  %v426_v43 = vmul.f32 %v759_v53, %v346_v13  ;;  %v122_v24 = vsel %vm106_vm5, 1.0, %v588_v49  ;;  %v331_v41 = vadd.f32 0.2548296, %v315_v2  ;;  %v26_v33 = vld [vmem:[%s1024_s0 + $0x68] sm:$0xff] }
  0x37   :  { %502 = vst [vmem:[%s1026_s2 + $0x8] sm:$0xff] %v486_v25  ;;  %v441_v9 = vsub.f32 1.0, %v425_v37  ;;  %v284_v52 = vmul.f32 %v774_v23, %v268_v16  ;;  %v488_v46 = vmul.f32 %v472_v22, %v666_v51  ;;  %v365_v53 = vsub.f32 0.0, %v764_v61 }
  0x38   :  { %503 = vst [vmem:[%s1026_s2 + $0x10] sm:$0xff] %v487_v19  ;;  %v442_v21 = vsub.f32 1.0, %v426_v43  ;;  %v820_v39 = vmul.f32 0.70710677, %v808_v17  ;;  %v347_v54 = vmul.f32 %v750_v34, %v331_v41  ;;  %v74_v29 = vmul.f32 0.5, %v659_v40  ;;  %v24_v40 = vld [vmem:[%s1024_s0 + $0x58] sm:$0xff] }
  0x39   :  { %v457_v48 = vmul.f32 %v441_v9, %v736_v12  ;;  %v300_v27 = vadd.f32 -0.28449672, %v284_v52  ;;  %504 = vst [vmem:[%s1026_s2 + $0x18] sm:$0xff] %v488_v46  ;;  %v831_v31 = vadd.f32 %v612_v1, %v43_v15  ;;  %v123_v34 = vsel %vm107_vm6, 1.0, %v588_v49  ;;  %v842_v58 = vpop.eup %556  ;;  %v27_v52 = vld [vmem:[%s1024_s0 + $0x70] sm:$0xff] }
  0x3a   :  { %v458_v51 = vmul.f32 %v442_v21, %v122_v24  ;;  %v142_v30 = vand.u32 2147483647, %v820_v39  ;;  %v427_v12 = vmul.f32 %v767_v7, %v347_v54  ;;  %v381_v36 = vmul.f32 %v365_v53, %v764_v61 }
  0x3b   :  { %v473_v26 = vadd.f32 1.0, %v457_v48  ;;  %v316_v6 = vmul.f32 %v774_v23, %v300_v27  ;;  %v75_v44 = vmul.f32 0.5, %v674_v55  ;;  %v846_v14 = vmul.f32 0.70710677, %v831_v31 }
  0x3c   :  { %v474_v32 = vadd.f32 1.0, %v458_v51  ;;  %v158_v38 = vmul.f32 0.3275911, %v142_v30  ;;  %v443_v45 = vsub.f32 1.0, %v427_v12  ;;  %v221_v55 = vmul.f32 1.0614054, %v842_v58 }
  0x3d   :  { %v489_v42 = vmul.f32 %v473_v26, %v706_v20  ;;  %v332_v47 = vadd.f32 0.2548296, %v316_v6  ;;  %v44_v35 = vmul.f32 %v607_v0, %v24_v40  ;;  %v405_v59 = vmul.f32 1.442695, %v381_v36  ;;  %v28_v36 = vld [vmem:[%s1024_s0 + $0x78] sm:$0xff] }
  0x3e   :  { %v490_v7 = vmul.f32 %v474_v32, %v74_v29  ;;  %v174_v50 = vadd.f32 1.0, %v158_v38  ;;  %v459_v61 = vmul.f32 %v443_v45, %v123_v34  ;;  %v143_v56 = vand.u32 2147483647, %v846_v14 }
  0x3f   :  { %505 = vst [vmem:[%s1026_s2 + $0x20] sm:$0xff] %v489_v42  ;;  %v348_v20 = vmul.f32 %v774_v23, %v332_v47  ;;  %v237_v23 = vadd.f32 -1.4531521, %v221_v55  ;;  %v124_v25 = vsel %vm108_vm7, 1.0, %v588_v49  ;;  %v366_v10 = vsub.f32 0.0, %v142_v30 }
  0x40   :  { %506 = vst [vmem:[%s1026_s2 + $0x28] sm:$0xff] %v490_v7  ;;  %558 = vrcp.f32 %v174_v50  ;;  %v475_v4 = vadd.f32 1.0, %v459_v61  ;;  %v159_v8 = vmul.f32 0.3275911, %v143_v56  ;;  %v866_v11 = vadd.f32 %v612_v1, %v44_v35 }
  0x41   :  { %v428_v5 = vmul.f32 %v783_v57, %v348_v20  ;;  %v253_v37 = vmul.f32 %v842_v58, %v237_v23  ;;  %v45_v57 = vmul.f32 %v607_v0, %v25_v62  ;;  %v76_v2 = vmul.f32 0.5, %v686_v3 }
  0x42   :  { %v491_v60 = vmul.f32 %v475_v4, %v75_v44  ;;  %560 = vpow2.f32 %v405_v59  ;;  %v175_v18 = vadd.f32 1.0, %v159_v8  ;;  %v875_v16 = vmul.f32 0.70710677, %v866_v11 }
  0x43   :  { %v444_v13 = vsub.f32 1.0, %v428_v5  ;;  %v269_v19 = vadd.f32 1.4214138, %v253_v37  ;;  %v881_v22 = vadd.f32 %v612_v1, %v45_v57  ;;  %v46_v43 = vmul.f32 %v607_v0, %v26_v33 }
  0x44   :  { %507 = vst [vmem:[%s1026_s2 + $0x30] sm:$0xff] %v491_v60  ;;  %562 = vrcp.f32 %v175_v18  ;;  %v144_v9 = vand.u32 2147483647, %v875_v16  ;;  %v382_v41 = vmul.f32 %v366_v10, %v142_v30  ;;  %v367_v29 = vsub.f32 0.0, %v143_v56 }
  0x45   :  { %v460_v15 = vmul.f32 %v444_v13, %v124_v25  ;;  %v285_v24 = vmul.f32 %v842_v58, %v269_v19  ;;  %v890_v21 = vmul.f32 0.70710677, %v881_v22  ;;  %v893_v54 = vadd.f32 %v612_v1, %v46_v43 }
  0x46   :  { %v160_v46 = vmul.f32 0.3275911, %v144_v9  ;;  %v47_v30 = vmul.f32 %v607_v0, %v27_v52  ;;  %v407_v32 = vmul.f32 1.442695, %v382_v41  ;;  %v383_v45 = vmul.f32 %v367_v29, %v143_v56 }
  0x47   :  { %v476_v3 = vadd.f32 1.0, %v460_v15  ;;  %v301_v48 = vadd.f32 -0.28449672, %v285_v24  ;;  %v145_v26 = vand.u32 2147483647, %v890_v21  ;;  %v368_v35 = vsub.f32 0.0, %v144_v9 }
  0x48   :  { %v176_v51 = vadd.f32 1.0, %v160_v46  ;;  %v908_v42 = vmul.f32 0.70710677, %v893_v54  ;;  %v912_v7 = vadd.f32 %v612_v1, %v47_v30  ;;  %v48_v59 = vmul.f32 %v607_v0, %v28_v36 }
  0x49   :  { %v492_v53 = vmul.f32 %v476_v3, %v76_v2  ;;  %v317_v12 = vmul.f32 %v842_v58, %v301_v48  ;;  %v161_v34 = vmul.f32 0.3275911, %v145_v26  ;;  %v409_v23 = vmul.f32 1.442695, %v383_v45 }
  0x4a   :  { %v895_v27 = vpop.eup %558  ;;  %564 = vrcp.f32 %v176_v51  ;;  %v146_v20 = vand.u32 2147483647, %v908_v42  ;;  %v369_v25 = vsub.f32 0.0, %v145_v26  ;;  %v925_v10 = vmul.f32 0.70710677, %v912_v7 }
  0x4b   :  { %508 = vst [vmem:[%s1026_s2 + $0x38] sm:$0xff] %v492_v53  ;;  %v222_v6 = vmul.f32 1.0614054, %v895_v27  ;;  %v333_v38 = vadd.f32 0.2548296, %v317_v12  ;;  %v177_v47 = vadd.f32 1.0, %v161_v34  ;;  %566 = vpow2.f32 %v407_v32 }
  0x4c   :  { %v561_v44 = vpop.eup %560  ;;  %v162_v5 = vmul.f32 0.3275911, %v146_v20  ;;  %v77_v0 = vmul.f32 0.5, %v726_v63  ;;  %v384_v37 = vmul.f32 %v368_v35, %v144_v9  ;;  %v147_v57 = vand.u32 2147483647, %v925_v10 }
  0x4d   :  { %v238_v40 = vadd.f32 -1.4531521, %v222_v6  ;;  %v349_v50 = vmul.f32 %v842_v58, %v333_v38  ;;  %568 = vrcp.f32 %v177_v47  ;;  %v125_v58 = vsel %vm109_vm8, 1.0, %v588_v49 }
  0x4e   :  { %v917_v55 = vpop.eup %562  ;;  %v178_v13 = vadd.f32 1.0, %v162_v5  ;;  %v931_v2 = vadd.f32 %v612_v1, %v48_v59  ;;  %vm110_vm9 = vcmp.ge.f32.partialorder %v820_v39, 0.0  ;;  %v385_v43 = vmul.f32 %v369_v25, %v145_v26 }
  0x4f   :  { %v254_v61 = vmul.f32 %v895_v27, %v238_v40  ;;  %v429_v62 = vmul.f32 %v561_v44, %v349_v50  ;;  %v223_v56 = vmul.f32 1.0614054, %v917_v55  ;;  %v163_v3 = vmul.f32 0.3275911, %v147_v57 }
  0x50   :  { %570 = vrcp.f32 %v178_v13  ;;  %v411_v1 = vmul.f32 1.442695, %v384_v37  ;;  %v370_v52 = vsub.f32 0.0, %v146_v20  ;;  %v940_v53 = vmul.f32 0.70710677, %v931_v2 }
  0x51   :  { %v270_v4 = vadd.f32 1.4214138, %v254_v61  ;;  %v445_v8 = vsub.f32 1.0, %v429_v62  ;;  %v239_v60 = vadd.f32 -1.4531521, %v223_v56  ;;  %572 = vpow2.f32 %v409_v23 }
  0x52   :  { %v179_v46 = vadd.f32 1.0, %v163_v3  ;;  %v413_v6 = vmul.f32 1.442695, %v385_v43  ;;  %v148_v32 = vand.u32 2147483647, %v940_v53  ;;  %v126_v44 = vsel %vm110_vm9, 1.0, %v588_v49 }
  0x53   :  { %v286_v33 = vmul.f32 %v895_v27, %v270_v4  ;;  %v461_v28 = vmul.f32 %v445_v8, %v125_v58  ;;  %v255_v15 = vmul.f32 %v917_v55, %v239_v60  ;;  %v386_v45 = vmul.f32 %v370_v52, %v146_v20 }
  0x54   :  { %v934_v19 = vpop.eup %564  ;;  %574 = vrcp.f32 %v179_v46  ;;  %v164_v47 = vmul.f32 0.3275911, %v148_v32  ;;  %vm111_vm10 = vcmp.ge.f32.partialorder %v846_v14, 0.0  ;;  %v78_v23 = vmul.f32 0.5, %v808_v17 }
  0x55   :  { %v302_v18 = vadd.f32 -0.28449672, %v286_v33  ;;  %v477_v24 = vadd.f32 1.0, %v461_v28  ;;  %v271_v9 = vadd.f32 1.4214138, %v255_v15  ;;  %v567_v48 = vpop.eup %566  ;;  %576 = vpow2.f32 %v411_v1 }
  0x56   :  { %v224_v41 = vmul.f32 1.0614054, %v934_v19  ;;  %578 = vpow2.f32 %v413_v6  ;;  %v180_v62 = vadd.f32 1.0, %v164_v47  ;;  %v415_v8 = vmul.f32 1.442695, %v386_v45 }
  0x57   :  { %v318_v63 = vmul.f32 %v895_v27, %v302_v18  ;;  %v493_v29 = vmul.f32 %v477_v24, %v77_v0  ;;  %v287_v30 = vmul.f32 %v917_v55, %v271_v9  ;;  %v943_v26 = vpop.eup %568  ;;  %v127_v37 = vsel %vm111_vm10, 1.0, %v588_v49 }
  0x58   :  { %v240_v12 = vadd.f32 -1.4531521, %v224_v41  ;;  %v225_v40 = vmul.f32 1.0614054, %v943_v26  ;;  %580 = vrcp.f32 %v180_v62  ;;  %vm112_vm11 = vcmp.ge.f32.partialorder %v875_v16, 0.0 }
  0x59   :  { %v334_v51 = vadd.f32 0.2548296, %v318_v63  ;;  %509 = vst [vmem:[%s1026_s2 + $0x40] sm:$0xff] %v493_v29  ;;  %v303_v36 = vadd.f32 -0.28449672, %v287_v30  ;;  %582 = vpow2.f32 %v415_v8  ;;  %v372_v63 = vsub.f32 0.0, %v148_v32 }
  0x5a   :  { %v256_v38 = vmul.f32 %v934_v19, %v240_v12  ;;  %v241_v59 = vadd.f32 -1.4531521, %v225_v40  ;;  %v957_v4 = vpop.eup %570  ;;  %v79_v29 = vmul.f32 0.5, %v831_v31  ;;  %vm113_vm12 = vcmp.ge.f32.partialorder %v890_v21, 0.0 }
  0x5b   :  { %v350_v34 = vmul.f32 %v895_v27, %v334_v51  ;;  %v319_v61 = vmul.f32 %v917_v55, %v303_v36  ;;  %v371_v27 = vsub.f32 0.0, %v147_v57  ;;  %v573_v20 = vpop.eup %572  ;;  %v226_v25 = vmul.f32 1.0614054, %v957_v4 }
  0x5c   :  { %v272_v35 = vadd.f32 1.4214138, %v256_v38  ;;  %v257_v58 = vmul.f32 %v943_v26, %v241_v59  ;;  %v388_v38 = vmul.f32 %v372_v63, %v148_v32  ;;  %v80_v16 = vmul.f32 0.5, %v866_v11 }
  0x5d   :  { %v430_v50 = vmul.f32 %v567_v48, %v350_v34  ;;  %v335_v5 = vadd.f32 0.2548296, %v319_v61  ;;  %v242_v28 = vadd.f32 -1.4531521, %v226_v25  ;;  %v387_v18 = vmul.f32 %v371_v27, %v147_v57 }
  0x5e   :  { %v288_v39 = vmul.f32 %v934_v19, %v272_v35  ;;  %v273_v0 = vadd.f32 1.4214138, %v257_v58  ;;  %v969_v24 = vpop.eup %574  ;;  %vm114_vm13 = vcmp.ge.f32.partialorder %v908_v42, 0.0  ;;  %vm115_vm14 = vcmp.ge.f32.partialorder %v925_v10, 0.0 }
  0x5f   :  { %v446_v56 = vsub.f32 1.0, %v430_v50  ;;  %v351_v60 = vmul.f32 %v917_v55, %v335_v5  ;;  %v258_v55 = vmul.f32 %v957_v4, %v242_v28  ;;  %v577_v52 = vpop.eup %576  ;;  %v227_v46 = vmul.f32 1.0614054, %v969_v24 }
  0x60   :  { %v304_v13 = vadd.f32 -0.28449672, %v288_v39  ;;  %v289_v17 = vmul.f32 %v943_v26, %v273_v0  ;;  %v417_v48 = vmul.f32 1.442695, %v387_v18  ;;  %v579_v6 = vpop.eup %578  ;;  %vm116_vm15 = vcmp.ge.f32.partialorder %v940_v53, 0.0 }
  0x61   :  { %v462_v33 = vmul.f32 %v446_v56, %v126_v44  ;;  %v431_v43 = vmul.f32 %v573_v20, %v351_v60  ;;  %v274_v57 = vadd.f32 1.4214138, %v258_v55  ;;  %v243_v36 = vadd.f32 -1.4531521, %v227_v46 }
  0x62   :  { %v320_v3 = vmul.f32 %v934_v19, %v304_v13  ;;  %v305_v1 = vadd.f32 -0.28449672, %v289_v17  ;;  %v128_v44 = vsel %vm112_vm11, 1.0, %v588_v49  ;;  %v581_v50 = vpop.eup %580  ;;  %584 = vpow2.f32 %v417_v48 }
  0x63   :  { %v478_v15 = vadd.f32 1.0, %v462_v33  ;;  %v447_v41 = vsub.f32 1.0, %v431_v43  ;;  %v290_v34 = vmul.f32 %v957_v4, %v274_v57  ;;  %v228_v27 = vmul.f32 1.0614054, %v581_v50  ;;  %v583_v20 = vpop.eup %582 }
  0x64   :  { %v336_v14 = vadd.f32 0.2548296, %v320_v3  ;;  %v321_v12 = vmul.f32 %v943_v26, %v305_v1  ;;  %v419_v56 = vmul.f32 1.442695, %v388_v38  ;;  %v130_v3 = vsel %vm114_vm13, 1.0, %v588_v49 }
  0x65   :  { %v494_v9 = vmul.f32 %v478_v15, %v78_v23  ;;  %v463_v51 = vmul.f32 %v447_v41, %v127_v37  ;;  %v306_v31 = vadd.f32 -0.28449672, %v290_v34  ;;  %v244_v58 = vadd.f32 -1.4531521, %v228_v27 }
  0x66   :  { %v352_v30 = vmul.f32 %v934_v19, %v336_v14  ;;  %v337_v47 = vadd.f32 0.2548296, %v321_v12  ;;  %v259_v19 = vmul.f32 %v969_v24, %v243_v36  ;;  %v129_v23 = vsel %vm113_vm12, 1.0, %v588_v49 }
  0x67   :  { %510 = vst [vmem:[%s1026_s2 + $0x48] sm:$0xff] %v494_v9  ;;  %v479_v40 = vadd.f32 1.0, %v463_v51  ;;  %v322_v32 = vmul.f32 %v957_v4, %v306_v31  ;;  %v260_v60 = vmul.f32 %v581_v50, %v244_v58  ;;  %586 = vpow2.f32 %v419_v56 }
  0x68   :  { %v432_v45 = vmul.f32 %v577_v52, %v352_v30  ;;  %v353_v59 = vmul.f32 %v943_v26, %v337_v47  ;;  %v275_v62 = vadd.f32 1.4214138, %v259_v19  ;;  %v81_v37 = vmul.f32 0.5, %v881_v22 }
  0x69   :  { %v495_v61 = vmul.f32 %v479_v40, %v79_v29  ;;  %v338_v26 = vadd.f32 0.2548296, %v322_v32  ;;  %v276_v18 = vadd.f32 1.4214138, %v260_v60  ;;  %v82_v22 = vmul.f32 0.5, %v893_v54 }
  0x6a   :  { %v448_v35 = vsub.f32 1.0, %v432_v45  ;;  %v433_v39 = vmul.f32 %v579_v6, %v353_v59  ;;  %v291_v25 = vmul.f32 %v969_v24, %v275_v62  ;;  %v131_v46 = vsel %vm115_vm14, 1.0, %v588_v49 }
  0x6b   :  { %511 = vst [vmem:[%s1026_s2 + $0x50] sm:$0xff] %v495_v61  ;;  %v354_v13 = vmul.f32 %v957_v4, %v338_v26  ;;  %v292_v42 = vmul.f32 %v581_v50, %v276_v18  ;;  %v83_v10 = vmul.f32 0.5, %v912_v7  ;;  %v132_v34 = vsel %vm116_vm15, 1.0, %v588_v49 }
  0x6c   :  { %v464_v5 = vmul.f32 %v448_v35, %v128_v44  ;;  %v449_v33 = vsub.f32 1.0, %v433_v39  ;;  %v307_v0 = vadd.f32 -0.28449672, %v291_v25  ;;  %v585_v17 = vpop.eup %584  ;;  %v84_v40 = vmul.f32 0.5, %v931_v2 }
  0x6d   :  { %v434_v15 = vmul.f32 %v583_v20, %v354_v13  ;;  %v308_v9 = vadd.f32 -0.28449672, %v292_v42 }
  0x6e   :  { %v480_v8 = vadd.f32 1.0, %v464_v5  ;;  %v465_v28 = vmul.f32 %v449_v33, %v129_v23  ;;  %v323_v21 = vmul.f32 %v969_v24, %v307_v0 }
  0x6f   :  { %v450_v4 = vsub.f32 1.0, %v434_v15  ;;  %v324_v1 = vmul.f32 %v581_v50, %v308_v9 }
  0x70   :  { %v496_v11 = vmul.f32 %v480_v8, %v80_v16  ;;  %v481_v43 = vadd.f32 1.0, %v465_v28  ;;  %v339_v55 = vadd.f32 0.2548296, %v323_v21 }
  0x71   :  { %v466_v41 = vmul.f32 %v450_v4, %v130_v3  ;;  %v340_v48 = vadd.f32 0.2548296, %v324_v1  ;;  %v587_v29 = vpop.eup %586 }
  0x72   :  { %512 = vst [vmem:[%s1026_s2 + $0x58] sm:$0xff] %v496_v11  ;;  %v497_v63 = vmul.f32 %v481_v43, %v81_v37  ;;  %v355_v14 = vmul.f32 %v969_v24, %v339_v55 }
  0x73   :  { %v482_v52 = vadd.f32 1.0, %v466_v41  ;;  %v356_v54 = vmul.f32 %v581_v50, %v340_v48 }
  0x74   :  { %513 = vst [vmem:[%s1026_s2 + $0x60] sm:$0xff] %v497_v63  ;;  %v435_v57 = vmul.f32 %v585_v17, %v355_v14 }
  0x75   :  { %v498_v51 = vmul.f32 %v482_v52, %v82_v22  ;;  %v436_v12 = vmul.f32 %v587_v29, %v356_v54 }
  0x76   :  { %v451_v30 = vsub.f32 1.0, %v435_v57 }
  0x77   :  { %514 = vst [vmem:[%s1026_s2 + $0x68] sm:$0xff] %v498_v51  ;;  %v452_v36 = vsub.f32 1.0, %v436_v12 }
  0x78   :  { %v467_v24 = vmul.f32 %v451_v30, %v131_v46 }
  0x79   :  { %v468_v44 = vmul.f32 %v452_v36, %v132_v34 }
  0x7a   :  { %v483_v6 = vadd.f32 1.0, %v467_v24 }
  0x7b   :  { %v484_v53 = vadd.f32 1.0, %v468_v44 }
  0x7c   :  { %v499_v38 = vmul.f32 %v483_v6, %v83_v10 }
  0x7d   :  { %v500_v45 = vmul.f32 %v484_v53, %v84_v40 }
  0x7e   :  { %515 = vst [vmem:[%s1026_s2 + $0x70] sm:$0xff] %v499_v38 }
  0x7f   :  { %516 = vst [vmem:[%s1026_s2 + $0x78] sm:$0xff] %v500_v45 }

// kernel: down_forward.3
= control target key start
LH: loop header
LB: loop body
LE: loop exit
PB: predicated region body
PF: predicated region fallthrough
CT: control target
= control target key end

     0   :  { %s2328_s0 = inlined_call_operand.vmem [shape: bf16[2,16,16,4], index: 0, kind: input, shape index: {}, may-alias: {0,1,2}]   ;;  %s2329_s1 = inlined_call_operand.vmem [shape: bf16[2,16,16,4], index: 1, kind: input, shape index: {}, may-alias: {0,1,2}]   ;;  %s2330_s2 = inlined_call_operand.vmem [shape: bf16[2,16,16,4], index: 2, kind: input, shape index: {}, may-alias: {0,1,2}]   ;;  %s2331_s3 = inlined_call_operand.vmem [shape: bf16[3,3,4,128], index: 3, kind: input, shape index: {}]   ;;  %s2332_s4 = inlined_call_operand.vmem [shape: f32[2,4], index: 4, kind: input, shape index: {}]   ;;  %s2333_s5 = inlined_call_operand.vmem [shape: f32[2,16,16,128], index: 5, kind: output, shape index: {0}]   ;;  %s2334_s6 = inlined_call_operand.vmem [shape: f32[2,128], index: 6, kind: output, shape index: {1}]  }
   0x1   :  { %2337 = sst [smem:[#allocation12_spill]] %s2333_s5 }
   0x2   :  { %s1940_s21 = smov 0   ;;  %s1942_s22 = smov 0  }
   0x3   :  { %s1944_s23 = smov 0   ;;  %s1946_s24 = smov 0  }
   0x4   :  { %s1948_s25 = smov 0   ;;  %s1950_s26 = smov 0  }
   0x5   :  { %s1952_s27 = smov 0   ;;  %s1954_s4 = smov 0  }
   0x6   :  { %s1956_s28 = smov 0  }
   0x7 LB: > { %2338 = sst [smem:[#allocation6_spill]] %s1874_s22  ;;  %s1986_s29 = sadd.s32 4294967295, %s1902_s28   ;;  %s1902_s28 = sphi %s1956_s28, %s2364_s28   ;;  %s1898_s4 = sphi %s1954_s4, %s2359_s4   ;;  %s1894_s27 = sphi %s1952_s27, %s2358_s27   ;;  %s1890_s26 = sphi %s1950_s26, %s2363_s26   ;;  %s1886_s25 = sphi %s1948_s25, %s2362_s25   ;;  %s1882_s24 = sphi %s1946_s24, %s2361_s24   ;;  %s1878_s23 = sphi %s1944_s23, %s2360_s23   ;;  %s1874_s22 = sphi %s1942_s22, %s2355_s22   ;;  %s1870_s21 = sphi %s1940_s21, %s2354_s21  }
   0x8   : > { %2339 = sst [smem:[#allocation7_spill]] %s1898_s4  ;;  %s1989_s30 = sadd.s32 1, %s1902_s28  }
   0x9   : > { %p22_p0 = scmp.gt.s32.totalorder %s1986_s29, 0  ;;  %p1498_p1 = scmp.lt.s32.totalorder %s1986_s29, 15 }
   0xa   : > { %s26_s7 = sadd.s32 4294967295, %s1989_s30  ;;  %s34_s8 = sadd.s32 1, %s1898_s4 }
   0xb   : > { %s23_s9 = scalar_select %p22_p0, %s1986_s29, 0 }
   0xc   : > { %p27_p2 = scmp.gt.s32.totalorder %s26_s7, 0  ;;  %p1503_p3 = scmp.lt.s32.totalorder %s26_s7, 15 }
   0xd   : > { %s2366_s9 = smov (!%p1498_p1, %s23_s9), 15  ;;  %p41_p4 = scmp.ne.s32.totalorder %s1898_s4, %s1894_s27 }
   0xe   : > { %s2368_s7 = smov (!%p27_p2, %s26_s7), 0  ;;  %p42_p5 = scmp.eq.s32.totalorder %s1902_s28, 0 }
   0xf   : > { %s2370_s7 = smov (!%p1503_p3, %s2368_s7), 15  ;;  %p57_p7 = scmp.gt.s32.totalorder %s1902_s28, 0 }
  0x10   : > { %p2005_p6 = por %p42_p5, %p41_p4  ;;  %s31_s11 = ssub.s32 %s2366_s9, %s2370_s7 }
  0x11   : > { %p1508_p8 = scmp.lt.s32.totalorder %s1902_s28, 15  ;;  %p32_p9 = scmp.eq.s32.totalorder %s31_s11, 0 }
  0x12   : > { %p61_p10 = scmp.gt.s32.totalorder %s1989_s30, 0  ;;  %p1513_p11 = scmp.lt.s32.totalorder %s1989_s30, 15 }
  0x13   : > { %s58_s12 = scalar_select %p57_p7, %s1902_s28, 0 }
  0x14   : > { %s2015_s13 = scalar_select %p32_p9, %s1898_s4, %s34_s8  }
  0x15   : > { %s2372_s12 = smov (!%p1508_p8, %s58_s12), 15  ;;  %s68_s15 = sadd.s32 1, %s1890_s26 }
  0x16   : > { %2341 = sst [smem:[#allocation8_spill]] %s2015_s13  ;;  %p75_p12 = scmp.ne.s32.totalorder %s1890_s26, %s1886_s25 }
  0x17   : > { %s62_s14 = scalar_select %p61_p10, %s1989_s30, 0 }
  0x18   : > { %s96_s16 = sadd.s32 1, %s1989_s30  ;;  %p2029_p13 = por %p75_p12, %p42_p5 }
  0x19   : > { %s2374_s14 = smov (!%p1513_p11, %s62_s14), 15  ;;  %p97_p1 = scmp.gt.s32.totalorder %s96_s16, 0 }
  0x1a   : > { %s65_s18 = ssub.s32 %s2372_s12, %s2374_s14  ;;  %p1523_p2 = scmp.lt.s32.totalorder %s96_s16, 15 }
  0x1b   : > { %p66_p3 = scmp.eq.s32.totalorder %s65_s18, 0  ;;  %s104_s19 = sadd.s32 1, %s1882_s24 }
  0x1c   : > { %s2376_s16 = smov (!%p97_p1, %s96_s16), 0  ;;  %p111_p4 = scmp.ne.s32.totalorder %s1882_s24, %s1878_s23 }
  0x1d   : > { %s2037_s20 = scalar_select %p66_p3, %s1890_s26, %s68_s15  }
  0x1e   : > { %s2378_s16 = smov (!%p1523_p2, %s2376_s16), 15  ;;  %s169_s7 = ssub.s32 %s1902_s28, %s1989_s30 }
  0x1f   : > { %2343 = sst [smem:[#allocation9_spill]] %s2037_s20  ;;  %s101_s8 = ssub.s32 %s2374_s14, %s2378_s16 }
  0x20   : > { %p170_p7 = scmp.eq.s32.totalorder %s169_s7, 0  ;;  %p102_p8 = scmp.eq.s32.totalorder %s101_s8, 0 }
  0x21   : > { %p2046_p9 = por %p111_p4, %p42_p5  ;;  %s172_s13 = sadd.s32 1, %s1874_s22 }
  0x22   : > { %p182_p10 = scmp.ne.s32.totalorder %s1874_s22, %s1870_s21  ;;  %p183_p11 = scmp.eq.s32.totalorder %s1986_s29, 15 }
  0x23   : > { %s2054_s5 = scalar_select %p102_p8, %s1882_s24, %s104_s19  }
  0x24   : > { %s2057_s18 = scalar_select %p170_p7, %s1874_s22, %s172_s13  }
  0x25   : > { %2345 = sst [smem:[#allocation10_spill]] %s2054_s5  ;;  %p2060_p12 = por %p183_p11, %p182_p10 }
  0x26   : > { %2346 = sst [smem:[#allocation11_spill]] %s2057_s18  ;;  %p1529_p1 = scmp.ge.s32.totalorder %s1902_s28, 16 }
  0x28   : > { %232 = sbr.rel (%p1529_p1) target bundleno = 68 (0x44), region = 24 }
  0x2f   : > { %235 = sbr.rel (!%p2005_p6) target bundleno = 54 (0x36), region = 28  ;;  %s237_s16 = sand.u32 (%p2005_p6), 1, %s1898_s4  }
  0x30   : > { %s1623_s7 = sshll.u32 (%p2005_p6), %s2366_s9, 3  ;;  %s1530_s8 = sshll.u32 (%p2005_p6), %s237_s16, 4 }
  0x31   : > { %s247_s13 = scalar_lea.vmem (%p2005_p6), %s2328_s0, %s1623_s7  ;;  %s239_s5 = scalar_lea.vmem (%p2005_p6), [#allocation2], %s1530_s8 }
  0x32   : > { %v263_v0 = vld [vmem:[%s247_s13] sm:$0xff] (%p2005_p6)  }
  0x33   : > { %v267_v1 = vld [vmem:[%s247_s13 + $0x80] sm:$0xff] (%p2005_p6)   ;;  %264 = vst [vmem:[%s239_s5] sm:$0xff] (%p2005_p6), %v263_v0  }
  0x34   : > { %268 = vst [vmem:[%s239_s5 + $0x8] sm:$0xff] (%p2005_p6), %v267_v1  }
  0x36 PF: > { %301 = sbr.rel (!%p2029_p13) target bundleno = 61 (0x3d), region = 69  ;;  %s303_s10 = sand.u32 (%p2029_p13), 1, %s1890_s26  }
  0x37   : > { %s1626_s18 = sshll.u32 (%p2029_p13), %s2372_s12, 3  ;;  %s1538_s4 = sshll.u32 (%p2029_p13), %s303_s10, 4 }
  0x38   : > { %s312_s22 = scalar_lea.vmem (%p2029_p13), %s2329_s1, %s1626_s18  ;;  %s305_s20 = scalar_lea.vmem (%p2029_p13), [#allocation3], %s1538_s4 }
  0x39   : > { %v328_v2 = vld [vmem:[%s312_s22] sm:$0xff] (%p2029_p13)  }
  0x3a   : > { %v332_v3 = vld [vmem:[%s312_s22 + $0x80] sm:$0xff] (%p2029_p13)   ;;  %329 = vst [vmem:[%s305_s20] sm:$0xff] (%p2029_p13), %v328_v2  }
  0x3b   : > { %333 = vst [vmem:[%s305_s20 + $0x8] sm:$0xff] (%p2029_p13), %v332_v3  }
  0x3d PF: > { %366 = sbr.rel (!%p2046_p9) target bundleno = 68 (0x44), region = 110  ;;  %s368_s5 = sand.u32 (%p2046_p9), 1, %s1882_s24  }
  0x3e   : > { %s1629_s17 = sshll.u32 (%p2046_p9), %s2374_s14, 3  ;;  %s1546_s7 = sshll.u32 (%p2046_p9), %s368_s5, 4 }
  0x3f   : > { %s378_s19 = scalar_lea.vmem (%p2046_p9), %s2330_s2, %s1629_s17  ;;  %s370_s18 = scalar_lea.vmem (%p2046_p9), [#allocation4], %s1546_s7 }
  0x40   : > { %v394_v4 = vld [vmem:[%s378_s19] sm:$0xff] (%p2046_p9)  }
  0x41   : > { %v398_v5 = vld [vmem:[%s378_s19 + $0x80] sm:$0xff] (%p2046_p9)   ;;  %395 = vst [vmem:[%s370_s18] sm:$0xff] (%p2046_p9), %v394_v4  }
  0x42   : > { %399 = vst [vmem:[%s370_s18 + $0x8] sm:$0xff] (%p2046_p9), %v398_v5  }
  0x44 PF: > { %p1554_p5 = scmp.ge.s32.totalorder %s1902_s28, 1  ;;  %p431_p6 = scmp.lt.s32.totalorder %s1902_s28, 17 }
  0x46   : > { %p432_p13 = pnand %p1554_p5, %p431_p6 }
  0x47   : > { %vm602_vm0 = vcmask (!%p432_p13), 1041408   ;;  %v1582_v6 = vld [vmem:[%s2331_s3 + $0x8] sm:$0x3] (!%p432_p13)  ;;  %s445_s14 = sand.u32 (!%p432_p13), 1, %s1886_s25   ;;  %v1585_v8 = vld [vmem:[%s2331_s3 + $0xa] sm:$0x3] (!%p432_p13) }
  0x48   : > { %435 = sbr.rel (%p432_p13) target bundleno = 378 (0x17a), region = 151  ;;  %1748 = vmatprep.subr.msk.bf16.mxu0 (!%p432_p13), %vm602_vm0, %v1582_v6  ;;  %v912_v7 = vsel (!%p432_p13), %vm602_vm0, %v1582_v6, 0  ;;  %s1556_s11 = sshll.u32 (!%p432_p13), %s445_s14, 4  ;;  %v1565_v9 = vld [vmem:[%s2331_s3 + $0x2] sm:$0x3] (!%p432_p13)  ;;  %vm597_vm1 = vcmask (!%p432_p13), 31744  }
  0x49   : > { %1683 = vmatpush3.bf16.msra.mxu0 (!%p432_p13), %v912_v7  ;;  %1744 = vmatprep.subr.msk.bf16.mxu1 (!%p432_p13), %vm602_vm0, %v1565_v9  ;;  %v604_v10 = vsel (!%p432_p13), %vm602_vm0, %v1565_v9, 0  ;;  %s447_s25 = scalar_lea.vmem (!%p432_p13), [#allocation3], %s1556_s11  ;;  %v2113_v18 = vld [vmem:[%s2331_s3] sm:$0x3] (!%p432_p13)  ;;  %v976_v20 = vsel (!%p432_p13), %vm602_vm0, %v1585_v8, 0  ;;  %vm589_vm3 = vcmask (!%p432_p13), 1047552  }
  0x4a   : > { %v777_v11 = vld [vmem:[%s447_s25] sm:$0xf] (!%p432_p13)  ;;  %v2102_v12 = vld [vmem:[%s447_s25 + $0x4] sm:$0xf] (!%p432_p13)  ;;  %v779_v13 = vld [vmem:[%s447_s25 + $0x8] sm:$0xf] (!%p432_p13)  ;;  %1749 = vmatprep.subr.msk.bf16.mxu0 (!%p432_p13), %vm602_vm0, %v1585_v8  ;;  %1659 = vmatpush3.bf16.msra.mxu1 (!%p432_p13), %v604_v10 }
  0x4b   : > { %v2106_v14 = vcombine.low (!%p432_p13), %v777_v11, %v2102_v12  ;;  %v1577_v15 = vcombine.low (!%p432_p13), %v777_v11, %v777_v11  ;;  %v2108_v16 = vld [vmem:[%s447_s25 + $0xc] sm:$0xf] (!%p432_p13)  ;;  %v1578_v17 = vcombine.low (!%p432_p13), %v779_v13, %v779_v13  ;;  %vm590_vm2 = vsmask.f32 (!%p432_p13), 7424  ;;  %1745 = vmatprep.subr.msk.bf16.mxu1 (!%p432_p13), %vm602_vm0, %v2113_v18  ;;  %s438_s12 = sand.u32 (!%p432_p13), 1, %s1894_s27   ;;  %s1035_s19 = sadd.s32 (!%p432_p13), 2, %s1986_s29 }
  0x4c   : > { %v2116_v19 = vcombine.low (!%p432_p13), %v779_v13, %v2108_v16  ;;  %v1594_v24 = vld [vmem:[%s2331_s3 + $0xc] sm:$0x3] (!%p432_p13)  ;;  %vm2137_vm4 = vmand (!%p432_p13), %vm589_vm3, %vm590_vm2  ;;  %s1555_s18 = sshll.u32 (!%p432_p13), %s438_s12, 4  ;;  %p2153_p2 = scmp.le.s32.totalorder (!%p432_p13), %s1035_s19, 16  ;;  %v2165_v38 = vld [vmem:[%s2331_s3 + $0xe] sm:$0x3] (!%p432_p13) }
  0x4d   : > { %v804_v21 = vshrl.u32 (!%p432_p13), %v2106_v14, 16  ;;  %v807_v22 = vshll.u32 (!%p432_p13), %v2106_v14, 16  ;;  %v830_v23 = vshll.u32 (!%p432_p13), %v1577_v15, 16  ;;  %1684 = vmatprep.mubr.msk.bf16.mxu0 (!%p432_p13), %vm597_vm1, %v2106_v14  ;;  %v834_v28 = vshll.u32 (!%p432_p13), %v1578_v17, 16  ;;  %s440_s25 = scalar_lea.vmem (!%p432_p13), [#allocation2], %s1555_s18  ;;  %s452_s20 = sand.u32 (!%p432_p13), 1, %s1878_s23  }
  0x4e   : > { %v814_v25 = vshll.u32 (!%p432_p13), %v2116_v19, 16  ;;  %1685 = vmatmul.mubr.msk.bf16.vlgmr.msra.gmra.mrb[0].mxu0 (!%p432_p13), %vm597_vm1, %v2116_v19  ;;  %v811_v27 = vshrl.u32 (!%p432_p13), %v2116_v19, 16  ;;  %v1126_v37 = vsel (!%p432_p13), %vm602_vm0, %v1594_v24, 0  ;;  %v503_v39 = vld [vmem:[%s440_s25] sm:$0xf] (!%p432_p13)  ;;  %s1557_s12 = sshll.u32 (!%p432_p13), %s452_s20, 4 }
  0x4f   : > { %v832_v26 = vrot.slane %v830_v23, 1  ;;  %1689 = vmatpush3.bf16.msra.mxu0 %v976_v20  ;;  %v821_v29 = vrot.slane %v807_v22, 1  ;;  %s508_s7 = scalar_select %p22_p0, 1, 0  ;;  %v836_v35 = vrot.slane %v834_v28, 1  ;;  %v662_v51 = vsel %vm602_vm0, %v2113_v18, 0 }
  0x50   : > { %v823_v31 = vrot.slane %v814_v25, 1  ;;  %1750 = vmatprep.subr.msk.bf16.mxu0 %vm602_vm0, %v1594_v24  ;;  %s1037_s10 = scalar_select %p2153_p2, 1, 0  ;;  %v504_v40 = vld [vmem:[%s440_s25 + $0x4] sm:$0xf]  ;;  %vm566_vm5 = vcmask 1040384   ;;  %v1573_v24 = vcombine.low %v2102_v12, %v2102_v12 }
  0x51   : > { %v822_v32 = vor.u32 %v821_v29, %v804_v21  ;;  %s509_s8 = scvt.s32.f32 %s508_s7  ;;  %v505_v41 = vld [vmem:[%s440_s25 + $0x8] sm:$0xf]  ;;  %v506_v42 = vld [vmem:[%s440_s25 + $0xc] sm:$0xf]  ;;  %vm567_vm6 = vsmask.f32 256 }
  0x52   : > { %v824_v34 = vor.u32 %v823_v31, %v811_v27  ;;  %s1038_s17 = scvt.s32.f32 %s1037_s10  ;;  %v1570_v57 = vld [vmem:[%s2331_s3 + $0x4] sm:$0x3]  ;;  %s454_s14 = scalar_lea.vmem [#allocation4], %s1557_s12  ;;  %vm2191_vm7 = vmand %vm566_vm5, %vm567_vm6 }
  0x53   : > { %v839_v33 = vsel %vm2137_vm4, %v822_v32, %v832_v26  ;;  %s512_s22 = sshrl.u32 %s509_s8, 16  ;;  %p511_p0 = scmp.ne.f32.partialorder %s509_s8, %s509_s8  ;;  %v1031_v59 = vld [vmem:[%s454_s14] sm:$0xf]  ;;  %v1032_v62 = vld [vmem:[%s454_s14 + $0x4] sm:$0xf]  ;;  %v722_v32 = vsel %vm602_vm0, %v1570_v57, 0 }
  0x54   : > { %1690 = vmatprep.mubr.msk.bf16.mxu0 %vm597_vm1, %v839_v33  ;;  %s513_s27 = sand.u32 1, %s512_s22  ;;  %v840_v36 = vsel %vm2137_vm4, %v824_v34, %v836_v35  ;;  %p1040_p3 = scmp.ne.f32.partialorder %s1038_s17, %s1038_s17  ;;  %v1033_v3 = vld [vmem:[%s454_s14 + $0x8] sm:$0xf]  ;;  %v1034_v7 = vld [vmem:[%s454_s14 + $0xc] sm:$0xf] }
  0x55   : > { %s514_s4 = sadd.s32 32767, %s513_s27  ;;  %s483_s20 = sand.u32 1, %s1870_s21  }
  0x56   : > { %s515_s11 = sadd.s32 %s514_s4, %s509_s8  ;;  %s1041_s8 = sshrl.u32 %s1038_s17, 16 }
  0x57   : > { %s516_s13 = sand.u32 4294901760, %s515_s11  ;;  %s1042_s19 = sand.u32 1, %s1041_s8 }
  0x58   : > { %s2380_s13 = smov (%p511_p0, %s516_s13), 2143289344  ;;  %s1043_s23 = sadd.s32 32767, %s1042_s19 }
  0x59   : > { %s519_s16 = sshrl.u32 %s2380_s13, 16  ;;  %s1044_s18 = sadd.s32 %s1043_s23, %s1038_s17 }
  0x5a   : > { %1691 = vmatmul.mubr.msk.bf16.vlgmr.msra.gmra.mrb[0].mxu0 %vm597_vm1, %v840_v36  ;;  %s520_s5 = sshll.u32 %s519_s16, 16  ;;  %s1045_s22 = sand.u32 4294901760, %s1044_s18 }
  0x5b   : > { %1695 = vmatpush3.bf16.msra.mxu0 %v1126_v37  ;;  %s521_s7 = sor.u32 %s520_s5, %s519_s16  ;;  %s2382_s22 = smov (%p1040_p3, %s1045_s22), 2143289344 }
  0x5c   : > { %1751 = vmatprep.subr.msk.bf16.mxu0 %vm602_vm0, %v2165_v38  ;;  %v522_v43 = vstv %s521_s7  ;;  %s1048_s11 = sshrl.u32 %s2382_s22, 16  ;;  %s1558_s5 = sshll.u32 %s483_s20, 5 }
  0x5d   : > { %v524_v44 = vmul.bf16 %v522_v43, %v503_v39  ;;  %v525_v45 = vmul.bf16 %v522_v43, %v504_v40  ;;  %v2171_v46 = vmul.bf16 %v522_v43, %v505_v41  ;;  %v527_v47 = vmul.bf16 %v522_v43, %v506_v42  ;;  %s1049_s13 = sshll.u32 %s1048_s11, 16  ;;  %s2268_s17 = scalar_lea.vmem [#allocation5], %s1558_s5 }
  0x5e   : > { %s1050_s10 = sor.u32 %s1049_s13, %s1048_s11  ;;  %p1603_p4 = scmp.ne.s32.totalorder %s1986_s29, 0 }
  0x5f   : > { %v1559_v48 = vcombine.low %v525_v45, %v525_v45  ;;  %v1561_v49 = vcombine.low %v524_v44, %v525_v45  ;;  %v2174_v50 = vcombine.low %v2171_v46, %v527_v47  ;;  %v1563_v52 = vcombine.low %v524_v44, %v524_v44  ;;  %v1579_v44 = vld [vmem:[%s2331_s3 + $0x6] sm:$0x3] }
  0x60   : > { %v1560_v53 = vcombine.low %v527_v47, %v527_v47  ;;  %v1051_v8 = vstv %s1050_s10  ;;  %v1564_v33 = vcombine.low %v2171_v46, %v2171_v46 }
  0x61   : > { %v551_v54 = vshrl.u32 %v1561_v49, 16  ;;  %v554_v55 = vshll.u32 %v1561_v49, 16  ;;  %1660 = vmatprep.mubr.msk.bf16.mxu1 %vm597_vm1, %v1561_v49  ;;  %v558_v56 = vshrl.u32 %v2174_v50, 16  ;;  %v561_v58 = vshll.u32 %v2174_v50, 16 }
  0x62   : > { %1661 = vmatmul.mubr.msk.bf16.vlgmr.msra.gmra.mrb[0].mxu1 %vm597_vm1, %v2174_v50  ;;  %v535_v60 = vshrl.u32 %v1559_v48, 16  ;;  %v539_v61 = vshrl.u32 %v1560_v53, 16  ;;  %v580_v5 = vshll.u32 %v1563_v52, 16  ;;  %v1053_v11 = vmul.bf16 %v1051_v8, %v1031_v59  ;;  %v1600_v59 = vld [vmem:[%s2331_s3 + $0x10] sm:$0x3] }
  0x63   : > { %1665 = vmatpush3.bf16.msra.mxu1 %v662_v51  ;;  %v553_v63 = vrot.slane %v551_v54, 7  ;;  %v560_v0 = vrot.slane %v558_v56, 7  ;;  %v571_v4 = vrot.slane %v554_v55, 1  ;;  %v1054_v13 = vmul.bf16 %v1051_v8, %v1032_v62 }
  0x64   : > { %v537_v2 = vrot.slane %v535_v60, 3  ;;  %1746 = vmatprep.subr.msk.bf16.mxu1 %vm602_vm0, %v1570_v57  ;;  %v541_v9 = vrot.slane %v539_v61, 3  ;;  %v2198_v17 = vmul.bf16 %v1051_v8, %v1033_v3  ;;  %v1056_v18 = vmul.bf16 %v1051_v8, %v1034_v7 }
  0x65   : > { %v556_v6 = vor.u32 %v554_v55, %v553_v63  ;;  %v563_v10 = vor.u32 %v561_v58, %v560_v0  ;;  %v572_v20 = vor.u32 %v571_v4, %v551_v54  ;;  %v582_v23 = vrot.slane %v580_v5, 1 }
  0x66   : > { %v1588_v26 = vcombine.low %v1054_v13, %v1054_v13  ;;  %v1590_v28 = vcombine.low %v1053_v11, %v1054_v13  ;;  %v1589_v29 = vcombine.low %v1056_v18, %v1056_v18  ;;  %v2204_v31 = vcombine.low %v2198_v17, %v1056_v18 }
  0x67   : > { %v569_v15 = vsel %vm2191_vm7, %v537_v2, %v556_v6  ;;  %v570_v37 = vsel %vm2191_vm7, %v541_v9, %v563_v10  ;;  %v592_v41 = vsel %vm2137_vm4, %v572_v20, %v582_v23  ;;  %v573_v48 = vrot.slane %v561_v58, 1 }
  0x68   : > { %1666 = vmatprep.mubr.msk.bf16.mxu1 %vm597_vm1, %v569_v15  ;;  %v1064_v34 = vshrl.u32 %v1588_v26, 16  ;;  %v1080_v35 = vshrl.u32 %v1590_v28, 16  ;;  %v1083_v36 = vshll.u32 %v1590_v28, 16  ;;  %v1068_v39 = vshrl.u32 %v1589_v29, 16 }
  0x69   : > { %v1087_v12 = vshrl.u32 %v2204_v31, 16  ;;  %v1090_v40 = vshll.u32 %v2204_v31, 16  ;;  %v584_v49 = vshll.u32 %v1564_v33, 16  ;;  %v788_v51 = vshrl.u32 %v1573_v24, 16 }
  0x6a   : > { %v1066_v42 = vrot.slane %v1064_v34, 3  ;;  %v1082_v43 = vrot.slane %v1080_v35, 7  ;;  %v1070_v45 = vrot.slane %v1068_v39, 3  ;;  %v806_v53 = vrot.slane %v804_v21, 7 }
  0x6b   : > { %v1089_v46 = vrot.slane %v1087_v12, 7  ;;  %v1188_v55 = vsel %vm602_vm0, %v2165_v38, 0  ;;  %v1592_v57 = vcombine.low %v1053_v11, %v1053_v11  ;;  %v574_v21 = vor.u32 %v573_v48, %v558_v56 }
  0x6c   : > { %v1085_v47 = vor.u32 %v1083_v36, %v1082_v43  ;;  %v586_v60 = vrot.slane %v584_v49, 1  ;;  %v790_v61 = vrot.slane %v788_v51, 3  ;;  %v809_v38 = vor.u32 %v807_v22, %v806_v53 }
  0x6d   : > { %v1092_v52 = vor.u32 %v1090_v40, %v1089_v46  ;;  %v1097_v62 = vrot.slane %v1083_v36, 1  ;;  %v1106_v63 = vshll.u32 %v1592_v57, 16  ;;  %v1574_v0 = vcombine.low %v2108_v16, %v2108_v16 }
  0x6e   : > { %1667 = vmatmul.mubr.msk.bf16.vlgmr.msra.gmra.mrb[0].mxu1 %vm597_vm1, %v570_v37  ;;  %v1095_v54 = vsel %vm2191_vm7, %v1066_v42, %v1085_v47  ;;  %v593_v2 = vsel %vm2137_vm4, %v574_v21, %v586_v60  ;;  %v850_v50 = vsel %vm602_vm0, %v1579_v44, 0  ;;  %v819_v56 = vsel %vm2191_vm7, %v790_v61, %v809_v38 }
  0x6f   : > { %1671 = vmatpush3.bf16.msra.mxu1 %v722_v32  ;;  %1672 = vmatprep.mubr.msk.bf16.mxu1 %vm597_vm1, %v592_v41  ;;  %v1096_v58 = vsel %vm2191_vm7, %v1070_v45, %v1092_v52  ;;  %v1098_v3 = vor.u32 %v1097_v62, %v1080_v35  ;;  %v1108_v4 = vrot.slane %v1106_v63, 1  ;;  %v792_v14 = vshrl.u32 %v1574_v0, 16 }
  0x70   : > { %1747 = vmatprep.subr.msk.bf16.mxu1 %vm602_vm0, %v1579_v44  ;;  %1696 = vmatprep.mubr.msk.bf16.mxu0 %vm597_vm1, %v1095_v54  ;;  %v813_v22 = vrot.slane %v811_v27, 7  ;;  %v1593_v16 = vcombine.low %v2198_v17, %v2198_v17  ;;  %v1252_v5 = vsel %vm602_vm0, %v1600_v59, 0  ;;  %v1099_v27 = vrot.slane %v1090_v40, 1 }
  0x71   : > { %1697 = vmatmul.mubr.msk.bf16.vlgmr.msra.gmra.mrb[0].mxu0 %vm597_vm1, %v1096_v58  ;;  %v1115_v6 = vsel %vm2137_vm4, %v1098_v3, %v1108_v4  ;;  %v794_v7 = vrot.slane %v792_v14, 3 }
  0x72   : > { %1701 = vmatpush3.bf16.msra.mxu0 %v1188_v55  ;;  %1702 = vmatprep.mubr.msk.bf16.mxu0 %vm597_vm1, %v1590_v28  ;;  %v816_v8 = vor.u32 %v814_v25, %v813_v22  ;;  %v1110_v9 = vshll.u32 %v1593_v16, 16  ;;  %v1100_v11 = vor.u32 %v1099_v27, %v1087_v12 }
  0x73   : > { %1752 = vmatprep.subr.msk.bf16.mxu0 %vm602_vm0, %v1600_v59 }
  0x74   : > { %v820_v10 = vsel %vm2191_vm7, %v794_v7, %v816_v8  ;;  %v1112_v13 = vrot.slane %v1110_v9, 1 }
  0x76   : > { %v1116_v15 = vsel %vm2137_vm4, %v1100_v11, %v1112_v13 }
  0x7a   : > { %1673 = vmatmul.mubr.msk.bf16.vlgmr.msra.gmra.mrb[0].mxu1 %vm597_vm1, %v593_v2 }
  0x7b   : > { %1677 = vmatpush3.bf16.msra.mxu1 %v850_v50  ;;  %1678 = vmatprep.mubr.msk.bf16.mxu1 %vm597_vm1, %v819_v56 }
  0x7d   : > { %1703 = vmatmul.mubr.msk.bf16.vlgmr.msra.gmra.mrb[0].mxu0 %vm597_vm1, %v2204_v31  ;;  %v1904_v31 = vmov (!%p1603_p4), 0.0  }
  0x7e   : > { %1707 = vmatpush3.bf16.msra.mxu0 %v1252_v5  ;;  %1708 = vmatprep.mubr.msk.bf16.mxu0 %vm597_vm1, %v1115_v6  ;;  %1315 = vst [vmem:[%s2334_s6] sm:$0x3] (!%p1603_p4), %v1904_v31 }
  0x86   : > { %1679 = vmatmul.mubr.msk.bf16.vlgmr.msra.gmra.mrb[0].mxu1 %vm597_vm1, %v820_v10 }
  0x89   : > { %1709 = vmatmul.mubr.msk.bf16.vlgmr.msra.gmra.mrb[0].mxu0 %vm597_vm1, %v1116_v15 }
 0x159   : > { %v1680_v19 = vpop.f32.mrb[0].mxu1 }
 0x15a   : > { %v886_v25 = vpop.f32.mrb[1].mxu1 }
 0x15b   : > { %v1681_v17 = vpop.f32.mrb[2].mxu1 }
 0x15c   : > { %v889_v18 = vpop.f32.mrb[3].mxu1  ;;  %v1710_v20 = vpop.f32.mrb[0].mxu0  ;;  %1314 = sbr.rel (%p1603_p4) target bundleno = 355 (0x163), region = 167 }
 0x15d   : > { %v1712_v23 = vadd.f32 %v1710_v20, %v1680_v19  ;;  %v1288_v24 = vpop.f32.mrb[1].mxu0 }
 0x15e   : > { %v1713_v1 = vadd.f32 %v1288_v24, %v886_v25  ;;  %v1711_v26 = vpop.f32.mrb[2].mxu0 }
 0x15f   : > { %1309 = vst [vmem:[%s2268_s17 + $0x10] sm:$0xff] %v1712_v23  ;;  %v1714_v30 = vadd.f32 %v1711_v26, %v1681_v17  ;;  %v1291_v28 = vpop.f32.mrb[3].mxu0 }
 0x160   : > { %1307 = vst [vmem:[%s2268_s17] sm:$0xff] %v1713_v1  ;;  %v1715_v29 = vadd.f32 %v1291_v28, %v889_v18 }
 0x161   : > { %1310 = vst [vmem:[%s2268_s17 + $0x18] sm:$0xff] %v1714_v30 }
 0x162   : > { %1308 = vst [vmem:[%s2268_s17 + $0x8] sm:$0xff] %v1715_v29 }
 0x163 PF: > { %v1317_v32 = vadd.f32 %v1715_v29, %v1713_v1  ;;  %v1329_v33 = vmul.f32 %v1713_v1, %v1713_v1  ;;  %v1330_v34 = vmul.f32 %v1715_v29, %v1715_v29  ;;  %v1331_v35 = vmul.f32 %v1712_v23, %v1712_v23  ;;  %v1316_v52 = vld [vmem:[%s2334_s6] sm:$0x1]  ;;  %v1328_v55 = vld [vmem:[%s2334_s6 + $0x1] sm:$0x1]  ;;  %s1630_s14 = sshll.u32 (%p2060_p12), %s1986_s29, 4  ;;  %s2353_s10 = sld [smem:[#allocation12_spill]] (%p2060_p12) }
 0x164   : > { %v1332_v37 = vmul.f32 %v1714_v30, %v1714_v30 }
 0x165   : > { %v1318_v36 = vadd.f32 %v1712_v23, %v1317_v32  ;;  %v1333_v39 = vadd.f32 %v1330_v34, %v1329_v33 }
 0x166   : > { %v1391_v61 = vld [vmem:[%s2268_s17 + $0x10] sm:$0xff] (%p2060_p12) }
 0x167   : > { %v1319_v12 = vadd.f32 %v1714_v30, %v1318_v36  ;;  %v1334_v40 = vadd.f32 %v1333_v39, %v1331_v35  ;;  %v1387_v21 = vld [vmem:[%s2268_s17] sm:$0xff] (%p2060_p12) }
 0x168   : > { %v1393_v38 = vld [vmem:[%s2268_s17 + $0x18] sm:$0xff] (%p2060_p12) }
 0x169   : > { %v1320_v41 = vrot.slane %v1319_v12, 4  ;;  %v1335_v42 = vadd.f32 %v1334_v40, %v1332_v37  ;;  %v1389_v60 = vld [vmem:[%s2268_s17 + $0x8] sm:$0xff] (%p2060_p12)  ;;  %s1353_s9 = scalar_lea.vmem (%p2060_p12), %s2353_s10, %s1630_s14 }
 0x16a   : > { %1388 = vst [vmem:[%s1353_s9] sm:$0xff] (%p2060_p12), %v1387_v21  ;;  %1390 = vst [vmem:[%s1353_s9 + $0x8] sm:$0xff] (%p2060_p12), %v1389_v60 }
 0x16b   : > { %v1321_v43 = vadd.f32 %v1320_v41, %v1319_v12  ;;  %v1336_v44 = vrot.slane %v1335_v42, 4  ;;  %1392 = vst [vmem:[%s1353_s9 + $0x100] sm:$0xff] (%p2060_p12), %v1391_v61  ;;  %1394 = vst [vmem:[%s1353_s9 + $0x108] sm:$0xff] (%p2060_p12), %v1393_v38 }
 0x16d   : > { %v1322_v45 = vrot.slane %v1321_v43, 2  ;;  %v1337_v46 = vadd.f32 %v1336_v44, %v1335_v42 }
 0x16f   : > { %v1323_v47 = vadd.f32 %v1322_v45, %v1321_v43  ;;  %v1338_v48 = vrot.slane %v1337_v46, 2 }
 0x171   : > { %v1324_v49 = vrot.slane %v1323_v47, 1  ;;  %v1339_v51 = vadd.f32 %v1338_v48, %v1337_v46 }
 0x173   : > { %v1325_v53 = vadd.f32 %v1324_v49, %v1323_v47  ;;  %v1340_v54 = vrot.slane %v1339_v51, 1  ;;  %1350 = sbr.rel (!%p2060_p12) target bundleno = 378 (0x17a), region = 171 }
 0x175   : > { %v1326_v57 = vadd.f32 %v1325_v53, %v1316_v52  ;;  %v1341_v58 = vadd.f32 %v1340_v54, %v1339_v51 }
 0x177   : > { %1327 = vst [vmem:[%s2334_s6] sm:$0x1] %v1326_v57  ;;  %v1342_v59 = vadd.f32 %v1341_v58, %v1328_v55 }
 0x179   : > { %1343 = vst [vmem:[%s2334_s6 + $0x1] sm:$0x1] %v1342_v59 }
 0x17a PF: > { %s2354_s21 = sld [smem:[#allocation6_spill]]  ;;  %s2355_s22 = sld [smem:[#allocation11_spill]] }
 0x17b   : > { %s2356_s15 = sld [smem:[#allocation10_spill]]  ;;  %s2357_s29 = sld [smem:[#allocation9_spill]] }
 0x17c   : > { %s2358_s27 = sld [smem:[#allocation7_spill]]  ;;  %s2359_s4 = sld [smem:[#allocation8_spill]] }
 0x17d   : > { %p14_p7 = scmp.ge.s32.totalorder %s1989_s30, 18   ;;  %s2360_s23 = smov %s1882_s24 }
 0x17e   : > { %s2362_s25 = smov %s1890_s26  ;;  %s2364_s28 = smov %s1989_s30 }
 0x17f   :  { %16 = sbr.rel (!%p14_p7) target bundleno = 7 (0x7), region = 272 }
 0x181   : > { %s2361_s24 = smov %s2356_s15  ;;  %s2363_s26 = smov %s2357_s29 }

// kernel: down_forward.4
= control target key start
LH: loop header
LB: loop body
LE: loop exit
PB: predicated region body
PF: predicated region fallthrough
CT: control target
= control target key end

     0   :  { %s3891_s0 = inlined_call_operand.vmem [shape: f32[2,16,8,256], index: 0, kind: input, shape index: {}, may-alias: {0,1,2}]   ;;  %s3892_s1 = inlined_call_operand.vmem [shape: f32[2,16,8,256], index: 1, kind: input, shape index: {}, may-alias: {0,1,2}]   ;;  %s3893_s2 = inlined_call_operand.vmem [shape: f32[2,16,8,256], index: 2, kind: input, shape index: {}, may-alias: {0,1,2}]   ;;  %s3894_s3 = inlined_call_operand.vmem [shape: bf16[3,3,128,128], index: 3, kind: input, shape index: {}]   ;;  %s3895_s4 = inlined_call_operand.vmem [shape: f32[2,128], index: 4, kind: input, shape index: {}]   ;;  %s3896_s5 = inlined_call_operand.vmem [shape: f32[2,8,8,128], index: 5, kind: output, shape index: {0}]   ;;  %s3897_s6 = inlined_call_operand.vmem [shape: f32[2,128], index: 6, kind: output, shape index: {1}]  }
   0x1   :  { %3900 = sst [smem:[#allocation10_spill]] %s3896_s5 }
   0x2   :  { %s3013_s21 = smov 0   ;;  %s3015_s22 = smov 0  }
   0x3   :  { %s3017_s23 = smov 0   ;;  %s3019_s24 = smov 0  }
   0x4   :  { %s3021_s25 = smov 0   ;;  %s3023_s26 = smov 0  }
   0x5   :  { %s3025_s27 = smov 0   ;;  %s3027_s28 = smov 0  }
   0x6   :  { %s3029_s29 = smov 0  }
   0x7 LB: > { %s3059_s30 = sadd.s32 4294967295, %s2972_s29   ;;  %s3062_s7 = sadd.s32 1, %s2972_s29   ;;  %s2972_s29 = sphi %s3029_s29, %s3912_s29   ;;  %s2968_s28 = sphi %s3027_s28, %s3923_s28   ;;  %s2964_s27 = sphi %s3025_s27, %s3922_s27   ;;  %s2960_s26 = sphi %s3023_s26, %s3921_s26   ;;  %s2956_s25 = sphi %s3021_s25, %s3920_s25   ;;  %s2952_s24 = sphi %s3019_s24, %s3919_s24   ;;  %s2948_s23 = sphi %s3017_s23, %s3918_s23   ;;  %s2944_s22 = sphi %s3015_s22, %s3917_s22   ;;  %s2940_s21 = sphi %s3013_s21, %s3916_s21  }
   0x8   : > { %3901 = sst [smem:[#allocation6_spill]] %s3062_s7  ;;  %s2095_s8 = sshll.u32 %s2972_s29, 1 }
   0x9   : > { %s36_s9 = sadd.s32 1, %s2968_s28  ;;  %s22_s10 = sadd.s32 4294967295, %s2095_s8 }
   0xa   : > { %s3066_s11 = sadd.s32 2, %s2095_s8  ;;  %p23_p0 = scmp.gt.s32.totalorder %s22_s10, 0 }
   0xb   : > { %p2096_p1 = scmp.lt.s32.totalorder %s22_s10, 15  ;;  %s28_s12 = sadd.s32 4294967295, %s3066_s11 }
   0xc   : > { %p43_p2 = scmp.ne.s32.totalorder %s2968_s28, %s2964_s27  ;;  %s3925_s10 = smov (!%p23_p0, %s22_s10), 0 }
   0xd   : > { %p29_p3 = scmp.gt.s32.totalorder %s28_s12, 0  ;;  %p2102_p4 = scmp.lt.s32.totalorder %s28_s12, 15 }
   0xe   : > { %s3927_s10 = smov (!%p2096_p1, %s3925_s10), 15  ;;  %p44_p5 = scmp.eq.s32.totalorder %s2972_s29, 0 }
   0xf   : > { %s3929_s12 = smov (!%p29_p3, %s28_s12), 0  ;;  %p60_p6 = scmp.gt.s32.totalorder %s2095_s8, 0 }
  0x10   : > { %s3931_s12 = smov (!%p2102_p4, %s3929_s12), 15  ;;  %p3076_p7 = por %p44_p5, %p43_p2 }
  0x11   : > { %p2108_p8 = scmp.lt.s32.totalorder %s2095_s8, 15  ;;  %s33_s14 = ssub.s32 %s3927_s10, %s3931_s12 }
  0x12   : > { %p65_p9 = scmp.gt.s32.totalorder %s3066_s11, 0  ;;  %p34_p10 = scmp.eq.s32.totalorder %s33_s14, 0 }
  0x13   : > { %p2114_p11 = scmp.lt.s32.totalorder %s3066_s11, 15  ;;  %s72_s18 = sadd.s32 1, %s2960_s26 }
  0x14   : > { %s61_s15 = scalar_select %p60_p6, %s2095_s8, 0 }
  0x15   : > { %s3084_s16 = scalar_select %p34_p10, %s2968_s28, %s36_s9  }
  0x16   : > { %s3933_s15 = smov (!%p2108_p8, %s61_s15), 15  ;;  %p79_p12 = scmp.ne.s32.totalorder %s2960_s26, %s2956_s25 }
  0x17   : > { %3903 = sst [smem:[#allocation7_spill]] %s3084_s16  ;;  %s96_s20 = sadd.s32 1, %s2095_s8 }
  0x18   : > { %s66_s17 = scalar_select %p65_p9, %s3066_s11, 0 }
  0x19   : > { %p3094_p13 = por %p79_p12, %p44_p5  ;;  %p97_p0 = scmp.gt.s32.totalorder %s96_s20, 0 }
  0x1a   : > { %s3935_s17 = smov (!%p2114_p11, %s66_s17), 15  ;;  %p2120_p2 = scmp.lt.s32.totalorder %s96_s20, 15 }
  0x1b   : > { %s69_s9 = ssub.s32 %s3933_s15, %s3935_s17  ;;  %s3937_s20 = smov (!%p97_p0, %s96_s20), 0 }
  0x1c   : > { %p70_p1 = scmp.eq.s32.totalorder %s69_s9, 0  ;;  %s3939_s20 = smov (!%p2120_p2, %s3937_s20), 15 }
  0x1d   : > { %s102_s14 = sadd.s32 1, %s3066_s11  ;;  %s110_s16 = sadd.s32 1, %s2952_s24 }
  0x1e   : > { %s3100_s12 = scalar_select %p70_p1, %s2960_s26, %s72_s18  }
  0x1f   : > { %p103_p3 = scmp.gt.s32.totalorder %s102_s14, 0  ;;  %p2126_p4 = scmp.lt.s32.totalorder %s102_s14, 15 }
  0x20   : > { %3905 = sst [smem:[#allocation8_spill]] %s3100_s12  ;;  %p117_p6 = scmp.ne.s32.totalorder %s2952_s24, %s2948_s23 }
  0x21   : > { %s175_s8 = ssub.s32 %s2972_s29, %s3062_s7  ;;  %s3941_s14 = smov (!%p103_p3, %s102_s14), 0 }
  0x22   : > { %p3112_p8 = por %p117_p6, %p44_p5  ;;  %p176_p9 = scmp.eq.s32.totalorder %s175_s8, 0 }
  0x23   : > { %s3943_s14 = smov (!%p2126_p4, %s3941_s14), 15  ;;  %s178_s18 = sadd.s32 1, %s2944_s22 }
  0x24   : > { %p188_p10 = scmp.ne.s32.totalorder %s2944_s22, %s2940_s21  ;;  %s107_s9 = ssub.s32 %s3939_s20, %s3943_s14 }
  0x25   : > { %p189_p11 = scmp.eq.s32.totalorder %s3059_s30, 7  ;;  %p108_p12 = scmp.eq.s32.totalorder %s107_s9, 0 }
  0x26   : > { %s3122_s11 = scalar_select %p176_p9, %s2944_s22, %s178_s18  }
  0x27   : > { %s3125_s12 = scalar_select %p108_p12, %s2952_s24, %s110_s16  }
  0x28   : > { %p3127_p0 = por %p189_p11, %p188_p10  ;;  %p2132_p5 = scmp.ge.s32.totalorder %s2972_s29, 8 }
  0x29   : > { %3907 = sst [smem:[#allocation9_spill]] %s3125_s12 }
  0x2a   : > { %238 = sbr.rel (%p2132_p5) target bundleno = 70 (0x46), region = 24 }
  0x31   : > { %241 = sbr.rel (!%p3076_p7) target bundleno = 56 (0x38), region = 28  ;;  %s243_s8 = sand.u32 (%p3076_p7), 1, %s2968_s28  }
  0x32   : > { %s2402_s14 = sshll.u32 (%p3076_p7), %s3927_s10, 4  ;;  %s2133_s7 = sshll.u32 (%p3076_p7), %s243_s8, 5 }
  0x33   : > { %s254_s16 = scalar_lea.vmem (%p3076_p7), %s3891_s0, %s2402_s14  ;;  %s245_s12 = scalar_lea.vmem (%p3076_p7), [#allocation2], %s2133_s7 }
  0x34   : > { %v267_v0 = vld [vmem:[%s254_s16] sm:$0xff] (%p3076_p7)  ;;  %v269_v1 = vld [vmem:[%s254_s16 + $0x8] sm:$0xff] (%p3076_p7) }
  0x35   : > { %v271_v2 = vld [vmem:[%s254_s16 + $0x100] sm:$0xff] (%p3076_p7)  ;;  %268 = vst [vmem:[%s245_s12] sm:$0xff] (%p3076_p7), %v267_v0  ;;  %270 = vst [vmem:[%s245_s12 + $0x8] sm:$0xff] (%p3076_p7), %v269_v1  ;;  %v273_v3 = vld [vmem:[%s254_s16 + $0x108] sm:$0xff] (%p3076_p7) }
  0x36   : > { %272 = vst [vmem:[%s245_s12 + $0x10] sm:$0xff] (%p3076_p7), %v271_v2  ;;  %274 = vst [vmem:[%s245_s12 + $0x18] sm:$0xff] (%p3076_p7), %v273_v3 }
  0x38 PF: > { %280 = sbr.rel (!%p3094_p13) target bundleno = 63 (0x3f), region = 51  ;;  %s282_s10 = sand.u32 (%p3094_p13), 1, %s2960_s26  }
  0x39   : > { %s2405_s13 = sshll.u32 (%p3094_p13), %s3933_s15, 4  ;;  %s2142_s8 = sshll.u32 (%p3094_p13), %s282_s10, 5 }
  0x3a   : > { %s292_s18 = scalar_lea.vmem (%p3094_p13), %s3892_s1, %s2405_s13  ;;  %s284_s7 = scalar_lea.vmem (%p3094_p13), [#allocation3], %s2142_s8 }
  0x3b   : > { %v305_v4 = vld [vmem:[%s292_s18] sm:$0xff] (%p3094_p13)  ;;  %v307_v5 = vld [vmem:[%s292_s18 + $0x8] sm:$0xff] (%p3094_p13) }
  0x3c   : > { %v309_v6 = vld [vmem:[%s292_s18 + $0x100] sm:$0xff] (%p3094_p13)  ;;  %306 = vst [vmem:[%s284_s7] sm:$0xff] (%p3094_p13), %v305_v4  ;;  %308 = vst [vmem:[%s284_s7 + $0x8] sm:$0xff] (%p3094_p13), %v307_v5  ;;  %v311_v7 = vld [vmem:[%s292_s18 + $0x108] sm:$0xff] (%p3094_p13) }
  0x3d   : > { %310 = vst [vmem:[%s284_s7 + $0x10] sm:$0xff] (%p3094_p13), %v309_v6  ;;  %312 = vst [vmem:[%s284_s7 + $0x18] sm:$0xff] (%p3094_p13), %v311_v7 }
  0x3f PF: > { %318 = sbr.rel (!%p3112_p8) target bundleno = 70 (0x46), region = 74  ;;  %s320_s15 = sand.u32 (%p3112_p8), 1, %s2952_s24  }
  0x40   : > { %s2408_s19 = sshll.u32 (%p3112_p8), %s3939_s20, 4  ;;  %s2151_s12 = sshll.u32 (%p3112_p8), %s320_s15, 5 }
  0x41   : > { %s331_s13 = scalar_lea.vmem (%p3112_p8), %s3893_s2, %s2408_s19  ;;  %s322_s8 = scalar_lea.vmem (%p3112_p8), [#allocation4], %s2151_s12 }
  0x42   : > { %v344_v8 = vld [vmem:[%s331_s13] sm:$0xff] (%p3112_p8)  ;;  %v346_v9 = vld [vmem:[%s331_s13 + $0x8] sm:$0xff] (%p3112_p8) }
  0x43   : > { %v348_v10 = vld [vmem:[%s331_s13 + $0x100] sm:$0xff] (%p3112_p8)  ;;  %345 = vst [vmem:[%s322_s8] sm:$0xff] (%p3112_p8), %v344_v8  ;;  %347 = vst [vmem:[%s322_s8 + $0x8] sm:$0xff] (%p3112_p8), %v346_v9  ;;  %v350_v11 = vld [vmem:[%s331_s13 + $0x108] sm:$0xff] (%p3112_p8) }
  0x44   : > { %349 = vst [vmem:[%s322_s8 + $0x10] sm:$0xff] (%p3112_p8), %v348_v10  ;;  %351 = vst [vmem:[%s322_s8 + $0x18] sm:$0xff] (%p3112_p8), %v350_v11 }
  0x46 PF: > { %p2160_p7 = scmp.ge.s32.totalorder %s2972_s29, 1  ;;  %p356_p13 = scmp.lt.s32.totalorder %s2972_s29, 9 }
  0x48   : > { %p357_p1 = pnand %p2160_p7, %p356_p13 }
  0x49   : > { %v2782_v12 = vld [vmem:[%s3894_s3 + $0x100] sm:$0xff] (!%p357_p1)   ;;  %v2974_v13 = vmov (!%p357_p1), 0.0   ;;  %v2784_v15 = vld [vmem:[%s3894_s3 + $0x108] sm:$0xff] (!%p357_p1)   ;;  %vm2975_vm0 = vmmov (!%p357_p1), 0   ;;  %v2786_v17 = vld [vmem:[%s3894_s3 + $0x110] sm:$0xff] (!%p357_p1)   ;;  %s370_s13 = sand.u32 (!%p357_p1), 1, %s2956_s25  }
  0x4a   : > { %360 = sbr.rel (%p357_p1) target bundleno = 498 (0x1f2), region = 97  ;;  %2576 = vmatprep.subr.bf16.mxu0 (!%p357_p1), %v2974_v13  ;;  %2496 = vmatprep.subr.bf16.mxu1 (!%p357_p1), %v2974_v13  ;;  %v2783_v14 = vld [vmem:[%s3894_s3 + $0x40] sm:$0xff] (!%p357_p1)   ;;  %v2785_v16 = vld [vmem:[%s3894_s3 + $0x48] sm:$0xff] (!%p357_p1)   ;;  %v2787_v18 = vld [vmem:[%s3894_s3 + $0x50] sm:$0xff] (!%p357_p1)   ;;  %s363_s8 = sand.u32 (!%p357_p1), 1, %s2964_s27   ;;  %vm593_vm8 = vcmask (!%p357_p1), 1040384  }
  0x4b   : > { %2577 = vmatpush3.bf16.msra.mxu0 (!%p357_p1), %v2782_v12  ;;  %2592 = vmatprep.mubr.msk.bf16.mxu0 (!%p357_p1), %vm2975_vm0, %v2974_v13  ;;  %v2788_v19 = vld [vmem:[%s3894_s3 + $0x118] sm:$0xff] (!%p357_p1)   ;;  %s2162_s9 = sshll.u32 (!%p357_p1), %s370_s13, 5  ;;  %s2161_s7 = sshll.u32 (!%p357_p1), %s363_s8, 5  ;;  %v2790_v21 = vld [vmem:[%s3894_s3 + $0x120] sm:$0xff] (!%p357_p1)   ;;  %v2792_v28 = vld [vmem:[%s3894_s3 + $0x128] sm:$0xff] (!%p357_p1)  }
  0x4c   : > { %2497 = vmatpush3.bf16.msra.mxu1 (!%p357_p1), %v2783_v14  ;;  %2578 = vmatprep.subr.bf16.mxu0 (!%p357_p1), %v2974_v13  ;;  %v2789_v20 = vld [vmem:[%s3894_s3 + $0x58] sm:$0xff] (!%p357_p1)   ;;  %v2791_v22 = vld [vmem:[%s3894_s3 + $0x60] sm:$0xff] (!%p357_p1)   ;;  %s3211_s13 = scalar_lea.vmem (!%p357_p1), [#allocation3], %s2162_s9  ;;  %s365_s17 = scalar_lea.vmem (!%p357_p1), [#allocation2], %s2161_s7  ;;  %v2793_v31 = vld [vmem:[%s3894_s3 + $0x68] sm:$0xff] (!%p357_p1)  }
  0x4d   : > { %2498 = vmatprep.subr.bf16.mxu1 (!%p357_p1), %v2974_v13  ;;  %2512 = vmatprep.mubr.msk.bf16.mxu1 (!%p357_p1), %vm2975_vm0, %v2974_v13  ;;  %v3204_v23 = vld [vmem:[%s3895_s4] ss:$0 sm:$0xff] (!%p357_p1)  ;;  %v3209_v24 = vld [vmem:[%s3895_s4 + $0x1] ss:$0 sm:$0xff] (!%p357_p1)  ;;  %v937_v26 = vld [vmem:[%s3211_s13 + $0x10] sm:$0xff] (!%p357_p1)  ;;  %p503_p2 = scmp.gt.s32.totalorder (!%p357_p1), %s3059_s30, 0 }
  0x4e   : > { %v935_v25 = vld [vmem:[%s3211_s13] sm:$0xff] (!%p357_p1)  ;;  %v940_v29 = vmul.f32 (!%p357_p1), %v3204_v23, %v937_v26  ;;  %v435_v33 = vld [vmem:[%s365_s17 + $0x10] sm:$0xff] (!%p357_p1)  ;;  %v434_v41 = vld [vmem:[%s365_s17 + $0x8] sm:$0xff] (!%p357_p1)  ;;  %vm594_vm7 = vsmask.f32 (!%p357_p1), 256  ;;  %s2301_s9 = sshll.u32 (!%p357_p1), %s3059_s30, 1 }
  0x4f   : > { %2579 = vmatpush3.bf16.msra.mxu0 (!%p357_p1), %v2784_v15  ;;  %v939_v27 = vmul.f32 (!%p357_p1), %v3204_v23, %v935_v25  ;;  %v433_v30 = vld [vmem:[%s365_s17] sm:$0xff] (!%p357_p1)  ;;  %v442_v36 = vmul.f32 (!%p357_p1), %v3204_v23, %v435_v33  ;;  %v2794_v39 = vld [vmem:[%s3894_s3 + $0x130] sm:$0xff] (!%p357_p1)   ;;  %v436_v47 = vld [vmem:[%s365_s17 + $0x18] sm:$0xff] (!%p357_p1)  ;;  %v511_v50 = vmul.f32 (!%p357_p1), %v3204_v23, %v434_v41  ;;  %s1486_s7 = sadd.s32 (!%p357_p1), 2, %s2301_s9  ;;  %p2377_p4 = scmp.ne.s32.totalorder (!%p357_p1), %s3059_s30, 0 }
  0x50   : > { %2499 = vmatpush3.bf16.msra.mxu1 (!%p357_p1), %v2785_v16  ;;  %2580 = vmatprep.subr.bf16.mxu0 (!%p357_p1), %v2974_v13  ;;  %v441_v34 = vmul.f32 (!%p357_p1), %v3204_v23, %v433_v30  ;;  %v942_v35 = vadd.f32 (!%p357_p1), %v3209_v24, %v940_v29  ;;  %v2795_v43 = vld [vmem:[%s3894_s3 + $0x70] sm:$0xff] (!%p357_p1)   ;;  %v2796_v51 = vld [vmem:[%s3894_s3 + $0x138] sm:$0xff] (!%p357_p1)   ;;  %v512_v56 = vmul.f32 (!%p357_p1), %v3204_v23, %v436_v47  ;;  %vm3531_vm11 = vmand (!%p357_p1), %vm593_vm8, %vm594_vm7  ;;  %p1487_p3 = scmp.le.s32.totalorder (!%p357_p1), %s1486_s7, 16 }
  0x51   : > { %2500 = vmatprep.subr.bf16.mxu1 %v2974_v13  ;;  %v941_v32 = vadd.f32 %v3209_v24, %v939_v27  ;;  %v3240_v42 = vadd.f32 %v3209_v24, %v442_v36  ;;  %v2797_v54 = vld [vmem:[%s3894_s3 + $0x78] sm:$0xff]   ;;  %v3268_v62 = vadd.f32 %v3209_v24, %v511_v50  ;;  %s3281_s16 = scalar_select %p503_p2, 1, 0 }
  0x52   : > { %v3232_v38 = vadd.f32 %v3209_v24, %v441_v34  ;;  %v3237_v40 = vmul.f32 0.70710677, %v942_v35  ;;  %v3273_v2 = vadd.f32 %v3209_v24, %v512_v56  ;;  %v3288_v11 = vmul.f32 0.5, %v942_v35 }
  0x53   : > { %2581 = vmatpush3.bf16.msra.mxu0 %v2786_v17  ;;  %v3229_v37 = vmul.f32 0.70710677, %v941_v32  ;;  %v3253_v49 = vmul.f32 0.70710677, %v3240_v42  ;;  %v3277_v7 = vmul.f32 0.70710677, %v3268_v62  ;;  %s505_s10 = scvt.s32.f32 %s3281_s16 }
  0x54   : > { %2501 = vmatpush3.bf16.msra.mxu1 %v2787_v18  ;;  %2582 = vmatprep.subr.bf16.mxu0 %v2974_v13  ;;  %v3248_v45 = vmul.f32 0.70710677, %v3232_v38  ;;  %v952_v46 = vand.u32 2147483647, %v3237_v40  ;;  %v3284_v9 = vmul.f32 0.70710677, %v3273_v2 }
  0x55   : > { %2502 = vmatprep.subr.bf16.mxu1 %v2974_v13  ;;  %v951_v44 = vand.u32 2147483647, %v3229_v37  ;;  %v458_v59 = vand.u32 2147483647, %v3253_v49  ;;  %v3286_v10 = vmul.f32 0.5, %v941_v32  ;;  %vm947_vm1 = vcmp.ge.f32.partialorder %v3229_v37, 0.0 }
  0x56   : > { %v954_v52 = vmul.f32 0.3275911, %v952_v46  ;;  %v457_v53 = vand.u32 2147483647, %v3248_v45  ;;  %v980_v60 = vsub.f32 0.0, %v952_v46  ;;  %vm948_vm2 = vcmp.ge.f32.partialorder %v3237_v40, 0.0 }
  0x57   : > { %2583 = vmatpush3.bf16.msra.mxu0 %v2788_v19  ;;  %v953_v48 = vmul.f32 0.3275911, %v951_v44  ;;  %v979_v58 = vsub.f32 0.0, %v951_v44  ;;  %v460_v63 = vmul.f32 0.3275911, %v458_v59  ;;  %v486_v6 = vsub.f32 0.0, %v458_v59 }
  0x58   : > { %2503 = vmatpush3.bf16.msra.mxu1 %v2789_v20  ;;  %2584 = vmatprep.subr.bf16.mxu0 %v2974_v13  ;;  %v956_v57 = vadd.f32 1.0, %v954_v52  ;;  %v459_v61 = vmul.f32 0.3275911, %v457_v53  ;;  %v485_v0 = vsub.f32 0.0, %v457_v53  ;;  %v982_v5 = vmul.f32 %v980_v60, %v952_v46  ;;  %v936_v37 = vld [vmem:[%s3211_s13 + $0x8] sm:$0xff] }
  0x59   : > { %2504 = vmatprep.subr.bf16.mxu1 %v2974_v13  ;;  %v955_v55 = vadd.f32 1.0, %v953_v48  ;;  %v981_v3 = vmul.f32 %v979_v58, %v951_v44  ;;  %v462_v4 = vadd.f32 1.0, %v460_v63  ;;  %v523_v12 = vand.u32 2147483647, %v3277_v7 }
  0x5a   : > { %v461_v1 = vadd.f32 1.0, %v459_v61  ;;  %v487_v8 = vmul.f32 %v485_v0, %v457_v53  ;;  %v524_v15 = vand.u32 2147483647, %v3284_v9  ;;  %v985_v16 = vmul.f32 1.442695, %v982_v5 }
  0x5b   : > { %2585 = vmatpush3.bf16.msra.mxu0 %v2790_v21  ;;  %2854 = vrcp.f32 %v955_v55  ;;  %v983_v14 = vmul.f32 1.442695, %v981_v3  ;;  %v488_v17 = vmul.f32 %v486_v6, %v458_v59  ;;  %v525_v18 = vmul.f32 0.3275911, %v523_v12  ;;  %v938_v59 = vld [vmem:[%s3211_s13 + $0x18] sm:$0xff]  ;;  %s377_s13 = sand.u32 1, %s2948_s23  }
  0x5c   : > { %2505 = vmatpush3.bf16.msra.mxu1 %v2791_v22  ;;  %2586 = vmatprep.subr.bf16.mxu0 %v2974_v13  ;;  %2856 = vrcp.f32 %v956_v57  ;;  %v489_v19 = vmul.f32 1.442695, %v487_v8  ;;  %v526_v20 = vmul.f32 0.3275911, %v524_v15  ;;  %v3296_v22 = vmul.f32 0.5, %v3232_v38  ;;  %s3391_s23 = sshll.u32 %s377_s13, 5 }
  0x5d   : > { %2506 = vmatprep.subr.bf16.mxu1 %v2974_v13  ;;  %2858 = vrcp.f32 %v461_v1  ;;  %v527_v25 = vadd.f32 1.0, %v525_v18  ;;  %v491_v30 = vmul.f32 1.442695, %v488_v17  ;;  %v551_v32 = vsub.f32 0.0, %v523_v12  ;;  %s3426_s29 = scalar_lea.vmem [#allocation4], %s3391_s23 }
  0x5e   : > { %2860 = vrcp.f32 %v462_v4  ;;  %v552_v33 = vsub.f32 0.0, %v524_v15  ;;  %v2976_v48 = vmov -1.0   ;;  %v3317_v52 = vmul.f32 0.5, %v3240_v42  ;;  %s3629_s23 = scalar_select %p1487_p3, 1, 0 }
  0x5f   : > { %2587 = vmatpush3.bf16.msra.mxu0 %v2792_v28  ;;  %v528_v28 = vadd.f32 1.0, %v526_v20  ;;  %2862 = vrcp.f32 %v527_v25  ;;  %v553_v47 = vmul.f32 %v551_v32, %v523_v12  ;;  %v3314_v50 = vsel %vm947_vm1, 1.0, %v2976_v48 }
  0x60   : > { %2507 = vmatpush3.bf16.msra.mxu1 %v2793_v31  ;;  %2588 = vmatprep.subr.bf16.mxu0 %v2974_v13  ;;  %vm453_vm3 = vcmp.ge.f32.partialorder %v3248_v45, 0.0  ;;  %v554_v58 = vmul.f32 %v552_v33, %v524_v15  ;;  %vm454_vm4 = vcmp.ge.f32.partialorder %v3253_v49, 0.0  ;;  %v999_v63 = vmul.f32 %v3204_v23, %v936_v37  ;;  %s1489_s9 = scvt.s32.f32 %s3629_s23  ;;  %s408_s23 = sand.u32 1, %s2940_s21  }
  0x61   : > { %2508 = vmatprep.subr.bf16.mxu1 %v2974_v13  ;;  %2864 = vrcp.f32 %v528_v28  ;;  %v555_v61 = vmul.f32 1.442695, %v553_v47  ;;  %v1000_v4 = vmul.f32 %v3204_v23, %v938_v59  ;;  %v3341_v12 = vstv %s505_s10 }
  0x62   : > { %2866 = vpow2.f32 %v983_v14  ;;  %v557_v18 = vmul.f32 1.442695, %v554_v58  ;;  %v455_v58 = vsel %vm453_vm3, 1.0, %v2976_v48  ;;  %vm519_vm5 = vcmp.ge.f32.partialorder %v3277_v7, 0.0 }
  0x63   : > { %2589 = vmatpush3.bf16.msra.mxu0 %v2794_v39  ;;  %2868 = vpow2.f32 %v985_v16  ;;  %v3351_v32 = vadd.f32 %v3209_v24, %v1000_v4  ;;  %vm520_vm6 = vcmp.ge.f32.partialorder %v3284_v9, 0.0 }
  0x64   : > { %2509 = vmatpush3.bf16.msra.mxu1 %v2795_v43  ;;  %2590 = vmatprep.subr.bf16.mxu0 %v2974_v13  ;;  %2870 = vpow2.f32 %v489_v19 }
  0x65   : > { %2510 = vmatprep.subr.bf16.mxu1 %v2974_v13  ;;  %v3293_v21 = vpop.eup %2854  ;;  %2872 = vpow2.f32 %v491_v30 }
  0x66   : > { %v3298_v26 = vpop.eup %2856  ;;  %v961_v27 = vmul.f32 1.0614054, %v3293_v21  ;;  %2874 = vpow2.f32 %v555_v61  ;;  %v456_v61 = vsel %vm454_vm4, 1.0, %v2976_v48 }
  0x67   : > { %2591 = vmatpush3.bf16.msra.mxu0 %v2796_v51  ;;  %v962_v29 = vmul.f32 1.0614054, %v3298_v26  ;;  %v3303_v34 = vpop.eup %2858  ;;  %2876 = vpow2.f32 %v557_v18 }
  0x68   : > { %2511 = vmatpush3.bf16.msra.mxu1 %v2797_v54  ;;  %2596 = vmatprep.subr.bf16.mxu0 %v2974_v13  ;;  %v963_v31 = vadd.f32 -1.4531521, %v961_v27  ;;  %v3305_v36 = vpop.eup %2860  ;;  %v467_v39 = vmul.f32 1.0614054, %v3303_v34  ;;  %v3322_v54 = vsel %vm948_vm2, 1.0, %v2976_v48  ;;  %v3348_v27 = vadd.f32 %v3209_v24, %v999_v63 }
  0x69   : > { %2516 = vmatprep.subr.bf16.mxu1 %v2974_v13  ;;  %v964_v35 = vadd.f32 -1.4531521, %v962_v29  ;;  %v468_v43 = vmul.f32 1.0614054, %v3305_v36  ;;  %v3334_v0 = vpop.eup %2862 }
  0x6a   : > { %v965_v38 = vmul.f32 %v3293_v21, %v963_v31  ;;  %v469_v46 = vadd.f32 -1.4531521, %v467_v39  ;;  %v533_v14 = vmul.f32 1.0614054, %v3334_v0 }
  0x6b   : > { %v966_v41 = vmul.f32 %v3298_v26, %v964_v35  ;;  %v470_v53 = vadd.f32 -1.4531521, %v468_v43  ;;  %v3337_v5 = vpop.eup %2864 }
  0x6c   : > { %v967_v44 = vadd.f32 1.4214138, %v965_v38  ;;  %v471_v56 = vmul.f32 %v3303_v34, %v469_v46  ;;  %v534_v17 = vmul.f32 1.0614054, %v3337_v5  ;;  %v535_v25 = vadd.f32 -1.4531521, %v533_v14  ;;  %v2867_v28 = vpop.eup %2866 }
  0x6d   : > { %v968_v51 = vadd.f32 1.4214138, %v966_v41  ;;  %v472_v42 = vmul.f32 %v3305_v36, %v470_v53  ;;  %v2869_v33 = vpop.eup %2868 }
  0x6e   : > { %v969_v55 = vmul.f32 %v3293_v21, %v967_v44  ;;  %v473_v40 = vadd.f32 1.4214138, %v471_v56  ;;  %v536_v31 = vadd.f32 -1.4531521, %v534_v17  ;;  %v537_v39 = vmul.f32 %v3334_v0, %v535_v25  ;;  %v2871_v46 = vpop.eup %2870 }
  0x6f   : > { %v970_v57 = vmul.f32 %v3298_v26, %v968_v51  ;;  %v474_v3 = vadd.f32 1.4214138, %v472_v42  ;;  %v3363_v42 = vmul.f32 0.70710677, %v3351_v32 }
  0x70   : > { %v971_v60 = vadd.f32 -0.28449672, %v969_v55  ;;  %v475_v8 = vmul.f32 %v3303_v34, %v473_v40  ;;  %v538_v44 = vmul.f32 %v3337_v5, %v536_v31  ;;  %v539_v53 = vadd.f32 1.4214138, %v537_v39  ;;  %v2798_v39 = vld [vmem:[%s3894_s3 + $0x140] sm:$0xff]  }
  0x71   : > { %v972_v1 = vadd.f32 -0.28449672, %v970_v57  ;;  %v476_v16 = vmul.f32 %v3305_v36, %v474_v3  ;;  %v3360_v55 = vmul.f32 0.70710677, %v3348_v27  ;;  %vm1008_vm10 = vcmp.ge.f32.partialorder %v3363_v42, 0.0 }
  0x72   : > { %v973_v6 = vmul.f32 %v3293_v21, %v971_v60  ;;  %v477_v20 = vadd.f32 -0.28449672, %v475_v8  ;;  %v540_v57 = vadd.f32 1.4214138, %v538_v44  ;;  %v541_v60 = vmul.f32 %v3334_v0, %v539_v53 }
  0x73   : > { %v974_v15 = vmul.f32 %v3298_v26, %v972_v1  ;;  %v478_v30 = vadd.f32 -0.28449672, %v476_v16  ;;  %v3380_v14 = vand.u32 2147483647, %v3360_v55  ;;  %v3384_v16 = vand.u32 2147483647, %v3363_v42 }
  0x74   : > { %v975_v19 = vadd.f32 0.2548296, %v973_v6  ;;  %v479_v38 = vmul.f32 %v3303_v34, %v477_v20  ;;  %v542_v1 = vmul.f32 %v3337_v5, %v540_v57  ;;  %v543_v45 = vadd.f32 -0.28449672, %v541_v60  ;;  %v2799_v57 = vld [vmem:[%s3894_s3] sm:$0xff]   ;;  %v2813_v42 = vld [vmem:[%s3894_s3 + $0x38] sm:$0xff]  }
  0x75   : > { %v976_v29 = vadd.f32 0.2548296, %v974_v15  ;;  %v480_v43 = vmul.f32 %v3305_v36, %v478_v30  ;;  %v516_v60 = vmul.f32 0.5, %v3273_v2  ;;  %vm1007_vm9 = vcmp.ge.f32.partialorder %v3360_v55, 0.0 }
  0x76   : > { %v977_v35 = vmul.f32 %v3293_v21, %v975_v19  ;;  %v481_v51 = vadd.f32 0.2548296, %v479_v38  ;;  %v2873_v21 = vpop.eup %2872  ;;  %v544_v8 = vadd.f32 -0.28449672, %v542_v1  ;;  %v1013_v19 = vmul.f32 0.3275911, %v3380_v14 }
  0x77   : > { %v978_v41 = vmul.f32 %v3298_v26, %v976_v29  ;;  %v482_v37 = vadd.f32 0.2548296, %v480_v43  ;;  %v2875_v20 = vpop.eup %2874  ;;  %v1014_v29 = vmul.f32 0.3275911, %v3384_v16  ;;  %v1424_v1 = vld [vmem:[%s3426_s29 + $0x8] sm:$0xff] }
  0x78   : > { %v987_v47 = vmul.f32 %v2867_v28, %v977_v35  ;;  %v483_v59 = vmul.f32 %v3303_v34, %v481_v51  ;;  %v546_v18 = vmul.f32 %v3337_v5, %v544_v8  ;;  %v2877_v30 = vpop.eup %2876  ;;  %v1015_v38 = vadd.f32 1.0, %v1013_v19  ;;  %v2801_v8 = vld [vmem:[%s3894_s3 + $0x8] sm:$0xff]   ;;  %v2804_v19 = vld [vmem:[%s3894_s3 + $0x158] sm:$0xff]  }
  0x79   : > { %v988_v56 = vmul.f32 %v2869_v33, %v978_v41  ;;  %v484_v63 = vmul.f32 %v3305_v36, %v482_v37  ;;  %v545_v36 = vmul.f32 %v3334_v0, %v543_v45  ;;  %v1016_v43 = vadd.f32 1.0, %v1014_v29 }
  0x7a   : > { %v989_v26 = vsub.f32 1.0, %v987_v47  ;;  %v493_v4 = vmul.f32 %v2871_v46, %v483_v59  ;;  %v548_v35 = vadd.f32 0.2548296, %v546_v18  ;;  %2878 = vrcp.f32 %v1015_v38 }
  0x7b   : > { %v990_v40 = vsub.f32 1.0, %v988_v56  ;;  %v494_v6 = vmul.f32 %v2873_v21, %v484_v63  ;;  %v547_v28 = vadd.f32 0.2548296, %v545_v36  ;;  %2880 = vrcp.f32 %v1016_v43  ;;  %v2802_v63 = vld [vmem:[%s3894_s3 + $0x150] sm:$0xff]  }
  0x7c   : > { %v991_v3 = vmul.f32 %v989_v26, %v3314_v50  ;;  %v495_v15 = vsub.f32 1.0, %v493_v4  ;;  %v550_v47 = vmul.f32 %v3337_v5, %v548_v35  ;;  %v521_v21 = vsel %vm519_vm5, 1.0, %v2976_v48  ;;  %v1426_v4 = vld [vmem:[%s3426_s29 + $0x18] sm:$0xff] }
  0x7d   : > { %v992_v34 = vmul.f32 %v990_v40, %v3322_v54  ;;  %v496_v17 = vsub.f32 1.0, %v494_v6  ;;  %v1039_v26 = vsub.f32 0.0, %v3380_v14  ;;  %v1040_v59 = vsub.f32 0.0, %v3384_v16 }
  0x7e   : > { %v993_v49 = vadd.f32 1.0, %v991_v3  ;;  %v497_v25 = vmul.f32 %v495_v15, %v455_v58  ;;  %v560_v56 = vmul.f32 %v2877_v30, %v550_v47  ;;  %v515_v58 = vmul.f32 0.5, %v3268_v62 }
  0x7f   : > { %v994_v50 = vadd.f32 1.0, %v992_v34  ;;  %v498_v33 = vmul.f32 %v496_v17, %v456_v61  ;;  %v1495_v62 = vmul.f32 %v3204_v23, %v1424_v1  ;;  %v1041_v2 = vmul.f32 %v1039_v26, %v3380_v14 }
  0x80   : > { %v995_v54 = vmul.f32 %v993_v49, %v3286_v10  ;;  %v499_v41 = vadd.f32 1.0, %v497_v25  ;;  %v549_v10 = vmul.f32 %v3334_v0, %v547_v28  ;;  %v2800_v0 = vld [vmem:[%s3894_s3 + $0x148] sm:$0xff]   ;;  %v1496_v34 = vmul.f32 %v3204_v23, %v1426_v4 }
  0x81   : > { %v996_v31 = vmul.f32 %v994_v50, %v3288_v11  ;;  %v500_v46 = vadd.f32 1.0, %v498_v33  ;;  %v1042_v49 = vmul.f32 %v1040_v59, %v3384_v16  ;;  %v3441_v15 = vadd.f32 %v3209_v24, %v1495_v62  ;;  %v2803_v16 = vld [vmem:[%s3894_s3 + $0x10] sm:$0xff]   ;;  %v2812_v62 = vld [vmem:[%s3894_s3 + $0x178] sm:$0xff]  }
  0x82   : > { %v501_v11 = vmul.f32 %v499_v41, %v3296_v22  ;;  %v559_v51 = vmul.f32 %v2875_v20, %v549_v10  ;;  %v522_v22 = vsel %vm520_vm6, 1.0, %v2976_v48  ;;  %v3447_v14 = vadd.f32 %v3209_v24, %v1496_v34 }
  0x83   : > { %v2411_v44 = vpack.c.bf16 %v996_v31, %v995_v54  ;;  %v502_v53 = vmul.f32 %v500_v46, %v3317_v52  ;;  %v562_v52 = vsub.f32 1.0, %v560_v56  ;;  %v3462_v54 = vmul.f32 0.70710677, %v3441_v15  ;;  %v2805_v46 = vld [vmem:[%s3894_s3 + $0x18] sm:$0xff]   ;;  %v2807_v56 = vld [vmem:[%s3894_s3 + $0x20] sm:$0xff]  }
  0x84   : > { %v507_v5 = vmul.f32 %v3341_v12, %v501_v11  ;;  %v561_v37 = vsub.f32 1.0, %v559_v51  ;;  %v3443_v36 = vpop.eup %2878  ;;  %v1043_v29 = vmul.f32 1.442695, %v1041_v2  ;;  %v3470_v30 = vmul.f32 0.70710677, %v3447_v14  ;;  %v2808_v51 = vld [vmem:[%s3894_s3 + $0x168] sm:$0xff]  }
  0x85   : > { %2593 = vmatmul.mubr.bf16.vlgmr.msra.gmra.mrb[0].mxu0 %v2411_v44  ;;  %v508_v7 = vmul.f32 %v3341_v12, %v502_v53  ;;  %v564_v40 = vmul.f32 %v562_v52, %v522_v22  ;;  %v3449_v17 = vpop.eup %2880  ;;  %v1021_v20 = vmul.f32 1.0614054, %v3443_v36  ;;  %v1045_v33 = vmul.f32 1.442695, %v1042_v49 }
  0x86   : > { %2597 = vmatpush3.bf16.msra.mxu0 %v2798_v39  ;;  %2612 = vmatprep.mubr.msk.bf16.mxu0 %vm2975_vm0, %v2974_v13  ;;  %v563_v9 = vmul.f32 %v561_v37, %v521_v21  ;;  %v1022_v28 = vmul.f32 1.0614054, %v3449_v17  ;;  %v1507_v35 = vand.u32 2147483647, %v3462_v54  ;;  %v2806_v39 = vld [vmem:[%s3894_s3 + $0x160] sm:$0xff]   ;;  %2882 = vpow2.f32 %v1043_v29 }
  0x87   : > { %2598 = vmatprep.subr.bf16.mxu0 %v2974_v13  ;;  %v2409_v61 = vpack.c.bf16 %v508_v7, %v507_v5  ;;  %v566_v45 = vadd.f32 1.0, %v564_v40  ;;  %v1023_v31 = vadd.f32 -1.4531521, %v1021_v20  ;;  %v3487_v44 = vand.u32 2147483647, %v3470_v30 }
  0x88   : > { %v565_v3 = vadd.f32 1.0, %v563_v9  ;;  %v1024_v38 = vadd.f32 -1.4531521, %v1022_v28  ;;  %2884 = vpow2.f32 %v1045_v33  ;;  %v1509_v11 = vmul.f32 0.3275911, %v1507_v35  ;;  %v2846_v33 = vld [vmem:[%s3894_s3 + $0x200] sm:$0xff]  }
  0x89   : > { %2513 = vmatmul.mubr.bf16.vlgmr.msra.gmra.mrb[0].mxu1 %v2409_v61  ;;  %v568_v50 = vmul.f32 %v566_v45, %v516_v60  ;;  %v1025_v41 = vmul.f32 %v3443_v36, %v1023_v31  ;;  %v1510_v21 = vmul.f32 0.3275911, %v3487_v44  ;;  %v2809_v61 = vld [vmem:[%s3894_s3 + $0x28] sm:$0xff]   ;;  %v1536_v4 = vsub.f32 0.0, %v3487_v44 }
  0x8a   : > { %2599 = vmatpush3.bf16.msra.mxu0 %v2800_v0  ;;  %v567_v6 = vmul.f32 %v565_v3, %v515_v58  ;;  %2517 = vmatpush3.bf16.msra.mxu1 %v2799_v57  ;;  %v1026_v43 = vmul.f32 %v3449_v17, %v1024_v38  ;;  %v1511_v22 = vadd.f32 1.0, %v1509_v11  ;;  %v2810_v57 = vld [vmem:[%s3894_s3 + $0x170] sm:$0xff]   ;;  %v1535_v58 = vsub.f32 0.0, %v1507_v35 }
  0x8b   : > { %2600 = vmatprep.subr.bf16.mxu0 %v2974_v13  ;;  %2532 = vmatprep.mubr.msk.bf16.mxu1 %vm2975_vm0, %v2974_v13  ;;  %v3465_v25 = vmul.f32 %v568_v50, %v3341_v12  ;;  %v1027_v47 = vadd.f32 1.4214138, %v1025_v41  ;;  %v1512_v52 = vadd.f32 1.0, %v1510_v21  ;;  %v2811_v50 = vld [vmem:[%s3894_s3 + $0x30] sm:$0xff]   ;;  %v1003_v20 = vmul.f32 0.5, %v3348_v27  ;;  %v1423_v41 = vld [vmem:[%s3426_s29] sm:$0xff] }
  0x8c   : > { %2518 = vmatprep.subr.bf16.mxu1 %v2974_v13  ;;  %v3452_v18 = vmul.f32 %v567_v6, %v3341_v12  ;;  %v1028_v53 = vadd.f32 1.4214138, %v1026_v43  ;;  %2886 = vrcp.f32 %v1511_v22  ;;  %v1538_v27 = vmul.f32 %v1536_v4, %v3487_v44  ;;  %v1425_v43 = vld [vmem:[%s3426_s29 + $0x10] sm:$0xff]  ;;  %s2164_s29 = sshll.u32 %s408_s23, 4 }
  0x8d   : > { %v3482_v10 = vpack.c.bf16 %v3465_v25, %v3465_v25  ;;  %v1029_v0 = vmul.f32 %v3443_v36, %v1027_v47  ;;  %2888 = vrcp.f32 %v1512_v52  ;;  %vm1503_vm12 = vcmp.ge.f32.partialorder %v3462_v54, 0.0  ;;  %v2820_v54 = vld [vmem:[%s3894_s3 + $0x198] sm:$0xff]   ;;  %s3835_s8 = scalar_lea.vmem [#allocation5], %s2164_s29 }
  0x8e   : > { %2601 = vmatpush3.bf16.msra.mxu0 %v2802_v63  ;;  %2519 = vmatpush3.bf16.msra.mxu1 %v2801_v8  ;;  %v571_v12 = vpack.c.bf16 %v3452_v18, %v3452_v18  ;;  %v1030_v37 = vmul.f32 %v3449_v17, %v1028_v53  ;;  %v1537_v8 = vmul.f32 %v1535_v58, %v1507_v35  ;;  %v1009_v35 = vsel %vm1007_vm9, 1.0, %v2976_v48 }
  0x8f   : > { %2602 = vmatprep.subr.bf16.mxu0 %v2974_v13  ;;  %2520 = vmatprep.subr.bf16.mxu1 %v2974_v13  ;;  %v578_v7 = vshrl.u32 %v3482_v10, 16  ;;  %v1031_v26 = vadd.f32 -0.28449672, %v1029_v0  ;;  %v588_v3 = vshll.u32 %v3482_v10, 16  ;;  %v1428_v53 = vmul.f32 %v3204_v23, %v1425_v43 }
  0x90   : > { %v574_v5 = vshrl.u32 %v571_v12, 16  ;;  %v1032_v9 = vadd.f32 -0.28449672, %v1030_v37  ;;  %v584_v40 = vshll.u32 %v571_v12, 16  ;;  %v2883_v2 = vpop.eup %2882  ;;  %v1541_v0 = vmul.f32 1.442695, %v1538_v27 }
  0x91   : > { %v1033_v59 = vmul.f32 %v3443_v36, %v1031_v26  ;;  %v587_v1 = vrot.slane %v578_v7, 7  ;;  %v580_v29 = vrot.slane %v578_v7, 3  ;;  %v3567_v7 = vadd.f32 %v3209_v24, %v1428_v53  ;;  %v2818_v27 = vld [vmem:[%s3894_s3 + $0x190] sm:$0xff]  }
  0x92   : > { %2603 = vmatpush3.bf16.msra.mxu0 %v2804_v19  ;;  %2521 = vmatpush3.bf16.msra.mxu1 %v2803_v16  ;;  %v583_v60 = vrot.slane %v574_v5, 7  ;;  %v1034_v63 = vmul.f32 %v3449_v17, %v1032_v9  ;;  %v576_v6 = vrot.slane %v574_v5, 3  ;;  %v2885_v49 = vpop.eup %2884  ;;  %vm1504_vm13 = vcmp.ge.f32.partialorder %v3470_v30, 0.0 }
  0x93   : > { %2604 = vmatprep.subr.bf16.mxu0 %v2974_v13  ;;  %2522 = vmatprep.subr.bf16.mxu1 %v2974_v13  ;;  %v1035_v45 = vadd.f32 0.2548296, %v1033_v59  ;;  %v590_v31 = vor.u32 %v588_v3, %v587_v1  ;;  %v3574_v59 = vmul.f32 0.70710677, %v3567_v7  ;;  %v2814_v3 = vld [vmem:[%s3894_s3 + $0x180] sm:$0xff]   ;;  %v1499_v53 = vmul.f32 0.5, %v3441_v15 }
  0x94   : > { %v1036_v34 = vadd.f32 0.2548296, %v1034_v63  ;;  %v586_v19 = vor.u32 %v584_v40, %v583_v60 }
  0x95   : > { %v1037_v16 = vmul.f32 %v3443_v36, %v1035_v45  ;;  %v1004_v36 = vmul.f32 0.5, %v3351_v32  ;;  %v597_v11 = vsel %vm3531_vm11, %v580_v29, %v590_v31  ;;  %v2819_v31 = vld [vmem:[%s3894_s3 + $0x90] sm:$0xff]   ;;  %vm1436_vm15 = vcmp.ge.f32.partialorder %v3574_v59, 0.0 }
  0x96   : > { %2605 = vmatpush3.bf16.msra.mxu0 %v2806_v39  ;;  %2523 = vmatpush3.bf16.msra.mxu1 %v2805_v46  ;;  %v1038_v28 = vmul.f32 %v3449_v17, %v1036_v34  ;;  %v1010_v17 = vsel %vm1008_vm10, 1.0, %v2976_v48  ;;  %v1539_v39 = vmul.f32 1.442695, %v1537_v8  ;;  %v3545_v10 = vpop.eup %2886  ;;  %v596_v55 = vsel %vm3531_vm11, %v576_v6, %v586_v19  ;;  %v2817_v6 = vld [vmem:[%s3894_s3 + $0x88] sm:$0xff]  }
  0x97   : > { %2606 = vmatprep.subr.bf16.mxu0 %v2974_v13  ;;  %2524 = vmatprep.subr.bf16.mxu1 %v2974_v13  ;;  %v1047_v38 = vmul.f32 %v2883_v2, %v1037_v16  ;;  %v1427_v46 = vmul.f32 %v3204_v23, %v1423_v41  ;;  %v3551_v44 = vpop.eup %2888  ;;  %v2192_v58 = vcombine.low %v596_v55, %v597_v11  ;;  %v2816_v19 = vld [vmem:[%s3894_s3 + $0x188] sm:$0xff]   ;;  %v2821_v41 = vld [vmem:[%s3894_s3 + $0x98] sm:$0xff]  }
  0x98   : > { %v1048_v12 = vmul.f32 %v2885_v49, %v1038_v28  ;;  %2890 = vpow2.f32 %v1539_v39 }
  0x99   : > { %v1049_v32 = vsub.f32 1.0, %v1047_v38  ;;  %v3563_v5 = vadd.f32 %v3209_v24, %v1427_v46  ;;  %v2815_v24 = vld [vmem:[%s3894_s3 + $0x80] sm:$0xff]   ;;  %2892 = vpow2.f32 %v1541_v0  ;;  %v1506_v46 = vsel %vm1504_vm13, 1.0, %v2976_v48 }
  0x9a   : > { %2607 = vmatpush3.bf16.msra.mxu0 %v2808_v51  ;;  %2525 = vmatpush3.bf16.msra.mxu1 %v2807_v56  ;;  %v1050_v47 = vsub.f32 1.0, %v1048_v12  ;;  %v1517_v51 = vmul.f32 1.0614054, %v3545_v10  ;;  %v1518_v56 = vmul.f32 1.0614054, %v3551_v44  ;;  %v2822_v0 = vld [vmem:[%s3894_s3 + $0x1a0] sm:$0xff]  }
  0x9b   : > { %2608 = vmatprep.subr.bf16.mxu0 %v2974_v13  ;;  %2526 = vmatprep.subr.bf16.mxu1 %v2974_v13  ;;  %v1051_v21 = vmul.f32 %v1049_v32, %v1009_v35  ;;  %v3570_v26 = vmul.f32 0.70710677, %v3563_v5 }
  0x9c   : > { %v1052_v22 = vmul.f32 %v1050_v47, %v1010_v17  ;;  %v1519_v37 = vadd.f32 -1.4531521, %v1517_v51 }
  0x9d   : > { %v1053_v52 = vadd.f32 1.0, %v1051_v21  ;;  %vm1435_vm14 = vcmp.ge.f32.partialorder %v3570_v26, 0.0 }
  0x9e   : > { %2609 = vmatpush3.bf16.msra.mxu0 %v2810_v57  ;;  %2527 = vmatpush3.bf16.msra.mxu1 %v2809_v61  ;;  %v1520_v57 = vadd.f32 -1.4531521, %v1518_v56  ;;  %v1054_v23 = vadd.f32 1.0, %v1052_v22  ;;  %v1521_v9 = vmul.f32 %v3545_v10, %v1519_v37  ;;  %v3583_v61 = vand.u32 2147483647, %v3570_v26  ;;  %v2836_v26 = vld [vmem:[%s3894_s3 + $0x1d8] sm:$0xff]  }
  0x9f   : > { %2610 = vmatprep.subr.bf16.mxu0 %v2974_v13  ;;  %2528 = vmatprep.subr.bf16.mxu1 %v2974_v13  ;;  %v3576_v60 = vmul.f32 %v1053_v52, %v1003_v20  ;;  %v1500_v22 = vmul.f32 0.5, %v3447_v14 }
  0xa0   : > { %v1522_v40 = vmul.f32 %v3551_v44, %v1520_v57  ;;  %v3585_v63 = vmul.f32 %v1054_v23, %v1004_v36  ;;  %v1523_v1 = vadd.f32 1.4214138, %v1521_v9  ;;  %v1441_v34 = vmul.f32 0.3275911, %v3583_v61 }
  0xa1   : > { %v1467_v30 = vsub.f32 0.0, %v3583_v61  ;;  %v3663_v9 = vstv %s1489_s9 }
  0xa2   : > { %2611 = vmatpush3.bf16.msra.mxu0 %v2812_v62  ;;  %2529 = vmatpush3.bf16.msra.mxu1 %v2811_v50  ;;  %v1524_v4 = vadd.f32 1.4214138, %v1522_v40  ;;  %v3593_v62 = vand.u32 2147483647, %v3574_v59  ;;  %v2412_v45 = vpack.c.bf16 %v3585_v63, %v3576_v60  ;;  %v1525_v2 = vmul.f32 %v3545_v10, %v1523_v1  ;;  %v2891_v38 = vpop.eup %2890 }
  0xa3   : > { %2616 = vmatprep.subr.bf16.mxu0 %v2974_v13  ;;  %2530 = vmatprep.subr.bf16.mxu1 %v2974_v13  ;;  %v1443_v16 = vadd.f32 1.0, %v1441_v34  ;;  %v2893_v12 = vpop.eup %2892  ;;  %v1469_v15 = vmul.f32 %v1467_v30, %v3583_v61  ;;  %v2824_v61 = vld [vmem:[%s3894_s3 + $0x1a8] sm:$0xff]   ;;  %v2410_v30 = vpack.c.bf16 %v3465_v25, %v3452_v18  ;;  %v2830_v18 = vld [vmem:[%s3894_s3 + $0x1c0] sm:$0xff]   ;;  %v1437_v59 = vsel %vm1435_vm14, 1.0, %v2976_v48 }
  0xa4   : > { %v1526_v8 = vmul.f32 %v3551_v44, %v1524_v4  ;;  %v1442_v49 = vmul.f32 0.3275911, %v3593_v62  ;;  %v1527_v50 = vadd.f32 -0.28449672, %v1525_v2  ;;  %v1468_v11 = vsub.f32 0.0, %v3593_v62 }
  0xa5   : > { %2613 = vmatmul.mubr.bf16.vlgmr.msra.gmra.mrb[0].mxu0 %v2412_v45  ;;  %2894 = vrcp.f32 %v1443_v16 }
  0xa6   : > { %2531 = vmatpush3.bf16.msra.mxu1 %v2813_v42  ;;  %2617 = vmatpush3.bf16.msra.mxu0 %v2814_v3  ;;  %v1528_v20 = vadd.f32 -0.28449672, %v1526_v8  ;;  %v1444_v28 = vadd.f32 1.0, %v1442_v49  ;;  %v1529_v29 = vmul.f32 %v3545_v10, %v1527_v50  ;;  %v1470_v14 = vmul.f32 %v1468_v11, %v3593_v62  ;;  %v2831_v11 = vld [vmem:[%s3894_s3 + $0xc0] sm:$0xff]  }
  0xa7   : > { %2536 = vmatprep.subr.bf16.mxu1 %v2974_v13  ;;  %2632 = vmatprep.mubr.msk.bf16.mxu0 %vm2975_vm0, %v2974_v13  ;;  %v1471_v62 = vmul.f32 1.442695, %v1469_v15 }
  0xa8   : > { %2618 = vmatprep.subr.bf16.mxu0 %v2974_v13  ;;  %v1530_v36 = vmul.f32 %v3551_v44, %v1528_v20  ;;  %2896 = vrcp.f32 %v1444_v28  ;;  %v1531_v35 = vadd.f32 0.2548296, %v1529_v29  ;;  %v1473_v50 = vmul.f32 1.442695, %v1470_v14  ;;  %v2826_v20 = vld [vmem:[%s3894_s3 + $0x1b0] sm:$0xff]  }
  0xa9   : > { %2533 = vmatmul.mubr.bf16.vlgmr.msra.gmra.mrb[0].mxu1 %v2192_v58  ;;  %v2825_v58 = vld [vmem:[%s3894_s3 + $0xa8] sm:$0xff]   ;;  %2898 = vpow2.f32 %v1471_v62  ;;  %v1057_v14 = vpack.c.bf16 %v3576_v60, %v3576_v60  ;;  %v1438_v60 = vsel %vm1436_vm15, 1.0, %v2976_v48 }
  0xaa   : > { %2537 = vmatpush3.bf16.msra.mxu1 %v2815_v24  ;;  %2552 = vmatprep.mubr.msk.bf16.mxu1 %vm2975_vm0, %v2974_v13  ;;  %v1532_v17 = vadd.f32 0.2548296, %v1530_v36  ;;  %v1533_v39 = vmul.f32 %v3545_v10, %v1531_v35  ;;  %v1505_v10 = vsel %vm1503_vm12, 1.0, %v2976_v48  ;;  %2900 = vpow2.f32 %v1473_v50 }
  0xab   : > { %2538 = vmatprep.subr.bf16.mxu1 %v2974_v13  ;;  %2619 = vmatpush3.bf16.msra.mxu0 %v2816_v19  ;;  %v1070_v48 = vshll.u32 %v1057_v14, 16 }
  0xac   : > { %2620 = vmatprep.subr.bf16.mxu0 %v2974_v13  ;;  %v1534_v32 = vmul.f32 %v3551_v44, %v1532_v17  ;;  %v1543_v55 = vmul.f32 %v2891_v38, %v1533_v39  ;;  %v2823_v44 = vld [vmem:[%s3894_s3 + $0xa0] sm:$0xff]  }
  0xae   : > { %2539 = vmatpush3.bf16.msra.mxu1 %v2817_v6  ;;  %v1544_v43 = vmul.f32 %v2893_v12, %v1534_v32  ;;  %v1545_v42 = vsub.f32 1.0, %v1543_v55  ;;  %v2827_v6 = vld [vmem:[%s3894_s3 + $0xb0] sm:$0xff]  }
  0xaf   : > { %2540 = vmatprep.subr.bf16.mxu1 %v2974_v13  ;;  %2621 = vmatpush3.bf16.msra.mxu0 %v2818_v27  ;;  %v3646_v51 = vpop.eup %2894  ;;  %v2829_v27 = vld [vmem:[%s3894_s3 + $0xb8] sm:$0xff]  }
  0xb0   : > { %2622 = vmatprep.subr.bf16.mxu0 %v2974_v13  ;;  %v1546_v47 = vsub.f32 1.0, %v1544_v43  ;;  %v1547_v21 = vmul.f32 %v1545_v42, %v1505_v10  ;;  %v1449_v52 = vmul.f32 1.0614054, %v3646_v51 }
  0xb2   : > { %2541 = vmatpush3.bf16.msra.mxu1 %v2819_v31  ;;  %v3650_v56 = vpop.eup %2896  ;;  %v1548_v37 = vmul.f32 %v1546_v47, %v1506_v46  ;;  %v1549_v57 = vadd.f32 1.0, %v1547_v21  ;;  %v1451_v40 = vadd.f32 -1.4531521, %v1449_v52 }
  0xb3   : > { %2542 = vmatprep.subr.bf16.mxu1 %v2974_v13  ;;  %2623 = vmatpush3.bf16.msra.mxu0 %v2820_v54  ;;  %v1450_v23 = vmul.f32 1.0614054, %v3650_v56  ;;  %v2828_v54 = vld [vmem:[%s3894_s3 + $0x1b8] sm:$0xff]   ;;  %v2899_v52 = vpop.eup %2898 }
  0xb4   : > { %2624 = vmatprep.subr.bf16.mxu0 %v2974_v13  ;;  %v1550_v24 = vadd.f32 1.0, %v1548_v37  ;;  %v1551_v1 = vmul.f32 %v1549_v57, %v1499_v53  ;;  %v1453_v45 = vmul.f32 %v3646_v51, %v1451_v40  ;;  %v2833_v37 = vld [vmem:[%s3894_s3 + $0xc8] sm:$0xff]   ;;  %v2901_v15 = vpop.eup %2900  ;;  %v2834_v40 = vld [vmem:[%s3894_s3 + $0x1d0] sm:$0xff]  }
  0xb5   : > { %v1452_v3 = vadd.f32 -1.4531521, %v1450_v23 }
  0xb6   : > { %2543 = vmatpush3.bf16.msra.mxu1 %v2821_v41  ;;  %v1552_v4 = vmul.f32 %v1550_v24, %v1500_v22  ;;  %v3673_v2 = vmul.f32 %v1551_v1, %v3663_v9  ;;  %v1455_v49 = vadd.f32 1.4214138, %v1453_v45  ;;  %v2835_v24 = vld [vmem:[%s3894_s3 + $0xd0] sm:$0xff]   ;;  %v1058_v1 = vpack.c.bf16 %v3585_v63, %v3585_v63 }
  0xb7   : > { %2544 = vmatprep.subr.bf16.mxu1 %v2974_v13  ;;  %2625 = vmatpush3.bf16.msra.mxu0 %v2822_v0  ;;  %v1454_v34 = vmul.f32 %v3650_v56, %v1452_v3  ;;  %v2837_v3 = vld [vmem:[%s3894_s3 + $0xd8] sm:$0xff]   ;;  %v1060_v63 = vshrl.u32 %v1057_v14, 16 }
  0xb8   : > { %2626 = vmatprep.subr.bf16.mxu0 %v2974_v13  ;;  %v3680_v8 = vmul.f32 %v1552_v4, %v3663_v9  ;;  %v1555_v16 = vpack.c.bf16 %v3673_v2, %v3673_v2  ;;  %v1457_v29 = vmul.f32 %v3646_v51, %v1455_v49  ;;  %v1064_v45 = vshrl.u32 %v1058_v1, 16  ;;  %v2838_v49 = vld [vmem:[%s3894_s3 + $0x1e0] sm:$0xff]  }
  0xb9   : > { %v1456_v19 = vadd.f32 1.4214138, %v1454_v34  ;;  %v2839_v34 = vld [vmem:[%s3894_s3 + $0xe0] sm:$0xff]   ;;  %v1074_v50 = vshll.u32 %v1058_v1, 16 }
  0xba   : > { %2545 = vmatpush3.bf16.msra.mxu1 %v2823_v44  ;;  %v1556_v28 = vpack.c.bf16 %v3680_v8, %v3680_v8  ;;  %v2414_v31 = vpack.c.bf16 %v3680_v8, %v3673_v2  ;;  %v1558_v36 = vshrl.u32 %v1555_v16, 16  ;;  %v1568_v35 = vshll.u32 %v1555_v16, 16  ;;  %v2841_v16 = vld [vmem:[%s3894_s3 + $0xe8] sm:$0xff]  }
  0xbb   : > { %2546 = vmatprep.subr.bf16.mxu1 %v2974_v13  ;;  %2627 = vmatpush3.bf16.msra.mxu0 %v2824_v61  ;;  %v1458_v38 = vmul.f32 %v3650_v56, %v1456_v19  ;;  %v1459_v39 = vadd.f32 -0.28449672, %v1457_v29  ;;  %v1069_v19 = vrot.slane %v1060_v63, 7  ;;  %v1432_v29 = vmul.f32 0.5, %v3567_v7 }
  0xbc   : > { %2628 = vmatprep.subr.bf16.mxu0 %v2974_v13  ;;  %v1562_v17 = vshrl.u32 %v1556_v28, 16  ;;  %v1572_v12 = vshll.u32 %v1556_v28, 16  ;;  %v1560_v41 = vrot.slane %v1558_v36, 3  ;;  %v1567_v32 = vrot.slane %v1558_v36, 7 }
  0xbd   : > { %v1460_v55 = vadd.f32 -0.28449672, %v1458_v38  ;;  %v1461_v46 = vmul.f32 %v3646_v51, %v1459_v39  ;;  %v1431_v28 = vmul.f32 0.5, %v3563_v5  ;;  %v2840_v38 = vld [vmem:[%s3894_s3 + $0x1e8] sm:$0xff]   ;;  %v1072_v39 = vor.u32 %v1070_v48, %v1069_v19 }
  0xbe   : > { %2547 = vmatpush3.bf16.msra.mxu1 %v2825_v58  ;;  %v1564_v10 = vrot.slane %v1562_v17, 3  ;;  %v1571_v43 = vrot.slane %v1562_v17, 7  ;;  %v1570_v42 = vor.u32 %v1568_v35, %v1567_v32  ;;  %v2832_v58 = vld [vmem:[%s3894_s3 + $0x1c8] sm:$0xff]   ;;  %v1062_v17 = vrot.slane %v1060_v63, 3  ;;  %v2842_v32 = vld [vmem:[%s3894_s3 + $0x1f0] sm:$0xff]  }
  0xbf   : > { %2548 = vmatprep.subr.bf16.mxu1 %v2974_v13  ;;  %2629 = vmatpush3.bf16.msra.mxu0 %v2826_v20  ;;  %v1462_v44 = vmul.f32 %v3650_v56, %v1460_v55  ;;  %v1463_v21 = vadd.f32 0.2548296, %v1461_v46  ;;  %v1073_v20 = vrot.slane %v1064_v45, 7  ;;  %v2845_v55 = vld [vmem:[%s3894_s3 + $0xf8] sm:$0xff]   ;;  %v2977_v2 = vmov (!%p2377_p4), 0.0  }
  0xc0   : > { %2630 = vmatprep.subr.bf16.mxu0 %v2974_v13  ;;  %v1574_v47 = vor.u32 %v1572_v12, %v1571_v43  ;;  %v1577_v53 = vsel %vm3531_vm11, %v1560_v41, %v1570_v42  ;;  %v1066_v12 = vrot.slane %v1064_v45, 3  ;;  %v2844_v42 = vld [vmem:[%s3894_s3 + $0x1f8] sm:$0xff]   ;;  %1927 = vst [vmem:[%s3897_s6] sm:$0x3] (!%p2377_p4), %v2977_v2 }
  0xc1   : > { %v1464_v0 = vadd.f32 0.2548296, %v1462_v44  ;;  %v1465_v57 = vmul.f32 %v3646_v51, %v1463_v21  ;;  %v1076_v5 = vor.u32 %v1074_v50, %v1073_v20  ;;  %v2851_v21 = vld [vmem:[%s3894_s3 + $0x228] sm:$0xff]  }
  0xc2   : > { %2549 = vmatpush3.bf16.msra.mxu1 %v2827_v6  ;;  %v1578_v22 = vsel %vm3531_vm11, %v1564_v10, %v1574_v47  ;;  %v2848_v47 = vld [vmem:[%s3894_s3 + $0x210] sm:$0xff]  }
  0xc3   : > { %2550 = vmatprep.subr.bf16.mxu1 %v2974_v13  ;;  %2631 = vmatpush3.bf16.msra.mxu0 %v2828_v54  ;;  %v2318_v25 = vcombine.low %v1577_v53, %v1578_v22  ;;  %v1466_v23 = vmul.f32 %v3650_v56, %v1464_v0  ;;  %v1475_v51 = vmul.f32 %v2899_v52, %v1465_v57  ;;  %v2850_v53 = vld [vmem:[%s3894_s3 + $0x220] sm:$0xff]   ;;  %v2852_v0 = vld [vmem:[%s3894_s3 + $0x230] sm:$0xff]   ;;  %v2853_v22 = vld [vmem:[%s3894_s3 + $0x238] sm:$0xff]  }
  0xc4   : > { %2636 = vmatprep.subr.bf16.mxu0 %v2974_v13  ;;  %v1079_v54 = vsel %vm3531_vm11, %v1062_v17, %v1072_v39  ;;  %v1080_v10 = vsel %vm3531_vm11, %v1066_v12, %v1076_v5 }
  0xc5   : > { %v1476_v56 = vmul.f32 %v2901_v15, %v1466_v23  ;;  %v1477_v61 = vsub.f32 1.0, %v1475_v51 }
  0xc6   : > { %2551 = vmatpush3.bf16.msra.mxu1 %v2829_v27  ;;  %2633 = vmatmul.mubr.bf16.vlgmr.msra.gmra.mrb[0].mxu0 %v2318_v25  ;;  %v2843_v27 = vld [vmem:[%s3894_s3 + $0xf0] sm:$0xff]  }
  0xc7   : > { %2556 = vmatprep.subr.bf16.mxu1 %v2974_v13  ;;  %2637 = vmatpush3.bf16.msra.mxu0 %v2830_v18  ;;  %v1478_v4 = vsub.f32 1.0, %v1476_v56  ;;  %v1479_v62 = vmul.f32 %v1477_v61, %v1437_v59 }
  0xc8   : > { %2652 = vmatprep.mubr.msk.bf16.mxu0 %vm2975_vm0, %v2974_v13  ;;  %2638 = vmatprep.subr.bf16.mxu0 %v2974_v13 }
  0xc9   : > { %2553 = vmatmul.mubr.bf16.vlgmr.msra.gmra.mrb[0].mxu1 %v2410_v30  ;;  %v1480_v6 = vmul.f32 %v1478_v4, %v1438_v60  ;;  %v1481_v36 = vadd.f32 1.0, %v1479_v62  ;;  %v2242_v30 = vcombine.low %v1079_v54, %v1080_v10 }
  0xca   : > { %2557 = vmatpush3.bf16.msra.mxu1 %v2831_v11  ;;  %2572 = vmatprep.mubr.msk.bf16.mxu1 %vm2975_vm0, %v2974_v13  ;;  %v2849_v11 = vld [vmem:[%s3894_s3 + $0x218] sm:$0xff]  }
  0xcb   : > { %2558 = vmatprep.subr.bf16.mxu1 %v2974_v13  ;;  %2639 = vmatpush3.bf16.msra.mxu0 %v2832_v58  ;;  %v1482_v35 = vadd.f32 1.0, %v1480_v6  ;;  %v1483_v7 = vmul.f32 %v1481_v36, %v1431_v28 }
  0xcc   : > { %2640 = vmatprep.subr.bf16.mxu0 %v2974_v13 }
  0xcd   : > { %v1484_v41 = vmul.f32 %v1482_v35, %v1432_v29  ;;  %v1491_v43 = vmul.f32 %v3663_v9, %v1483_v7 }
  0xce   : > { %2559 = vmatpush3.bf16.msra.mxu1 %v2833_v37 }
  0xcf   : > { %2560 = vmatprep.subr.bf16.mxu1 %v2974_v13  ;;  %2641 = vmatpush3.bf16.msra.mxu0 %v2834_v40  ;;  %v1492_v46 = vmul.f32 %v3663_v9, %v1484_v41  ;;  %v2847_v9 = vld [vmem:[%s3894_s3 + $0x208] sm:$0xff]  }
  0xd0   : > { %2642 = vmatprep.subr.bf16.mxu0 %v2974_v13 }
  0xd1   : > { %v2413_v44 = vpack.c.bf16 %v1492_v46, %v1491_v43 }
  0xd2   : > { %2561 = vmatpush3.bf16.msra.mxu1 %v2835_v24 }
  0xd3   : > { %2562 = vmatprep.subr.bf16.mxu1 %v2974_v13  ;;  %2643 = vmatpush3.bf16.msra.mxu0 %v2836_v26 }
  0xd4   : > { %2644 = vmatprep.subr.bf16.mxu0 %v2974_v13 }
  0xd6   : > { %2563 = vmatpush3.bf16.msra.mxu1 %v2837_v3 }
  0xd7   : > { %2564 = vmatprep.subr.bf16.mxu1 %v2974_v13  ;;  %2645 = vmatpush3.bf16.msra.mxu0 %v2838_v49 }
  0xd8   : > { %2646 = vmatprep.subr.bf16.mxu0 %v2974_v13 }
  0xda   : > { %2565 = vmatpush3.bf16.msra.mxu1 %v2839_v34 }
  0xdb   : > { %2566 = vmatprep.subr.bf16.mxu1 %v2974_v13  ;;  %2647 = vmatpush3.bf16.msra.mxu0 %v2840_v38 }
  0xdc   : > { %2648 = vmatprep.subr.bf16.mxu0 %v2974_v13 }
  0xde   : > { %2567 = vmatpush3.bf16.msra.mxu1 %v2841_v16 }
  0xdf   : > { %2568 = vmatprep.subr.bf16.mxu1 %v2974_v13  ;;  %2649 = vmatpush3.bf16.msra.mxu0 %v2842_v32 }
  0xe0   : > { %2650 = vmatprep.subr.bf16.mxu0 %v2974_v13 }
  0xe2   : > { %2569 = vmatpush3.bf16.msra.mxu1 %v2843_v27 }
  0xe3   : > { %2570 = vmatprep.subr.bf16.mxu1 %v2974_v13  ;;  %2651 = vmatpush3.bf16.msra.mxu0 %v2844_v42 }
  0xe4   : > { %2656 = vmatprep.subr.bf16.mxu0 %v2974_v13 }
  0xe6   : > { %2571 = vmatpush3.bf16.msra.mxu1 %v2845_v55  ;;  %2653 = vmatmul.mubr.bf16.vlgmr.msra.gmra.mrb[0].mxu0 %v2413_v44 }
  0xe7   : > { %2657 = vmatpush3.bf16.msra.mxu0 %v2846_v33  ;;  %2672 = vmatprep.mubr.msk.bf16.mxu0 %vm2975_vm0, %v2974_v13 }
  0xe8   : > { %2658 = vmatprep.subr.bf16.mxu0 %v2974_v13 }
  0xe9   : > { %2573 = vmatmul.mubr.bf16.vlgmr.msra.gmra.mrb[0].mxu1 %v2242_v30 }
  0xeb   : > { %2659 = vmatpush3.bf16.msra.mxu0 %v2847_v9 }
  0xec   : > { %2660 = vmatprep.subr.bf16.mxu0 %v2974_v13 }
  0xef   : > { %2661 = vmatpush3.bf16.msra.mxu0 %v2848_v47 }
  0xf0   : > { %2662 = vmatprep.subr.bf16.mxu0 %v2974_v13 }
  0xf3   : > { %2663 = vmatpush3.bf16.msra.mxu0 %v2849_v11 }
  0xf4   : > { %2664 = vmatprep.subr.bf16.mxu0 %v2974_v13 }
  0xf7   : > { %2665 = vmatpush3.bf16.msra.mxu0 %v2850_v53 }
  0xf8   : > { %2666 = vmatprep.subr.bf16.mxu0 %v2974_v13 }
  0xfb   : > { %2667 = vmatpush3.bf16.msra.mxu0 %v2851_v21 }
  0xfc   : > { %2668 = vmatprep.subr.bf16.mxu0 %v2974_v13 }
  0xff   : > { %2669 = vmatpush3.bf16.msra.mxu0 %v2852_v0 }
 0x100   : > { %2670 = vmatprep.subr.bf16.mxu0 %v2974_v13 }
 0x103   : > { %2671 = vmatpush3.bf16.msra.mxu0 %v2853_v22 }
 0x106   : > { %2673 = vmatmul.mubr.bf16.vlgmr.msra.gmra.mrb[0].mxu0 %v2414_v31 }
 0x1bc   : > { %v1186_v18 = vpop.f32.mrb[0].mxu1 }
 0x1bd   : > { %v2574_v25 = vpop.f32.mrb[1].mxu1 }
 0x1be   : > { %v1189_v37 = vpop.f32.mrb[2].mxu1 }
 0x1bf   : > { %v2575_v52 = vpop.f32.mrb[3].mxu1 }
 0x1d8   : > { %1926 = sbr.rel (%p2377_p4) target bundleno = 479 (0x1df), region = 113 }
 0x1d9   : > { %v1912_v57 = vpop.f32.mrb[0].mxu0 }
 0x1da   : > { %v2676_v23 = vadd.f32 %v1912_v57, %v1186_v18  ;;  %v2674_v15 = vpop.f32.mrb[1].mxu0 }
 0x1db   : > { %v1915_v58 = vpop.f32.mrb[2].mxu0 }
 0x1dc   : > { %1921 = vst [vmem:[%s3835_s8] sm:$0xff] %v2676_v23  ;;  %v2677_v13 = vadd.f32 %v1915_v58, %v1189_v37  ;;  %v2675_v24 = vpop.f32.mrb[3].mxu0 }
 0x1de   : > { %1922 = vst [vmem:[%s3835_s8 + $0x8] sm:$0xff] %v2677_v13 }
 0x1df PF: > { %v1929_v8 = vadd.f32 %v2677_v13, %v2676_v23  ;;  %v1939_v31 = vmul.f32 %v2676_v23, %v2676_v23  ;;  %v1940_v51 = vmul.f32 %v2677_v13, %v2677_v13  ;;  %v1928_v63 = vld [vmem:[%s3897_s6] sm:$0x1]  ;;  %v1938_v62 = vld [vmem:[%s3897_s6 + $0x1] sm:$0x1]  ;;  %s2379_s19 = sshll.u32 (%p3127_p0), %s3059_s30, 3  ;;  %s3911_s10 = sld [smem:[#allocation10_spill]] (%p3127_p0) }
 0x1e1   : > { %v1930_v56 = vrot.slane %v1929_v8, 4  ;;  %v1941_v40 = vadd.f32 %v1940_v51, %v1939_v31 }
 0x1e3   : > { %v1931_v14 = vadd.f32 %v1930_v56, %v1929_v8  ;;  %v1942_v1 = vrot.slane %v1941_v40, 4  ;;  %v1988_v50 = vld [vmem:[%s3835_s8] sm:$0xff] (%p3127_p0) }
 0x1e5   : > { %v1932_v3 = vrot.slane %v1931_v14, 2  ;;  %v1943_v61 = vadd.f32 %v1942_v1, %v1941_v40  ;;  %v1990_v16 = vld [vmem:[%s3835_s8 + $0x8] sm:$0xff] (%p3127_p0)  ;;  %s1958_s13 = scalar_lea.vmem (%p3127_p0), %s3911_s10, %s2379_s19 }
 0x1e6   : > { %1989 = vst [vmem:[%s1958_s13] sm:$0xff] (%p3127_p0), %v1988_v50  ;;  %1991 = vst [vmem:[%s1958_s13 + $0x40] sm:$0xff] (%p3127_p0), %v1990_v16 }
 0x1e7   : > { %v1933_v4 = vadd.f32 %v1932_v3, %v1931_v14  ;;  %v1944_v26 = vrot.slane %v1943_v61, 2 }
 0x1e9   : > { %v1934_v59 = vrot.slane %v1933_v4, 1  ;;  %v1945_v60 = vadd.f32 %v1944_v26, %v1943_v61 }
 0x1eb   : > { %v1935_v45 = vadd.f32 %v1934_v59, %v1933_v4  ;;  %v1946_v34 = vrot.slane %v1945_v60, 1  ;;  %1956 = sbr.rel (!%p3127_p0) target bundleno = 498 (0x1f2), region = 117 }
 0x1ed   : > { %v1936_v6 = vadd.f32 %v1935_v45, %v1928_v63  ;;  %v1947_v49 = vadd.f32 %v1946_v34, %v1945_v60 }
 0x1ef   : > { %1937 = vst [vmem:[%s3897_s6] sm:$0x1] %v1936_v6  ;;  %v1948_v48 = vadd.f32 %v1947_v49, %v1938_v62 }
 0x1f1   : > { %1949 = vst [vmem:[%s3897_s6 + $0x1] sm:$0x1] %v1948_v48 }
 0x1f2 PF: > { %s3912_s29 = sld [smem:[#allocation6_spill]]  ;;  %s3913_s5 = sld [smem:[#allocation9_spill]] }
 0x1f3   : > { %s3914_s20 = sld [smem:[#allocation8_spill]]  ;;  %s3915_s17 = sld [smem:[#allocation7_spill]] }
 0x1f4   : > { %s3916_s21 = smov %s2944_s22  ;;  %s3917_s22 = smov %s3122_s11 }
 0x1f5   : > { %s3918_s23 = smov %s2952_s24  ;;  %s3920_s25 = smov %s2960_s26 }
 0x1f6   : > { %s3922_s27 = smov %s2968_s28 }
 0x1f8   : > { %p14_p6 = scmp.ge.s32.totalorder %s3912_s29, 10   ;;  %s3919_s24 = smov %s3913_s5 }
 0x1f9   : > { %s3921_s26 = smov %s3914_s20  ;;  %s3923_s28 = smov %s3915_s17 }
 0x1fa   :  { %16 = sbr.rel (!%p14_p6) target bundleno = 7 (0x7), region = 218 }

</bundles_post_ra>
